<compile_context>
chip_gen: v5e
topology: v5e:2x2
jax: 0.10.0
libtpu: 0.0.40
codegen_flags: <defaults>
</compile_context>

<pallas_src>
import functools

import jax
import jax.numpy as jnp
from jax.experimental import pallas as pl
from jax.experimental.pallas import tpu as pltpu

LANE = 128


def _round_up(x, m):
    return ((x + m - 1) // m) * m


def _pick_tile(n_pad, target):
    """Largest multiple of LANE <= target that divides n_pad (n_pad % LANE == 0)."""
    t = max(LANE, min(_round_up(target, LANE), n_pad))
    while n_pad % t:
        t -= LANE
    return t


# ----------------------------- Pallas kernel --------------------------------
def _hetero_layer_kernel(rel_tab_ref, src_tab_ref, nrel_ref,            # SMEM prefetch
                         a_ref, x_ref, w_ref, ssc_ref, dsc_ref, b_ref,  # VMEM tiles
                         o_ref,                                         # VMEM output
                         acc_ref,                                       # f32 scratch
                         *, apply_relu):
    d = pl.program_id(0)            # dst node type            ("parallel")
    r = pl.program_id(2)            # relation slot            (reduction axis)
    s = pl.program_id(3)            # src row tile             (reduction axis)
    last_r = pl.num_programs(2) - 1
    last_s = pl.num_programs(3) - 1

    @pl.when(jnp.logical_and(r == 0, s == 0))
    def _init():
        acc_ref[...] = jnp.zeros_like(acc_ref)

    # Skip padded (dummy) relation slots entirely. Their block indices repeat the
    # previous slot, so no extra DMA is issued for them by the pipeline either.
    @pl.when(r < nrel_ref[d])
    def _compute():
        # msg = s_dst * (A_01 @ (s_src * (X @ W)))   == D^-1/2 A D^-1/2 X W
        xw = jnp.dot(x_ref[...], w_ref[...], preferred_element_type=jnp.float32)
        xw = (xw * ssc_ref[...]).astype(jnp.bfloat16)        # fold src-degree norm
        a = a_ref[...].astype(jnp.bfloat16)                  # int8 0/1 -> MXU bf16
        msg = jnp.dot(a, xw, preferred_element_type=jnp.float32)
        acc_ref[...] += msg * dsc_ref[...]                   # fold dst-degree norm

    @pl.when(jnp.logical_and(r == last_r, s == last_s))
    def _finalize():
        res = acc_ref[...] + b_ref[...]                      # summed per-dst-type bias
        if apply_relu:                                       # fused inter-layer ReLU
            res = jnp.maximum(res, 0.0)
        o_ref[...] = res.astype(o_ref.dtype)


def hetero_layer_pallas(a_stack, x_stack, w_stack, ssc_stack, dsc_stack, b_sum,
                        rel_tab, src_tab, nrel,
                        *, apply_relu, out_dtype, tile_dst=512, tile_src=256):
    """One dglnn.HeteroGraphConv({rel: GraphConv}, aggregate='sum') layer.

    a_stack   : (n_rels, N_pad, N_pad)       int8   raw 0/1 adjacency (dst x src)
    x_stack   : (n_types, N_pad, F_in_pad)   bf16   per-type node features
    w_stack   : (n_rels, F_in_pad, F_out_pad) bf16
    ssc_stack : (n_rels, N_pad, 1)           f32    src-degree^-1/2 per relation
    dsc_stack : (n_rels, N_pad, 1)           f32    dst-degree^-1/2 per relation
    b_sum     : (n_types, 1, F_out_pad)      f32    per-dst-type summed bias
    rel_tab   : (n_types, max_rels) int32    relation slot at (dst_type, j)
    src_tab   : (n_types, max_rels) int32    src-type index at (dst_type, j)
    nrel      : (n_types,)          int32    valid relation count per dst type
    """
    n_types, n_pad, f_in_pad = x_stack.shape
    f_out_pad = w_stack.shape[2]
    max_rels = rel_tab.shape[1]

    td = _pick_tile(n_pad, tile_dst)
    ts = _pick_tile(n_pad, tile_src)
    n_dst_tiles = n_pad // td
    n_src_tiles = n_pad // ts

    kernel = functools.partial(_hetero_layer_kernel, apply_relu=apply_relu)

    grid_spec = pltpu.PrefetchScalarGridSpec(
        num_scalar_prefetch=3,
        grid=(n_types, n_dst_tiles, max_rels, n_src_tiles),
        in_specs=[
            # A (int8 0/1): (rel, dst_tile, src_tile)
            pl.BlockSpec((None, td, ts),
                         lambda d, t, r, s, rt, st, nr: (rt[d, r], t, s)),
            # X_src: (src_type, src_tile, F_in)
            pl.BlockSpec((None, ts, f_in_pad),
                         lambda d, t, r, s, rt, st, nr: (st[d, r], s, 0)),
            # W: (rel, F_in, F_out)
            pl.BlockSpec((None, f_in_pad, f_out_pad),
                         lambda d, t, r, s, rt, st, nr: (rt[d, r], 0, 0)),
            # src-degree scale: (rel, src_tile, 1)
            pl.BlockSpec((None, ts, 1),
                         lambda d, t, r, s, rt, st, nr: (rt[d, r], s, 0)),
            # dst-degree scale: (rel, dst_tile, 1)
            pl.BlockSpec((None, td, 1),
                         lambda d, t, r, s, rt, st, nr: (rt[d, r], t, 0)),
            # per-dst-type summed bias
            pl.BlockSpec((None, 1, f_out_pad),
                         lambda d, t, r, s, rt, st, nr: (d, 0, 0)),
        ],
        out_specs=pl.BlockSpec((None, td, f_out_pad),
                               lambda d, t, r, s, rt, st, nr: (d, t, 0)),
        scratch_shapes=[pltpu.VMEM((td, f_out_pad), jnp.float32)],
    )

    out_bytes = jnp.dtype(out_dtype).itemsize
    block_bytes = (td * ts * 1                 # A tile (int8)
                   + ts * f_in_pad * 2         # X tile (bf16)
                   + f_in_pad * f_out_pad * 2  # W (bf16)
                   + ts * 4 + td * 4           # degree scales
                   + f_out_pad * 4             # bias
                   + td * f_out_pad * out_bytes)
    vmem_limit = min(2 * block_bytes + td * f_out_pad * 4 + (8 << 20), 56 << 20)

    return pl.pallas_call(
        kernel,
        out_shape=jax.ShapeDtypeStruct((n_types, n_pad, f_out_pad), out_dtype),
        grid_spec=grid_spec,
        compiler_params=pltpu.CompilerParams(
            dimension_semantics=("parallel", "parallel", "arbitrary", "arbitrary"),
            vmem_limit_bytes=int(vmem_limit)),
    )(rel_tab, src_tab, nrel, a_stack, x_stack, w_stack, ssc_stack, dsc_stack, b_sum)


# ----------------------------- glue (plain JAX) ------------------------------
def normalize_adj(a):
    """DGL GraphConv norm='both' on a bipartite relation, degrees clamped >= 1."""
    deg_src = jnp.clip(a.sum(axis=0), 1.0, None)
    deg_dst = jnp.clip(a.sum(axis=1), 1.0, None)
    return (deg_dst ** -0.5)[:, None] * a * (deg_src ** -0.5)[None, :]


def xavier_uniform(key, fan_in, fan_out):
    bound = (6.0 / (fan_in + fan_out)) ** 0.5
    return jax.random.uniform(key, (fan_in, fan_out), jnp.float32, -bound, bound)


def pad2(x, r, c):
    return jnp.pad(x, ((0, r - x.shape[0]), (0, c - x.shape[1])))


# ----------------------------- driver ----------------------------------------
if __name__ == "__main__":
    key = jax.random.PRNGKey(0)

    # Synthetic heterogeneous graph: node types 'user' (16) and 'item' (24),
    # relations: user-follow->user, user-click->item, item-clicked_by->user.
    n_user, n_item = 16, 24
    in_feats, hid_feats, out_feats = 32, 64, 16

    node_types = ["user", "item"]
    rel_names = ["follow", "click", "clicked_by"]
    rel_meta = {
        "follow": ("user", "user"),
        "click": ("user", "item"),
        "clicked_by": ("item", "user"),
    }
    n_nodes = {"user": n_user, "item": n_item}
    type_idx = {t: i for i, t in enumerate(node_types)}
    rel_idx = {r: i for i, r in enumerate(rel_names)}

    keys = jax.random.split(key, 16)
    adj_raw, adjs_norm = {}, {}
    for i, rel in enumerate(rel_names):
        s, d = rel_meta[rel]
        a = jax.random.bernoulli(
            keys[i], 0.25, (n_nodes[d], n_nodes[s])).astype(jnp.float32)
        adj_raw[rel] = a
        adjs_norm[rel] = normalize_adj(a)

    inputs = {
        "user": jax.random.normal(keys[4], (n_user, in_feats), jnp.float32),
        "item": jax.random.normal(keys[5], (n_item, in_feats), jnp.float32),
    }

    # Xavier-uniform weights, zero biases (dglnn.GraphConv defaults).
    wkeys = jax.random.split(keys[6], 2 * len(rel_names))
    w1, b1, w2, b2 = {}, {}, {}, {}
    for i, rel in enumerate(rel_names):
        w1[rel] = xavier_uniform(wkeys[2 * i], in_feats, hid_feats)
        b1[rel] = jnp.zeros((hid_feats,), jnp.float32)
        w2[rel] = xavier_uniform(wkeys[2 * i + 1], hid_feats, out_feats)
        b2[rel] = jnp.zeros((out_feats,), jnp.float32)

    # ---------------- packing: lane-dense padded stacks -----------------------
    n_pad = _round_up(max(n_nodes.values()), LANE)
    f_in_pad = _round_up(in_feats, LANE)
    f_hid_pad = _round_up(hid_feats, LANE)
    f_out_pad = _round_up(out_feats, LANE)
    n_slots = len(rel_names)                   # no dummy slot needed any more

    # Raw 0/1 adjacency (int8) + folded norm='both' degree scales (f32).
    a_stack = jnp.zeros((n_slots, n_pad, n_pad), jnp.int8)
    ssc = jnp.zeros((n_slots, n_pad, 1), jnp.float32)
    dsc = jnp.zeros((n_slots, n_pad, 1), jnp.float32)
    for rel in rel_names:
        i = rel_idx[rel]
        a = adj_raw[rel]
        a_stack = a_stack.at[i].set(pad2(a, n_pad, n_pad).astype(jnp.int8))
        s_src = jnp.clip(a.sum(axis=0), 1.0, None) ** -0.5
        s_dst = jnp.clip(a.sum(axis=1), 1.0, None) ** -0.5
        ssc = ssc.at[i, :a.shape[1], 0].set(s_src)
        dsc = dsc.at[i, :a.shape[0], 0].set(s_dst)

    x_stack = jnp.zeros((len(node_types), n_pad, f_in_pad), jnp.float32)
    for t in node_types:
        x_stack = x_stack.at[type_idx[t]].set(pad2(inputs[t], n_pad, f_in_pad))
    x_stack = x_stack.astype(jnp.bfloat16)

    def pack_params(ws, bs, fi_pad, fo_pad, fo):
        w_stack = jnp.zeros((n_slots, fi_pad, fo_pad), jnp.float32)
        b_sum = jnp.zeros((len(node_types), 1, fo_pad), jnp.float32)
        for rel in rel_names:
            w_stack = w_stack.at[rel_idx[rel]].set(pad2(ws[rel], fi_pad, fo_pad))
            d_i = type_idx[rel_meta[rel][1]]
            b_sum = b_sum.at[d_i, 0, :fo].add(bs[rel])   # aggregate='sum' folds biases
        return w_stack.astype(jnp.bfloat16), b_sum

    w1_stack, b1_sum = pack_params(w1, b1, f_in_pad, f_hid_pad, hid_feats)
    w2_stack, b2_sum = pack_params(w2, b2, f_hid_pad, f_out_pad, out_feats)

    # Per-dst-type relation schedule (scalar-prefetch tables). Dummy slots repeat
    # the previous valid slot's indices (no re-DMA) and are skipped via nrel.
    groups = {t: [] for t in node_types}
    for rel in rel_names:
        groups[rel_meta[rel][1]].append(rel)
    max_rels = max(len(g) for g in groups.values())
    rel_tab_py, src_tab_py, nrel_py = [], [], []
    for t in node_types:
        rels = groups[t]
        nrel_py.append(len(rels))
        row_r, row_s = [], []
        for j in range(max_rels):
            rel = rels[min(j, len(rels) - 1)] if rels else rel_names[0]
            row_r.append(rel_idx[rel])
            row_s.append(type_idx[rel_meta[rel][0]])
        rel_tab_py.append(row_r)
        src_tab_py.append(row_s)
    rel_tab = jnp.array(rel_tab_py, jnp.int32)
    src_tab = jnp.array(src_tab_py, jnp.int32)
    nrel = jnp.array(nrel_py, jnp.int32)

    # ---------------- forward: 2 pallas_calls total ---------------------------
    def forward(xs):
        h1 = hetero_layer_pallas(a_stack, xs, w1_stack, ssc, dsc, b1_sum,
                                 rel_tab, src_tab, nrel,
                                 apply_relu=True, out_dtype=jnp.bfloat16)
        h2 = hetero_layer_pallas(a_stack, h1, w2_stack, ssc, dsc, b2_sum,
                                 rel_tab, src_tab, nrel,
                                 apply_relu=False, out_dtype=jnp.float32)
        return h2

    out_packed = jax.block_until_ready(jax.jit(forward)(x_stack))
    out = {t: out_packed[type_idx[t], :n_nodes[t], :out_feats] for t in node_types}

    # ---------------- references ----------------------------------------------
    # (1) bf16-mirrored reference: identical math/association/casts as the kernel.
    def ref_layer_packed(xs, w_stack, b_sum, relu):
        a_bf16 = a_stack.astype(jnp.bfloat16)
        outs = []
        for d_i, t in enumerate(node_types):
            acc = jnp.zeros((n_pad, w_stack.shape[2]), jnp.float32)
            for rel in groups[t]:
                r_i = rel_idx[rel]
                s_i = type_idx[rel_meta[rel][0]]
                xw = jnp.dot(xs[s_i], w_stack[r_i],
                             preferred_element_type=jnp.float32)
                xw = (xw * ssc[r_i]).astype(jnp.bfloat16)
                msg = jnp.dot(a_bf16[r_i], xw, preferred_element_type=jnp.float32)
                acc = acc + msg * dsc[r_i]
            acc = acc + b_sum[d_i]
            if relu:
                acc = jnp.maximum(acc, 0.0)
            outs.append(acc)
        return jnp.stack(outs)

    h1_ref = ref_layer_packed(x_stack, w1_stack, b1_sum, True).astype(jnp.bfloat16)
    h2_ref = ref_layer_packed(h1_ref, w2_stack, b2_sum, False)
    assert jnp.allclose(out_packed, h2_ref, atol=3e-2, rtol=3e-2)

    # (2) f32 semantic reference (original module math), loose tolerance for bf16.
    def ref_layer_f32(feats, ws, bs):
        o = {}
        for rel in rel_names:
            s, d = rel_meta[rel]
            m = adjs_norm[rel] @ (feats[s] @ ws[rel]) + bs[rel]
            o[d] = o[d] + m if d in o else m
        return o

    r = ref_layer_f32(inputs, w1, b1)
    r = {t: jax.nn.relu(v) for t, v in r.items()}
    r = ref_layer_f32(r, w2, b2)
    for t in node_types:
        assert out[t].shape == (n_nodes[t], out_feats)
        assert jnp.allclose(out[t], r[t], atol=1e-1, rtol=1e-1)

    print("KERNEL_OK")
</pallas_src>

<mosaic_0001>
module attributes {stable_mosaic.version = 11 : i64} {
  func.func @_hetero_layer_kernel(%arg0: i32, %arg1: i32, %arg2: i32, %arg3: i32, %arg4: memref<2x2xi32, #tpu.memory_space<smem>>, %arg5: memref<2x2xi32, #tpu.memory_space<smem>>, %arg6: memref<2xi32, #tpu.memory_space<smem>>, %arg7: memref<1x128x128xi8, #tpu.memory_space<vmem>>, %arg8: memref<1x128x128xbf16, #tpu.memory_space<vmem>>, %arg9: memref<1x128x128xbf16, #tpu.memory_space<vmem>>, %arg10: memref<1x128x1xf32, #tpu.memory_space<vmem>>, %arg11: memref<1x128x1xf32, #tpu.memory_space<vmem>>, %arg12: memref<1x1x128xf32, #tpu.memory_space<vmem>>, %arg13: memref<1x128x128xbf16, #tpu.memory_space<vmem>>, %arg14: memref<128x128xf32, #tpu.memory_space<vmem>>) attributes {dimension_semantics = [#tpu.dimension_semantics<parallel>, #tpu.dimension_semantics<parallel>, #tpu.dimension_semantics<arbitrary>, #tpu.dimension_semantics<arbitrary>], iteration_bounds = array<i64: 2, 1, 2, 1>, scalar_prefetch = 3 : i64, scratch_operands = 1 : i64, tpu.core_type = #tpu.core_type<tc>, window_params = [{transform_indices = @transform_0, window_bounds = array<i64: 1, 128, 128>}, {transform_indices = @transform_1, window_bounds = array<i64: 1, 128, 128>}, {transform_indices = @transform_2, window_bounds = array<i64: 1, 128, 128>}, {transform_indices = @transform_3, window_bounds = array<i64: 1, 128, 1>}, {transform_indices = @transform_4, window_bounds = array<i64: 1, 128, 1>}, {transform_indices = @transform_5, window_bounds = array<i64: 1, 1, 128>}, {transform_indices = @transform_6, window_bounds = array<i64: 1, 128, 128>}]} {
    %c0_i32 = arith.constant 0 : i32
    %0 = arith.cmpi eq, %arg2, %c0_i32 : i32
    %c0_i32_0 = arith.constant 0 : i32
    %1 = arith.cmpi eq, %arg3, %c0_i32_0 : i32
    %2 = arith.andi %0, %1 : i1
    %3 = arith.extui %2 : i1 to i32
    %c0_i32_1 = arith.constant 0 : i32
    %4 = arith.cmpi ne, %3, %c0_i32_1 : i32
    scf.if %4 {
      %cst = arith.constant 0.000000e+00 : f32
      %15 = vector.broadcast %cst : f32 to vector<128x128xf32>
      %c0 = arith.constant 0 : index
      %c0_5 = arith.constant 0 : index
      %16 = vector.load %arg14[%c0, %c0_5] : memref<128x128xf32, #tpu.memory_space<vmem>>, vector<128x128xf32>
      tpu.vector_store %arg14[%c0, %c0_5], %15 {strides = array<i32>} : memref<128x128xf32, #tpu.memory_space<vmem>>, vector<128x128xf32>,
    } else {
    }
    %5 = arith.index_cast %arg0 : i32 to index
    %6 = memref.load %arg6[%5] : memref<2xi32, #tpu.memory_space<smem>>
    %7 = arith.cmpi slt, %arg2, %6 : i32
    %8 = arith.extui %7 : i1 to i32
    %c0_i32_2 = arith.constant 0 : i32
    %9 = arith.cmpi ne, %8, %c0_i32_2 : i32
    scf.if %9 {
      %c0 = arith.constant 0 : index
      %c0_5 = arith.constant 0 : index
      %c0_6 = arith.constant 0 : index
      %15 = vector.load %arg8[%c0, %c0_5, %c0_6] : memref<1x128x128xbf16, #tpu.memory_space<vmem>>, vector<1x128x128xbf16>
      %16 = vector.shape_cast %15 : vector<1x128x128xbf16> to vector<128x128xbf16>
      %c0_7 = arith.constant 0 : index
      %c0_8 = arith.constant 0 : index
      %c0_9 = arith.constant 0 : index
      %17 = vector.load %arg9[%c0_7, %c0_8, %c0_9] : memref<1x128x128xbf16, #tpu.memory_space<vmem>>, vector<1x128x128xbf16>
      %18 = vector.shape_cast %17 : vector<1x128x128xbf16> to vector<128x128xbf16>
      %cst = arith.constant dense<0.000000e+00> : vector<128x128xf32>
      %19 = tpu.matmul %16, %18, %cst {dimension_numbers = #tpu.dot_dimension_numbers<[1], [0], [0], [1], [0, 0, 1, 1], [], []>} : vector<128x128xbf16>, vector<128x128xbf16>, vector<128x128xf32> -> vector<128x128xf32>
      %c0_10 = arith.constant 0 : index
      %c0_11 = arith.constant 0 : index
      %c0_12 = arith.constant 0 : index
      %20 = vector.load %arg10[%c0_10, %c0_11, %c0_12] : memref<1x128x1xf32, #tpu.memory_space<vmem>>, vector<1x128x1xf32>
      %21 = vector.shape_cast %20 : vector<1x128x1xf32> to vector<128x1xf32>
      %22 = vector.broadcast %21 : vector<128x1xf32> to vector<128x128xf32>
      %23 = arith.mulf %19, %22 : vector<128x128xf32>
      %24 = arith.truncf %23 : vector<128x128xf32> to vector<128x128xbf16>
      %c0_13 = arith.constant 0 : index
      %c0_14 = arith.constant 0 : index
      %c0_15 = arith.constant 0 : index
      %25 = vector.load %arg7[%c0_13, %c0_14, %c0_15] : memref<1x128x128xi8, #tpu.memory_space<vmem>>, vector<1x128x128xi8>
      %26 = vector.shape_cast %25 : vector<1x128x128xi8> to vector<128x128xi8>
      %27 = arith.sitofp %26 : vector<128x128xi8> to vector<128x128xbf16>
      %cst_16 = arith.constant dense<0.000000e+00> : vector<128x128xf32>
      %28 = tpu.matmul %27, %24, %cst_16 {dimension_numbers = #tpu.dot_dimension_numbers<[1], [0], [0], [1], [0, 0, 1, 1], [], []>} : vector<128x128xbf16>, vector<128x128xbf16>, vector<128x128xf32> -> vector<128x128xf32>
      %c0_17 = arith.constant 0 : index
      %c0_18 = arith.constant 0 : index
      %29 = vector.load %arg14[%c0_17, %c0_18] : memref<128x128xf32, #tpu.memory_space<vmem>>, vector<128x128xf32>
      %c0_19 = arith.constant 0 : index
      %c0_20 = arith.constant 0 : index
      %c0_21 = arith.constant 0 : index
      %30 = vector.load %arg11[%c0_19, %c0_20, %c0_21] : memref<1x128x1xf32, #tpu.memory_space<vmem>>, vector<1x128x1xf32>
      %31 = vector.shape_cast %30 : vector<1x128x1xf32> to vector<128x1xf32>
      %32 = vector.broadcast %31 : vector<128x1xf32> to vector<128x128xf32>
      %33 = arith.mulf %28, %32 : vector<128x128xf32>
      %34 = arith.addf %29, %33 : vector<128x128xf32>
      %c0_22 = arith.constant 0 : index
      %c0_23 = arith.constant 0 : index
      %35 = vector.load %arg14[%c0_22, %c0_23] : memref<128x128xf32, #tpu.memory_space<vmem>>, vector<128x128xf32>
      tpu.vector_store %arg14[%c0_22, %c0_23], %34 {strides = array<i32>} : memref<128x128xf32, #tpu.memory_space<vmem>>, vector<128x128xf32>,
    } else {
    }
    %c1_i32 = arith.constant 1 : i32
    %10 = arith.cmpi eq, %arg2, %c1_i32 : i32
    %c0_i32_3 = arith.constant 0 : i32
    %11 = arith.cmpi eq, %arg3, %c0_i32_3 : i32
    %12 = arith.andi %10, %11 : i1
    %13 = arith.extui %12 : i1 to i32
    %c0_i32_4 = arith.constant 0 : i32
    %14 = arith.cmpi ne, %13, %c0_i32_4 : i32
    scf.if %14 {
      %c0 = arith.constant 0 : index
      %c0_5 = arith.constant 0 : index
      %15 = vector.load %arg14[%c0, %c0_5] : memref<128x128xf32, #tpu.memory_space<vmem>>, vector<128x128xf32>
      %c0_6 = arith.constant 0 : index
      %c0_7 = arith.constant 0 : index
      %c0_8 = arith.constant 0 : index
      %16 = vector.load %arg12[%c0_6, %c0_7, %c0_8] : memref<1x1x128xf32, #tpu.memory_space<vmem>>, vector<1x1x128xf32>
      %17 = vector.shape_cast %16 : vector<1x1x128xf32> to vector<1x128xf32>
      %18 = vector.broadcast %17 : vector<1x128xf32> to vector<128x128xf32>
      %19 = arith.addf %15, %18 : vector<128x128xf32>
      %cst = arith.constant 0.000000e+00 : f32
      %20 = vector.broadcast %cst : f32 to vector<128x128xf32>
      %21 = arith.maximumf %19, %20 : vector<128x128xf32>
      %22 = arith.truncf %21 : vector<128x128xf32> to vector<128x128xbf16>
      %c0_9 = arith.constant 0 : index
      %c0_10 = arith.constant 0 : index
      %c0_11 = arith.constant 0 : index
      %23 = vector.load %arg13[%c0_9, %c0_10, %c0_11] : memref<1x128x128xbf16, #tpu.memory_space<vmem>>, vector<1x128x128xbf16>
      %24 = vector.shape_cast %23 : vector<1x128x128xbf16> to vector<128x128xbf16>
      %25 = vector.shape_cast %22 : vector<128x128xbf16> to vector<1x128x128xbf16>
      tpu.vector_store %arg13[%c0_9, %c0_10, %c0_11], %25 {strides = array<i32>} : memref<1x128x128xbf16, #tpu.memory_space<vmem>>, vector<1x128x128xbf16>,
    } else {
    }
    return
  }
  func.func @transform_0(%arg0: i32, %arg1: i32, %arg2: i32, %arg3: i32, %arg4: memref<2x2xi32, #tpu.memory_space<smem>>, %arg5: memref<2x2xi32, #tpu.memory_space<smem>>, %arg6: memref<2xi32, #tpu.memory_space<smem>>) -> (i32, i32, i32) {
    %0 = arith.index_cast %arg0 : i32 to index
    %1 = arith.index_cast %arg2 : i32 to index
    %2 = memref.load %arg4[%0, %1] : memref<2x2xi32, #tpu.memory_space<smem>>
    %c0_i32 = arith.constant 0 : i32
    return %2, %arg1, %arg3 : i32, i32, i32
  }
  func.func @transform_1(%arg0: i32, %arg1: i32, %arg2: i32, %arg3: i32, %arg4: memref<2x2xi32, #tpu.memory_space<smem>>, %arg5: memref<2x2xi32, #tpu.memory_space<smem>>, %arg6: memref<2xi32, #tpu.memory_space<smem>>) -> (i32, i32, i32) {
    %0 = arith.index_cast %arg0 : i32 to index
    %1 = arith.index_cast %arg2 : i32 to index
    %2 = memref.load %arg5[%0, %1] : memref<2x2xi32, #tpu.memory_space<smem>>
    %c0_i32 = arith.constant 0 : i32
    %c0_i32_0 = arith.constant 0 : i32
    return %2, %arg3, %c0_i32 : i32, i32, i32
  }
  func.func @transform_2(%arg0: i32, %arg1: i32, %arg2: i32, %arg3: i32, %arg4: memref<2x2xi32, #tpu.memory_space<smem>>, %arg5: memref<2x2xi32, #tpu.memory_space<smem>>, %arg6: memref<2xi32, #tpu.memory_space<smem>>) -> (i32, i32, i32) {
    %0 = arith.index_cast %arg0 : i32 to index
    %1 = arith.index_cast %arg2 : i32 to index
    %2 = memref.load %arg4[%0, %1] : memref<2x2xi32, #tpu.memory_space<smem>>
    %c0_i32 = arith.constant 0 : i32
    %c0_i32_0 = arith.constant 0 : i32
    %c0_i32_1 = arith.constant 0 : i32
    return %2, %c0_i32, %c0_i32_0 : i32, i32, i32
  }
  func.func @transform_3(%arg0: i32, %arg1: i32, %arg2: i32, %arg3: i32, %arg4: memref<2x2xi32, #tpu.memory_space<smem>>, %arg5: memref<2x2xi32, #tpu.memory_space<smem>>, %arg6: memref<2xi32, #tpu.memory_space<smem>>) -> (i32, i32, i32) {
    %0 = arith.index_cast %arg0 : i32 to index
    %1 = arith.index_cast %arg2 : i32 to index
    %2 = memref.load %arg4[%0, %1] : memref<2x2xi32, #tpu.memory_space<smem>>
    %c0_i32 = arith.constant 0 : i32
    %c0_i32_0 = arith.constant 0 : i32
    return %2, %arg3, %c0_i32 : i32, i32, i32
  }
  func.func @transform_4(%arg0: i32, %arg1: i32, %arg2: i32, %arg3: i32, %arg4: memref<2x2xi32, #tpu.memory_space<smem>>, %arg5: memref<2x2xi32, #tpu.memory_space<smem>>, %arg6: memref<2xi32, #tpu.memory_space<smem>>) -> (i32, i32, i32) {
    %0 = arith.index_cast %arg0 : i32 to index
    %1 = arith.index_cast %arg2 : i32 to index
    %2 = memref.load %arg4[%0, %1] : memref<2x2xi32, #tpu.memory_space<smem>>
    %c0_i32 = arith.constant 0 : i32
    %c0_i32_0 = arith.constant 0 : i32
    return %2, %arg1, %c0_i32 : i32, i32, i32
  }
  func.func @transform_5(%arg0: i32, %arg1: i32, %arg2: i32, %arg3: i32, %arg4: memref<2x2xi32, #tpu.memory_space<smem>>, %arg5: memref<2x2xi32, #tpu.memory_space<smem>>, %arg6: memref<2xi32, #tpu.memory_space<smem>>) -> (i32, i32, i32) {
    %c0_i32 = arith.constant 0 : i32
    %c0_i32_0 = arith.constant 0 : i32
    %c0_i32_1 = arith.constant 0 : i32
    return %arg0, %c0_i32, %c0_i32_0 : i32, i32, i32
  }
  func.func @transform_6(%arg0: i32, %arg1: i32, %arg2: i32, %arg3: i32, %arg4: memref<2x2xi32, #tpu.memory_space<smem>>, %arg5: memref<2x2xi32, #tpu.memory_space<smem>>, %arg6: memref<2xi32, #tpu.memory_space<smem>>) -> (i32, i32, i32) {
    %c0_i32 = arith.constant 0 : i32
    %c0_i32_0 = arith.constant 0 : i32
    return %arg0, %arg1, %c0_i32 : i32, i32, i32
  }
}

module attributes {stable_mosaic.version = 11 : i64} {
  func.func @_hetero_layer_kernel(%arg0: i32, %arg1: i32, %arg2: i32, %arg3: i32, %arg4: memref<2x2xi32, #tpu.memory_space<smem>>, %arg5: memref<2x2xi32, #tpu.memory_space<smem>>, %arg6: memref<2xi32, #tpu.memory_space<smem>>, %arg7: memref<1x128x128xi8, #tpu.memory_space<vmem>>, %arg8: memref<1x128x128xbf16, #tpu.memory_space<vmem>>, %arg9: memref<1x128x128xbf16, #tpu.memory_space<vmem>>, %arg10: memref<1x128x1xf32, #tpu.memory_space<vmem>>, %arg11: memref<1x128x1xf32, #tpu.memory_space<vmem>>, %arg12: memref<1x1x128xf32, #tpu.memory_space<vmem>>, %arg13: memref<1x128x128xf32, #tpu.memory_space<vmem>>, %arg14: memref<128x128xf32, #tpu.memory_space<vmem>>) attributes {dimension_semantics = [#tpu.dimension_semantics<parallel>, #tpu.dimension_semantics<parallel>, #tpu.dimension_semantics<arbitrary>, #tpu.dimension_semantics<arbitrary>], iteration_bounds = array<i64: 2, 1, 2, 1>, scalar_prefetch = 3 : i64, scratch_operands = 1 : i64, tpu.core_type = #tpu.core_type<tc>, window_params = [{transform_indices = @transform_0, window_bounds = array<i64: 1, 128, 128>}, {transform_indices = @transform_1, window_bounds = array<i64: 1, 128, 128>}, {transform_indices = @transform_2, window_bounds = array<i64: 1, 128, 128>}, {transform_indices = @transform_3, window_bounds = array<i64: 1, 128, 1>}, {transform_indices = @transform_4, window_bounds = array<i64: 1, 128, 1>}, {transform_indices = @transform_5, window_bounds = array<i64: 1, 1, 128>}, {transform_indices = @transform_6, window_bounds = array<i64: 1, 128, 128>}]} {
    %c0_i32 = arith.constant 0 : i32
    %0 = arith.cmpi eq, %arg2, %c0_i32 : i32
    %c0_i32_0 = arith.constant 0 : i32
    %1 = arith.cmpi eq, %arg3, %c0_i32_0 : i32
    %2 = arith.andi %0, %1 : i1
    %3 = arith.extui %2 : i1 to i32
    %c0_i32_1 = arith.constant 0 : i32
    %4 = arith.cmpi ne, %3, %c0_i32_1 : i32
    scf.if %4 {
      %cst = arith.constant 0.000000e+00 : f32
      %15 = vector.broadcast %cst : f32 to vector<128x128xf32>
      %c0 = arith.constant 0 : index
      %c0_5 = arith.constant 0 : index
      %16 = vector.load %arg14[%c0, %c0_5] : memref<128x128xf32, #tpu.memory_space<vmem>>, vector<128x128xf32>
      tpu.vector_store %arg14[%c0, %c0_5], %15 {strides = array<i32>} : memref<128x128xf32, #tpu.memory_space<vmem>>, vector<128x128xf32>,
    } else {
    }
    %5 = arith.index_cast %arg0 : i32 to index
    %6 = memref.load %arg6[%5] : memref<2xi32, #tpu.memory_space<smem>>
    %7 = arith.cmpi slt, %arg2, %6 : i32
    %8 = arith.extui %7 : i1 to i32
    %c0_i32_2 = arith.constant 0 : i32
    %9 = arith.cmpi ne, %8, %c0_i32_2 : i32
    scf.if %9 {
      %c0 = arith.constant 0 : index
      %c0_5 = arith.constant 0 : index
      %c0_6 = arith.constant 0 : index
      %15 = vector.load %arg8[%c0, %c0_5, %c0_6] : memref<1x128x128xbf16, #tpu.memory_space<vmem>>, vector<1x128x128xbf16>
      %16 = vector.shape_cast %15 : vector<1x128x128xbf16> to vector<128x128xbf16>
      %c0_7 = arith.constant 0 : index
      %c0_8 = arith.constant 0 : index
      %c0_9 = arith.constant 0 : index
      %17 = vector.load %arg9[%c0_7, %c0_8, %c0_9] : memref<1x128x128xbf16, #tpu.memory_space<vmem>>, vector<1x128x128xbf16>
      %18 = vector.shape_cast %17 : vector<1x128x128xbf16> to vector<128x128xbf16>
      %cst = arith.constant dense<0.000000e+00> : vector<128x128xf32>
      %19 = tpu.matmul %16, %18, %cst {dimension_numbers = #tpu.dot_dimension_numbers<[1], [0], [0], [1], [0, 0, 1, 1], [], []>} : vector<128x128xbf16>, vector<128x128xbf16>, vector<128x128xf32> -> vector<128x128xf32>
      %c0_10 = arith.constant 0 : index
      %c0_11 = arith.constant 0 : index
      %c0_12 = arith.constant 0 : index
      %20 = vector.load %arg10[%c0_10, %c0_11, %c0_12] : memref<1x128x1xf32, #tpu.memory_space<vmem>>, vector<1x128x1xf32>
      %21 = vector.shape_cast %20 : vector<1x128x1xf32> to vector<128x1xf32>
      %22 = vector.broadcast %21 : vector<128x1xf32> to vector<128x128xf32>
      %23 = arith.mulf %19, %22 : vector<128x128xf32>
      %24 = arith.truncf %23 : vector<128x128xf32> to vector<128x128xbf16>
      %c0_13 = arith.constant 0 : index
      %c0_14 = arith.constant 0 : index
      %c0_15 = arith.constant 0 : index
      %25 = vector.load %arg7[%c0_13, %c0_14, %c0_15] : memref<1x128x128xi8, #tpu.memory_space<vmem>>, vector<1x128x128xi8>
      %26 = vector.shape_cast %25 : vector<1x128x128xi8> to vector<128x128xi8>
      %27 = arith.sitofp %26 : vector<128x128xi8> to vector<128x128xbf16>
      %cst_16 = arith.constant dense<0.000000e+00> : vector<128x128xf32>
      %28 = tpu.matmul %27, %24, %cst_16 {dimension_numbers = #tpu.dot_dimension_numbers<[1], [0], [0], [1], [0, 0, 1, 1], [], []>} : vector<128x128xbf16>, vector<128x128xbf16>, vector<128x128xf32> -> vector<128x128xf32>
      %c0_17 = arith.constant 0 : index
      %c0_18 = arith.constant 0 : index
      %29 = vector.load %arg14[%c0_17, %c0_18] : memref<128x128xf32, #tpu.memory_space<vmem>>, vector<128x128xf32>
      %c0_19 = arith.constant 0 : index
      %c0_20 = arith.constant 0 : index
      %c0_21 = arith.constant 0 : index
      %30 = vector.load %arg11[%c0_19, %c0_20, %c0_21] : memref<1x128x1xf32, #tpu.memory_space<vmem>>, vector<1x128x1xf32>
      %31 = vector.shape_cast %30 : vector<1x128x1xf32> to vector<128x1xf32>
      %32 = vector.broadcast %31 : vector<128x1xf32> to vector<128x128xf32>
      %33 = arith.mulf %28, %32 : vector<128x128xf32>
      %34 = arith.addf %29, %33 : vector<128x128xf32>
      %c0_22 = arith.constant 0 : index
      %c0_23 = arith.constant 0 : index
      %35 = vector.load %arg14[%c0_22, %c0_23] : memref<128x128xf32, #tpu.memory_space<vmem>>, vector<128x128xf32>
      tpu.vector_store %arg14[%c0_22, %c0_23], %34 {strides = array<i32>} : memref<128x128xf32, #tpu.memory_space<vmem>>, vector<128x128xf32>,
    } else {
    }
    %c1_i32 = arith.constant 1 : i32
    %10 = arith.cmpi eq, %arg2, %c1_i32 : i32
    %c0_i32_3 = arith.constant 0 : i32
    %11 = arith.cmpi eq, %arg3, %c0_i32_3 : i32
    %12 = arith.andi %10, %11 : i1
    %13 = arith.extui %12 : i1 to i32
    %c0_i32_4 = arith.constant 0 : i32
    %14 = arith.cmpi ne, %13, %c0_i32_4 : i32
    scf.if %14 {
      %c0 = arith.constant 0 : index
      %c0_5 = arith.constant 0 : index
      %15 = vector.load %arg14[%c0, %c0_5] : memref<128x128xf32, #tpu.memory_space<vmem>>, vector<128x128xf32>
      %c0_6 = arith.constant 0 : index
      %c0_7 = arith.constant 0 : index
      %c0_8 = arith.constant 0 : index
      %16 = vector.load %arg12[%c0_6, %c0_7, %c0_8] : memref<1x1x128xf32, #tpu.memory_space<vmem>>, vector<1x1x128xf32>
      %17 = vector.shape_cast %16 : vector<1x1x128xf32> to vector<1x128xf32>
      %18 = vector.broadcast %17 : vector<1x128xf32> to vector<128x128xf32>
      %19 = arith.addf %15, %18 : vector<128x128xf32>
      %c0_9 = arith.constant 0 : index
      %c0_10 = arith.constant 0 : index
      %c0_11 = arith.constant 0 : index
      %20 = vector.load %arg13[%c0_9, %c0_10, %c0_11] : memref<1x128x128xf32, #tpu.memory_space<vmem>>, vector<1x128x128xf32>
      %21 = vector.shape_cast %20 : vector<1x128x128xf32> to vector<128x128xf32>
      %22 = vector.shape_cast %19 : vector<128x128xf32> to vector<1x128x128xf32>
      tpu.vector_store %arg13[%c0_9, %c0_10, %c0_11], %22 {strides = array<i32>} : memref<1x128x128xf32, #tpu.memory_space<vmem>>, vector<1x128x128xf32>,
    } else {
    }
    return
  }
  func.func @transform_0(%arg0: i32, %arg1: i32, %arg2: i32, %arg3: i32, %arg4: memref<2x2xi32, #tpu.memory_space<smem>>, %arg5: memref<2x2xi32, #tpu.memory_space<smem>>, %arg6: memref<2xi32, #tpu.memory_space<smem>>) -> (i32, i32, i32) {
    %0 = arith.index_cast %arg0 : i32 to index
    %1 = arith.index_cast %arg2 : i32 to index
    %2 = memref.load %arg4[%0, %1] : memref<2x2xi32, #tpu.memory_space<smem>>
    %c0_i32 = arith.constant 0 : i32
    return %2, %arg1, %arg3 : i32, i32, i32
  }
  func.func @transform_1(%arg0: i32, %arg1: i32, %arg2: i32, %arg3: i32, %arg4: memref<2x2xi32, #tpu.memory_space<smem>>, %arg5: memref<2x2xi32, #tpu.memory_space<smem>>, %arg6: memref<2xi32, #tpu.memory_space<smem>>) -> (i32, i32, i32) {
    %0 = arith.index_cast %arg0 : i32 to index
    %1 = arith.index_cast %arg2 : i32 to index
    %2 = memref.load %arg5[%0, %1] : memref<2x2xi32, #tpu.memory_space<smem>>
    %c0_i32 = arith.constant 0 : i32
    %c0_i32_0 = arith.constant 0 : i32
    return %2, %arg3, %c0_i32 : i32, i32, i32
  }
  func.func @transform_2(%arg0: i32, %arg1: i32, %arg2: i32, %arg3: i32, %arg4: memref<2x2xi32, #tpu.memory_space<smem>>, %arg5: memref<2x2xi32, #tpu.memory_space<smem>>, %arg6: memref<2xi32, #tpu.memory_space<smem>>) -> (i32, i32, i32) {
    %0 = arith.index_cast %arg0 : i32 to index
    %1 = arith.index_cast %arg2 : i32 to index
    %2 = memref.load %arg4[%0, %1] : memref<2x2xi32, #tpu.memory_space<smem>>
    %c0_i32 = arith.constant 0 : i32
    %c0_i32_0 = arith.constant 0 : i32
    %c0_i32_1 = arith.constant 0 : i32
    return %2, %c0_i32, %c0_i32_0 : i32, i32, i32
  }
  func.func @transform_3(%arg0: i32, %arg1: i32, %arg2: i32, %arg3: i32, %arg4: memref<2x2xi32, #tpu.memory_space<smem>>, %arg5: memref<2x2xi32, #tpu.memory_space<smem>>, %arg6: memref<2xi32, #tpu.memory_space<smem>>) -> (i32, i32, i32) {
    %0 = arith.index_cast %arg0 : i32 to index
    %1 = arith.index_cast %arg2 : i32 to index
    %2 = memref.load %arg4[%0, %1] : memref<2x2xi32, #tpu.memory_space<smem>>
    %c0_i32 = arith.constant 0 : i32
    %c0_i32_0 = arith.constant 0 : i32
    return %2, %arg3, %c0_i32 : i32, i32, i32
  }
  func.func @transform_4(%arg0: i32, %arg1: i32, %arg2: i32, %arg3: i32, %arg4: memref<2x2xi32, #tpu.memory_space<smem>>, %arg5: memref<2x2xi32, #tpu.memory_space<smem>>, %arg6: memref<2xi32, #tpu.memory_space<smem>>) -> (i32, i32, i32) {
    %0 = arith.index_cast %arg0 : i32 to index
    %1 = arith.index_cast %arg2 : i32 to index
    %2 = memref.load %arg4[%0, %1] : memref<2x2xi32, #tpu.memory_space<smem>>
    %c0_i32 = arith.constant 0 : i32
    %c0_i32_0 = arith.constant 0 : i32
    return %2, %arg1, %c0_i32 : i32, i32, i32
  }
  func.func @transform_5(%arg0: i32, %arg1: i32, %arg2: i32, %arg3: i32, %arg4: memref<2x2xi32, #tpu.memory_space<smem>>, %arg5: memref<2x2xi32, #tpu.memory_space<smem>>, %arg6: memref<2xi32, #tpu.memory_space<smem>>) -> (i32, i32, i32) {
    %c0_i32 = arith.constant 0 : i32
    %c0_i32_0 = arith.constant 0 : i32
    %c0_i32_1 = arith.constant 0 : i32
    return %arg0, %c0_i32, %c0_i32_0 : i32, i32, i32
  }
  func.func @transform_6(%arg0: i32, %arg1: i32, %arg2: i32, %arg3: i32, %arg4: memref<2x2xi32, #tpu.memory_space<smem>>, %arg5: memref<2x2xi32, #tpu.memory_space<smem>>, %arg6: memref<2xi32, #tpu.memory_space<smem>>) -> (i32, i32, i32) {
    %c0_i32 = arith.constant 0 : i32
    %c0_i32_0 = arith.constant 0 : i32
    return %arg0, %arg1, %c0_i32 : i32, i32, i32
  }
}

</mosaic_0001>

<bundles_post_ra>
// kernel: forward.2
= control target key start
LH: loop header
LB: loop body
LE: loop exit
PB: predicated region body
PF: predicated region fallthrough
CT: control target
= control target key end

     0   :  { %s2352_s15 = smov [#allocation4]   ;;  %s2353_s16 = smov [#allocation5]   ;;  %s3074_s0 = inlined_call_operand.vmem [shape: s32[2,2], index: 0, kind: input, shape index: {}]   ;;  %s3075_s3 = inlined_call_operand.hbm [shape: s8[3,128,128], index: 3, kind: input, shape index: {}]   ;;  %s3076_s4 = inlined_call_operand.hbm [shape: bf16[2,128,128], index: 4, kind: input, shape index: {}]   ;;  %s3077_s5 = inlined_call_operand.hbm [shape: bf16[3,128,128], index: 5, kind: input, shape index: {}]   ;;  %s3078_s6 = inlined_call_operand.hbm [shape: f32[3,128,1], index: 6, kind: input, shape index: {}]   ;;  %s3079_s7 = inlined_call_operand.hbm [shape: f32[3,128,1], index: 7, kind: input, shape index: {}]   ;;  %s3080_s8 = inlined_call_operand.vmem [shape: f32[2,1,128], index: 8, kind: input, shape index: {}]   ;;  %s3081_s9 = inlined_call_operand.vmem [shape: bf16[2,128,128], index: 9, kind: output, shape index: {}]   ;;  %s3082_s1 = inlined_call_operand.vmem [shape: s32[2,2], index: 1, kind: input, shape index: {}]   ;;  %s3083_s2 = inlined_call_operand.vmem [shape: s32[2], index: 2, kind: input, shape index: {}]  }
   0x1   :  { %3114 = sst [smem:[#allocation52_spill]] %s3075_s3  ;;  %s15_s11 = sshll.u32 %s3074_s0, 4  ;;  %s16_s11 = int_to_ptr.vmem [resolvable:$true] %s15_s11 }
   0x2   :  { %3115 = sst [smem:[#allocation53_spill]] %s3076_s4  ;;  %s20_s14 = sshll.u32 %s3082_s1, 4  ;;  %s21_s14 = int_to_ptr.vmem [resolvable:$true] %s20_s14 }
   0x3   :  { %3116 = sst [smem:[#allocation54_spill]] %s3077_s5  ;;  %s25_s19 = sshll.u32 %s3083_s2, 4  ;;  %s26_s19 = int_to_ptr.vmem [resolvable:$true] %s25_s19 }
   0x4   :  { %3117 = sst [smem:[#allocation55_spill]] %s3078_s6  ;;  %s2354_s20 = smov [#allocation6]  }
   0x5   :  { %3118 = sst [smem:[#allocation56_spill]] %s3079_s7 }
   0x6   :  { %3119 = sst [smem:[#allocation57_spill]] %s3080_s8 }
   0x7   :  { %3120 = sst [smem:[#allocation58_spill]] %s3081_s9 }
   0x8   :  { %18 = dma.vmem_to_smem %s16_s11, 32, %s2352_s15, [#allocation3] }
   0x9   :  { %23 = dma.vmem_to_smem %s21_s14, 32, %s2353_s16, [#allocation3] }
   0xa   :  { %28 = dma.vmem_to_smem %s26_s19, 16, %s2354_s20, [#allocation3] }
   0xb   :  { %2250 = dma.done.wait [#allocation3], 80 }
   0xc   :  { %2251 = vsyncadd [#allocation3], 4294967216 }
   0xd   :  { %31 = sfence }
   0xe   :  { %32 = vsyncpa [#allocation8], 0 }
   0xf   :  { %34 = vsyncpa [#allocation8 + $0x1], 0 }
  0x10   :  { %35 = vsyncpa [#allocation10], 0 }
  0x11   :  { %37 = vsyncpa [#allocation10 + $0x1], 0 }
  0x12   :  { %38 = vsyncpa [#allocation13], 0 }
  0x13   :  { %40 = vsyncpa [#allocation13 + $0x1], 0  ;;  %s2420_s0 = smov 0   ;;  %s2422_s1 = smov 0  }
  0x14   :  { %s2424_s21 = smov 0   ;;  %s2426_s22 = smov 0  }
  0x15   :  { %s2428_s2 = smov 0   ;;  %s2430_s23 = smov 0  }
  0x16   :  { %s2432_s24 = smov 0   ;;  %s2434_s25 = smov 0  }
  0x17   :  { %s2436_s26 = smov 0   ;;  %s2438_s27 = smov 0  }
  0x18   :  { %s2440_s28 = smov 0   ;;  %s2442_s29 = smov 0  }
  0x19   :  { %s2444_s30 = smov 0   ;;  %s2446_s10 = smov 0  }
  0x1a   :  { %s2448_s11 = smov 0   ;;  %s2450_s12 = smov 0  }
  0x1b   :  { %s2452_s13 = smov 0   ;;  %s2454_s14 = smov 0  }
  0x1c   :  { %s2456_s15 = smov 0   ;;  %s2458_s16 = smov 0  }
  0x1d LB: > { %3121 = sst [smem:[#allocation31_spill]] %s2274_s0  ;;  %s64_s18 = sadd.s32 1, %s2342_s14  ;;  %s2350_s16 = sphi %s2458_s16, %s46_s16   ;;  %s2346_s15 = sphi %s2456_s15, %s3226_s15   ;;  %s2342_s14 = sphi %s2454_s14, %s3224_s14   ;;  %s2338_s13 = sphi %s2452_s13, %s3223_s13   ;;  %s2334_s12 = sphi %s2450_s12, %s3222_s12   ;;  %s2330_s11 = sphi %s2448_s11, %s3221_s11   ;;  %s2326_s10 = sphi %s2446_s10, %s3234_s10   ;;  %s2322_s30 = sphi %s2444_s30, %s3233_s30   ;;  %s2318_s29 = sphi %s2442_s29, %s3219_s29   ;;  %s2314_s28 = sphi %s2440_s28, %s3218_s28   ;;  %s2310_s27 = sphi %s2438_s27, %s3232_s27   ;;  %s2306_s26 = sphi %s2436_s26, %s3231_s26   ;;  %s2302_s25 = sphi %s2434_s25, %s3230_s25   ;;  %s2298_s24 = sphi %s2432_s24, %s3229_s24   ;;  %s2294_s23 = sphi %s2430_s23, %s3215_s23   ;;  %s2290_s2 = sphi %s2428_s2, %s3228_s2   ;;  %s2286_s22 = sphi %s2426_s22, %s3227_s22   ;;  %s2282_s21 = sphi %s2424_s21, %s3225_s21   ;;  %s2278_s1 = sphi %s2422_s1, %s3213_s1   ;;  %s2274_s0 = sphi %s2420_s0, %s3212_s0  }
  0x1e   : > { %3122 = sst [smem:[#allocation32_spill]] %s2278_s1  ;;  %p66_p0 = scmp.ge.s32.totalorder %s64_s18, 2 }
  0x1f   : > { %3123 = sst [smem:[#allocation33_spill]] %s2282_s21  ;;  %s72_s19 = sadd.s32 1, %s2346_s15 }
  0x20   : > { %3124 = sst [smem:[#allocation34_spill]] %s2294_s23  ;;  %s76_s20 = sshra.s32 %s2342_s14, 7 }
  0x21   : > { %3125 = sst [smem:[#allocation35_spill]] %s2314_s28  ;;  %s81_s9 = sand.u32 127, %s2342_s14 }
  0x22   : > { %3126 = sst [smem:[#allocation36_spill]] %s2318_s29  ;;  %s3236_s18 = smov (%p66_p0, %s64_s18), 0 }
  0x23   : > { %3127 = sst [smem:[#allocation37_spill]] %s2330_s11  ;;  %s3238_s19 = smov (!%p66_p0, %s72_s19), %s2346_s15 }
  0x24   : > { %3128 = sst [smem:[#allocation38_spill]] %s2334_s12  ;;  %s78_s8 = sadd.s32 %s2346_s15, %s76_s20 }
  0x25   : > { %3129 = sst [smem:[#allocation39_spill]] %s2338_s13  ;;  %s84_s12 = sshra.s32 %s3236_s18, 7 }
  0x26   : > { %3130 = sst [smem:[#allocation40_spill]] %s2342_s14  ;;  %p74_p1 = scmp.ge.s32.totalorder %s3238_s19, 2 }
  0x27   : > { %3131 = sst [smem:[#allocation41_spill]] %s2346_s15  ;;  %s1568_s17 = sshll.u32 %s78_s8, 7 }
  0x28   : > { %3132 = sst [smem:[#allocation42_spill]] %s3236_s18  ;;  %s2530_s13 = sadd.s32 %s1568_s17, %s81_s9 }
  0x29   : > { %s89_s14 = sand.u32 127, %s3236_s18  ;;  %s3240_s19 = smov (%p74_p1, %s3238_s19), 0 }
  0x2a   : > { %3133 = sst [smem:[#allocation43_spill]] %s3240_s19  ;;  %p3103_p2 = scmp.eq.s32.totalorder %s2350_s16, 0 }
  0x2b   : > { %s3134_s7 = sadd.s32 4294967295, %s2350_s16   ;;  %s86_s15 = sadd.s32 %s84_s12, %s3240_s19 }
  0x2c   : > { %p2538_p3 = scmp.eq.s32.totalorder %s3134_s7, 0  ;;  %s129_s8 = sld [smem:[#allocation5 + %s2530_s13]] }
  0x2d   : > { %s1569_s5 = sshll.u32 %s86_s15, 7  ;;  %s143_s9 = sadd.s32 1, %s2318_s29 }
  0x2e   : > { %s2545_s17 = sadd.s32 %s1569_s5, %s89_s14  ;;  %p150_p4 = scmp.ne.s32.totalorder %s2318_s29, %s2314_s28 }
  0x2f   : > { %s137_s18 = sld [smem:[#allocation5 + %s2545_s17]]  ;;  %p156_p5 = scmp.ne.s32.totalorder %s2314_s28, %s2310_s27 }
  0x30   : > { %p2554_p6 = por %p150_p4, %p3103_p2  ;;  %p3099_p8 = scmp.lt.s32.totalorder %s2350_s16, 4 }
  0x31   : > { %p2560_p7 = por %p156_p5, %p2538_p3  ;;  %s399_s27 = sand.u32 1, %s2318_s29  }
  0x32   : > { %s1584_s14 = sshll.u32 %s399_s27, 6  ;;  %p2571_p9 = pnand %p3099_p8, %p2554_p6 }
  0x33   : > { %s3137_s5 = scalar_select %p2560_p7, 1, 0 }
  0x34   : > { %s401_s28 = scalar_lea.vmem [#allocation9], %s1584_s14  ;;  %p1600_p11 = scmp.ge.s32.totalorder %s2350_s16, 1 }
  0x35   : > { %3138 = sst [smem:[#allocation44_spill]] %s3137_s5  ;;  %s138_s19 = ssub.s32 %s129_s8, %s137_s18 }
  0x36   : > { %s2575_s0 = sshll.u32 %s401_s28, 4  ;;  %p141_p10 = scmp.eq.s32.totalorder %s138_s19, 0 }
  0x37   : > { %3140 = sst [smem:[#allocation45_spill]] %s2575_s0  ;;  %p527_p12 = scmp.lt.s32.totalorder %s2350_s16, 5 }
  0x38   : > { %s1767_s27 = scalar_select %p2554_p6, [#allocation5], [#allocation16] }
  0x39   : > { %s2581_s12 = scalar_select %p141_p10, %s2318_s29, %s143_s9  }
  0x3a   : > { %s1768_s5 = scalar_select %p2554_p6, %s2530_s13, 0 }
  0x3b   : > { %3141 = sst [smem:[#allocation46_spill]] %s2581_s12  ;;  %s3242_s27 = smov (!%p3099_p8, %s1767_s27), [#allocation21] }
  0x3c   : > { %s3244_s5 = smov (!%p3099_p8, %s1768_s5), 0  ;;  %p2592_p13 = pnand %p1600_p11, %p527_p12 }
  0x3d   : > { %s409_s28 = sld [smem:[%s3242_s27 + %s3244_s5]]  ;;  %s229_s12 = sadd.s32 1, %s2294_s23 }
  0x3e   : > { %s3142_s18 = scalar_select %p2592_p13, 1, 0 }
  0x3f   : > { %s2597_s19 = sld [smem:[#allocation4 + %s2530_s13]]  ;;  %p236_p0 = scmp.ne.s32.totalorder %s2294_s23, %s2290_s2 }
  0x40   : > { %3143 = sst [smem:[#allocation47_spill]] %s3142_s18  ;;  %s3145_s5 = sand.u32 1, %s2350_s16  }
  0x41   : > { %s223_s9 = sld [smem:[#allocation4 + %s2545_s17]]  ;;  %s2610_s27 = scalar_lea.sflag [#allocation10], %s3145_s5 }
  0x42   : > { %s3144_s4 = sld [smem:[#allocation53_spill]]  ;;  %p2024_p5 = pneg %p2571_p9 }
  0x43   : > { %s1678_s8 = sshll.u32 %s409_s28, 6 }
  0x48   : > { %s416_s0 = scalar_lea.hbm %s3144_s4, %s1678_s8  ;;  %s2027_s8 = scalar_lea.hbm %s3144_s4, 128 }
  0x49   : > { %s417_s29 = sshll.u32 %s416_s0, 4  ;;  %s418_s29 = int_to_ptr.hbm [resolvable:$true] %s417_s29 }
  0x4a   : > { %s2020_s21 = sshra.s32 %s418_s29, 4  ;;  %s2021_s21 = int_to_ptr.hbm [resolvable:$true] %s2020_s21 }
  0x4b   : > { %s2022_s1 = scalar_lea.hbm %s2021_s21, 64  ;;  %p2028_p11 = scmp.lt.s32.totalorder %s2021_s21, %s3144_s4 }
  0x4c   : > { %p2023_p4 = scmp.ne.s32.totalorder %s2021_s21, %s2022_s1  ;;  %p2029_p12 = scmp.lt.s32.totalorder %s2027_s8, %s2022_s1 }
  0x4e   : > { %p2025_p6 = pnand %p2024_p5, %p2023_p4  ;;  %p2030_p8 = por %p2029_p12, %p2028_p11 }
  0x50   : > { %p2026_p10 = pneg %p2025_p6 }
  0x52   : > { %p2031_p1 = pnand %p2030_p8, %p2026_p10 }
  0x54   : > { %2034 = shalt.err (!%p2031_p1)
}
  0x55   : > { %s3100_s14 = smov 64   ;;  %s3146_s5 = sld [smem:[#allocation45_spill]] }
  0x56   : > { %s3101_s1 = smov 4   ;;  %p238_p8 = por %p236_p0, %p3103_p2 }
  0x57   : > { %p3148_p1 = scmp.ne.s32.totalorder %s2290_s2, %s2286_s22  ;;  %s224_s28 = ssub.s32 %s2597_s19, %s223_s9 }
  0x58   : > { %p227_p5 = scmp.eq.s32.totalorder %s224_s28, 0  ;;  %s461_s8 = sand.u32 1, %s2294_s23  }
  0x59   : > { %p2638_p4 = por %p3148_p1, %p2538_p3  ;;  %s1592_s7 = sshll.u32 %s461_s8, 7 }
  0x5a   : > { %s2645_s15 = scalar_select %p227_p5, %s2294_s23, %s229_s12  }
  0x5b   : > { %s3147_s21 = int_to_ptr.vmem [resolvable:$true] %s3146_s5  ;;  %p3152_p6 = scmp.lt.s32.totalorder %s2350_s16, 4 }
  0x5c   : > { %1794 = dma.hbm_to_vmem [thread:$0]  (!%p2571_p9), %s418_s29, 1024, %s3147_s21, %s2610_s27, %s3100_s14, %s3100_s14, %s3101_s1  }
  0x5d   : > { %s3149_s18 = scalar_select %p2638_p4, 1, 0 }
  0x5e   : > { %3151 = sst [smem:[#allocation48_spill]] %s2645_s15  ;;  %p2649_p9 = pnand %p3152_p6, %p238_p8 }
  0x5f   : > { %3150 = sst [smem:[#allocation45_spill]] %s3149_s18  ;;  %p3154_p0 = pmov %p3152_p6 }
  0x60   : > { %s1773_s22 = scalar_select %p238_p8, [#allocation4], [#allocation18] }
  0x61   : > { %s1774_s0 = scalar_select %p238_p8, %s2530_s13, 0 }
  0x62   : > { %s3246_s22 = smov (!%p3154_p0, %s1773_s22), [#allocation23]  ;;  %p3155_p10 = pmov %p3154_p0 }
  0x63   : > { %s463_s19 = scalar_lea.vmem [#allocation12], %s1592_s7  ;;  %s2662_s5 = sld [smem:[#allocation4 + %s2530_s13]] }
  0x64   : > { %s3248_s0 = smov (!%p3155_p10, %s1774_s0), 0  ;;  %s2658_s12 = sshll.u32 %s463_s19, 4  ;;  %s482_s12 = int_to_ptr.vmem [resolvable:$true] %s2658_s12 }
  0x65   : > { %s471_s9 = sld [smem:[%s3246_s22 + %s3248_s0]]  ;;  %s99_s4 = sadd.s32 1, %s2330_s11 }
  0x66   : > { %s91_s28 = sld [smem:[#allocation4 + %s2545_s17]]  ;;  %p106_p11 = scmp.ne.s32.totalorder %s2330_s11, %s2326_s10 }
  0x67   : > { %s3156_s6 = sld [smem:[#allocation55_spill]]  ;;  %s3157_s7 = sand.u32 1, %s2350_s16  }
  0x68   : > { %s2675_s19 = scalar_lea.sflag [#allocation13], %s3157_s7  ;;  %p2054_p1 = pneg %p2649_p9 }
  0x6b   : > { %s1680_s21 = sshll.u32 %s471_s9, 7 }
  0x6d   : > { %s478_s1 = scalar_lea.hbm %s3156_s6, %s1680_s21  ;;  %s2057_s14 = scalar_lea.hbm %s3156_s6, 384 }
  0x6e   : > { %s479_s15 = sshll.u32 %s478_s1, 4  ;;  %s480_s15 = int_to_ptr.hbm [resolvable:$true] %s479_s15 }
  0x6f   : > { %s2050_s23 = sshra.s32 %s480_s15, 4  ;;  %s2051_s23 = int_to_ptr.hbm [resolvable:$true] %s2050_s23 }
  0x70   : > { %s2052_s22 = scalar_lea.hbm %s2051_s23, 128  ;;  %p2058_p0 = scmp.lt.s32.totalorder %s2051_s23, %s3156_s6 }
  0x71   : > { %p2053_p8 = scmp.ne.s32.totalorder %s2051_s23, %s2052_s22  ;;  %p2059_p10 = scmp.lt.s32.totalorder %s2057_s14, %s2052_s22 }
  0x73   : > { %p2055_p5 = pnand %p2054_p1, %p2053_p8  ;;  %p2060_p12 = por %p2059_p10, %p2058_p0 }
  0x75   : > { %p2056_p6 = pneg %p2055_p5 }
  0x77   : > { %p2061_p2 = pnand %p2060_p12, %p2056_p6 }
  0x79   : > { %2064 = shalt.err (!%p2061_p2)
}
  0x7a   : > { %s3104_s8 = smov 128   ;;  %s3106_s23 = smov 8  }
  0x7b   : > { %1804 = dma.hbm_to_vmem [thread:$0]  (!%p2649_p9), %s480_s15, 2048, %s482_s12, %s2675_s19, %s3104_s8, %s3104_s8, %s3106_s23  }
  0x7c   : > { %p3158_p2 = scmp.eq.s32.totalorder %s2350_s16, 0  ;;  %p3159_p8 = scmp.ne.s32.totalorder %s2326_s10, %s2322_s30 }
  0x7d   : > { %s92_s22 = ssub.s32 %s2662_s5, %s91_s28  ;;  %s364_s29 = sand.u32 1, %s2330_s11  }
  0x7e   : > { %p108_p12 = por %p3158_p2, %p106_p11  ;;  %p2703_p1 = por %p2538_p3, %p3159_p8 }
  0x7f   : > { %p97_p5 = scmp.eq.s32.totalorder %s92_s22, 0  ;;  %s1580_s0 = sshll.u32 %s364_s29, 5 }
  0x80   : > { %p3161_p9 = scmp.lt.s32.totalorder %s2350_s16, 4  ;;  %s368_s5 = scalar_lea.vmem [#allocation7], %s1580_s0 }
  0x81   : > { %s2718_s30 = scalar_select %p97_p5, %s2330_s11, %s99_s4  }
  0x82   : > { %p2711_p6 = pnand %p3161_p9, %p108_p12  ;;  %p3164_p11 = pmov %p3161_p9 }
  0x83   : > { %3163 = sst [smem:[#allocation49_spill]] %s2718_s30  ;;  %p3165_p0 = pmov %p3161_p9 }
  0x84   : > { %s1764_s12 = scalar_select %p108_p12, [#allocation4], [#allocation15] }
  0x85   : > { %s1765_s9 = scalar_select %p108_p12, %s2530_s13, 0 }
  0x86   : > { %s3250_s12 = smov (!%p3164_p11, %s1764_s12), [#allocation20]  ;;  %s2725_s28 = sshll.u32 %s368_s5, 4 }
  0x87   : > { %s3252_s9 = smov (!%p3165_p0, %s1765_s9), 0  ;;  %3166 = sst [smem:[#allocation50_spill]] %s2725_s28 }
  0x88   : > { %s376_s14 = sld [smem:[%s3250_s12 + %s3252_s9]]  ;;  %p192_p10 = scmp.ne.s32.totalorder %s2306_s26, %s2302_s25 }
  0x89   : > { %s2728_s21 = sld [smem:[#allocation4 + %s2530_s13]]  ;;  %p198_p2 = scmp.ne.s32.totalorder %s2302_s25, %s2298_s24 }
  0x8a   : > { %s2732_s1 = sld [smem:[#allocation4 + %s2545_s17]]  ;;  %s431_s22 = sand.u32 1, %s2306_s26  }
  0x8b   : > { %s3167_s3 = sld [smem:[#allocation52_spill]]  ;;  %p3168_p12 = scmp.eq.s32.totalorder %s2350_s16, 0 }
  0x8c   : > { %p2750_p5 = por %p198_p2, %p2538_p3  ;;  %s1588_s5 = sshll.u32 %s431_s22, 6 }
  0x8d   : > { %p2744_p8 = por %p192_p10, %p3168_p12  ;;  %s365_s24 = scalar_lea.sflag [#allocation8], %s364_s29 }
  0x8e   : > { %s1677_s4 = sshll.u32 %s376_s14, 5  ;;  %p2084_p11 = pneg %p2711_p6 }
  0x8f   : > { %s3170_s9 = scalar_select %p2750_p5, 1, 0 }
  0x91   : > { %s384_s6 = scalar_lea.hbm %s3167_s3, %s1677_s4 }
  0x92   : > { %s385_s12 = sshll.u32 %s384_s6, 4  ;;  %s2087_s6 = scalar_lea.hbm %s3167_s3, 96  ;;  %s386_s12 = int_to_ptr.hbm [resolvable:$true] %s385_s12 }
  0x93   : > { %s2080_s14 = sshra.s32 %s386_s12, 4  ;;  %s2081_s14 = int_to_ptr.hbm [resolvable:$true] %s2080_s14 }
  0x94   : > { %s2082_s28 = scalar_lea.hbm %s2081_s14, 32  ;;  %p2088_p2 = scmp.lt.s32.totalorder %s2081_s14, %s3167_s3 }
  0x95   : > { %p2083_p9 = scmp.ne.s32.totalorder %s2081_s14, %s2082_s28  ;;  %p2089_p12 = scmp.lt.s32.totalorder %s2087_s6, %s2082_s28 }
  0x97   : > { %p2085_p0 = pnand %p2084_p11, %p2083_p9  ;;  %p2090_p4 = por %p2089_p12, %p2088_p2 }
  0x99   : > { %p2086_p10 = pneg %p2085_p0 }
  0x9b   : > { %p2091_p5 = pnand %p2090_p4, %p2086_p10 }
  0x9d   : > { %2094 = shalt.err (!%p2091_p5)
}
  0x9e   : > { %s3171_s29 = smov 8   ;;  %s3172_s22 = smov 128  }
  0x9f   : > { %s3173_s11 = sld [smem:[#allocation50_spill]]  ;;  %s182_s28 = ssub.s32 %s2728_s21, %s2732_s1 }
  0xa0   : > { %s3175_s15 = sld [smem:[#allocation32_spill]]  ;;  %s185_s14 = sadd.s32 1, %s2306_s26 }
  0xa1   : > { %s3176_s30 = sld [smem:[#allocation33_spill]]  ;;  %p183_p4 = scmp.eq.s32.totalorder %s182_s28, 0 }
  0xa2   : > { %s3177_s8 = sld [smem:[#allocation31_spill]]  ;;  %p3179_p5 = scmp.lt.s32.totalorder %s2350_s16, 4 }
  0xa3   : > { %s2775_s23 = scalar_select %p183_p4, %s2306_s26, %s185_s14  }
  0xa4   : > { %s1771_s6 = scalar_select %p2744_p8, %s2530_s13, 0 }
  0xa5   : > { %s3174_s18 = int_to_ptr.vmem [resolvable:$true] %s3173_s11  ;;  %3178 = sst [smem:[#allocation51_spill]] %s2775_s23 }
  0xa6   : > { %1789 = dma.hbm_to_vmem [thread:$0]  (!%p2711_p6), %s386_s12, 512, %s3174_s18, %s365_s24, %s3172_s22, %s3172_s22, %s3171_s29  }
  0xa7   : > { %s1770_s11 = scalar_select %p2744_p8, [#allocation4], [#allocation17] }
  0xa8   : > { %p3180_p9 = pmov %p3179_p5  ;;  %s433_s18 = scalar_lea.vmem [#allocation11], %s1588_s5 }
  0xa9   : > { %s3254_s11 = smov (!%p3179_p5, %s1770_s11), [#allocation22]  ;;  %s2784_s12 = sshll.u32 %s433_s18, 4  ;;  %s450_s12 = int_to_ptr.vmem [resolvable:$true] %s2784_s12 }
  0xaa   : > { %s3256_s6 = smov (!%p3180_p9, %s1771_s6), 0  ;;  %p3181_p6 = pmov %p3179_p5 }
  0xab   : > { %s441_s1 = sld [smem:[%s3254_s11 + %s3256_s6]]  ;;  %p280_p0 = scmp.ne.s32.totalorder %s3176_s30, %s3175_s15 }
  0xac   : > { %p2790_p11 = pnand %p3181_p6, %p2744_p8  ;;  %s2796_s24 = sld [smem:[#allocation4 + %s2530_s13]] }
  0xad   : > { %s267_s4 = sld [smem:[#allocation4 + %s2545_s17]]  ;;  %p286_p10 = scmp.ne.s32.totalorder %s3175_s15, %s3177_s8 }
  0xae   : > { %s3183_s18 = sld [smem:[#allocation54_spill]]  ;;  %p3184_p2 = scmp.eq.s32.totalorder %s2350_s16, 0 }
  0xaf   : > { %p2814_p8 = por %p286_p10, %p2538_p3  ;;  %s493_s17 = sand.u32 1, %s3176_s30  }
  0xb0   : > { %p2808_p12 = por %p280_p0, %p3184_p2  ;;  %p2114_p5 = pneg %p2790_p11 }
  0xb1   : > { %s1679_s28 = sshll.u32 %s441_s1, 6 }
  0xb4   : > { %s446_s3 = scalar_lea.hbm %s3183_s18, %s1679_s28  ;;  %s2117_s28 = scalar_lea.hbm %s3183_s18, 192 }
  0xb5   : > { %s447_s23 = sshll.u32 %s446_s3, 4  ;;  %s448_s23 = int_to_ptr.hbm [resolvable:$true] %s447_s23 }
  0xb6   : > { %s2110_s6 = sshra.s32 %s448_s23, 4  ;;  %s2111_s6 = int_to_ptr.hbm [resolvable:$true] %s2110_s6 }
  0xb7   : > { %s2112_s15 = scalar_lea.hbm %s2111_s6, 64  ;;  %p2118_p3 = scmp.lt.s32.totalorder %s2111_s6, %s3183_s18 }
  0xb8   : > { %p2113_p4 = scmp.ne.s32.totalorder %s2111_s6, %s2112_s15  ;;  %p2119_p0 = scmp.lt.s32.totalorder %s2117_s28, %s2112_s15 }
  0xba   : > { %p2115_p9 = pnand %p2114_p5, %p2113_p4  ;;  %p2120_p10 = por %p2119_p0, %p2118_p3 }
  0xbc   : > { %p2116_p6 = pneg %p2115_p9 }
  0xbe   : > { %p2121_p2 = pnand %p2120_p10, %p2116_p6 }
  0xc0   : > { %2124 = shalt.err (!%p2121_p2)
}
  0xc1   : > { %s3187_s14 = smov 4   ;;  %s3188_s5 = smov 64  }
  0xc2   : > { %1799 = dma.hbm_to_vmem [thread:$0]  (!%p2790_p11), %s448_s23, 1024, %s450_s12, %s2610_s27, %s3188_s5, %s3188_s5, %s3187_s14  }
  0xc3   : > { %s268_s6 = ssub.s32 %s2796_s24, %s267_s4  ;;  %s273_s15 = sadd.s32 1, %s3176_s30 }
  0xc4   : > { %p271_p4 = scmp.eq.s32.totalorder %s268_s6, 0  ;;  %s1596_s21 = sshll.u32 %s493_s17, 7 }
  0xc5   : > { %s1776_s8 = scalar_select %p2808_p12, [#allocation4], [#allocation19] }
  0xc6   : > { %s3258_s30 = smov (!%p271_p4, %s3176_s30), %s273_s15  ;;  %s3260_s13 = smov (!%p2808_p12, %s2530_s13), 0 }
  0xc7   : > { %p3189_p5 = scmp.lt.s32.totalorder %s2350_s16, 4  ;;  %s495_s23 = scalar_lea.vmem [#allocation14], %s1596_s21 }
  0xc8   : > { %s513_s12 = sshll.u32 %s495_s23, 4  ;;  %s3193_s28 = sld [smem:[#allocation56_spill]]  ;;  %s514_s12 = int_to_ptr.vmem [resolvable:$true] %s513_s12 }
  0xc9   : > { %s3262_s8 = smov (!%p3189_p5, %s1776_s8), [#allocation24]  ;;  %p3190_p9 = pmov %p3189_p5 }
  0xca   : > { %p3191_p6 = pmov %p3189_p5 }
  0xcb   : > { %s3264_s13 = smov (!%p3190_p9, %s3260_s13), 0 }
  0xcc   : > { %p2853_p3 = pnand %p3191_p6, %p2808_p12  ;;  %s503_s27 = sld [smem:[%s3262_s8 + %s3264_s13]] }
  0xce   : > { %s3194_s3 = smov %s3193_s28  ;;  %p2144_p12 = pneg %p2853_p3 }
  0xcf   : > { %s2147_s15 = scalar_lea.hbm %s3194_s3, 384 }
  0xd2   : > { %s1681_s24 = sshll.u32 %s503_s27, 7 }
  0xd3   : > { %s510_s20 = scalar_lea.hbm %s3193_s28, %s1681_s24 }
  0xd4   : > { %s511_s14 = sshll.u32 %s510_s20, 4  ;;  %s512_s14 = int_to_ptr.hbm [resolvable:$true] %s511_s14 }
  0xd5   : > { %s2140_s5 = sshra.s32 %s512_s14, 4  ;;  %s2141_s5 = int_to_ptr.hbm [resolvable:$true] %s2140_s5 }
  0xd6   : > { %s2142_s0 = scalar_lea.hbm %s2141_s5, 128  ;;  %p2148_p2 = scmp.lt.s32.totalorder %s2141_s5, %s3194_s3 }
  0xd7   : > { %p2143_p11 = scmp.ne.s32.totalorder %s2141_s5, %s2142_s0  ;;  %p2149_p4 = scmp.lt.s32.totalorder %s2147_s15, %s2142_s0 }
  0xd9   : > { %p2145_p0 = pnand %p2144_p12, %p2143_p11  ;;  %p2150_p5 = por %p2149_p4, %p2148_p2 }
  0xdb   : > { %p2146_p10 = pneg %p2145_p0 }
  0xdd   : > { %p2151_p9 = pnand %p2150_p5, %p2146_p10 }
  0xdf   : > { %2154 = shalt.err (!%p2151_p9)
}
  0xe0   : > { %1809 = dma.hbm_to_vmem [thread:$0]  (!%p2853_p3), %s512_s14, 2048, %s514_s12, %s2675_s19, %s3172_s22, %s3172_s22, %s3171_s29  }
  0xe1   : > { %531 = sbr.rel (%p2592_p13) target bundleno = 780 (0x30c), region = 44  ;;  %s533_s23 = sand.u32 (!%p2592_p13), 1, %s2326_s10  }
  0xe2   : > { %s1601_s24 = sshll.u32 (!%p2592_p13), %s533_s23, 5  ;;  %s534_s4 = scalar_lea.sflag (!%p2592_p13), [#allocation8], %s533_s23 }
  0xe3   : > { %s2877_s17 = scalar_lea.vmem (!%p2592_p13), [#allocation7], %s1601_s24 }
  0xe6   : > { %2253 = dma.done.wait (%p2703_p1), %s534_s4, 512  }
  0xe7   : > { %2255 = vsyncadd (%p2703_p1), %s534_s4, 4294966784  ;;  %s3196_s1 = sadd.s32 4294967295, %s2350_s16   ;;  %s3197_s28 = sld [smem:[#allocation35_spill]] }
  0xe8   : > { %s543_s19 = sand.u32 1, %s3196_s1  }
  0xe9   : > { %s544_s12 = scalar_lea.sflag [#allocation10], %s543_s19 }
  0xed   : > { %s545_s29 = sand.u32 1, %s3197_s28  }
  0xee   : > { %s1602_s22 = sshll.u32 %s545_s29, 6 }
  0xef   : > { %s2886_s14 = scalar_lea.vmem [#allocation9], %s1602_s22 }
  0xf0   : > { %2257 = dma.done.wait (%p2560_p7), %s544_s12, 1024  }
  0xf1   : > { %2259 = vsyncadd (%p2560_p7), %s544_s12, 4294966272  ;;  %s555_s5 = sand.u32 1, %s2302_s25   ;;  %p3199_p13 = scmp.ne.s32.totalorder %s3170_s9, 0 }
  0xf2   : > { %s1603_s7 = sshll.u32 %s555_s5, 6 }
  0xf3   : > { %s2893_s0 = scalar_lea.vmem [#allocation11], %s1603_s7 }
  0xf4   : > { %2261 = dma.done.wait (%p3199_p13), %s544_s12, 1024  }
  0xf5   : > { %2263 = vsyncadd (%p3199_p13), %s544_s12, 4294966272  ;;  %s3200_s6 = sld [smem:[#allocation45_spill]]  ;;  %s565_s13 = sand.u32 1, %s2290_s2  }
  0xf6   : > { %s1604_s15 = sshll.u32 %s565_s13, 7  ;;  %s564_s21 = scalar_lea.sflag [#allocation13], %s543_s19 }
  0xf7   : > { %s2900_s8 = scalar_lea.vmem [#allocation12], %s1604_s15 }
  0xfb   : > { %p3201_p1 = scmp.ne.s32.totalorder %s3200_s6, 0 }
  0xfd   : > { %2265 = dma.done.wait (%p3201_p1), %s564_s21, 2048  }
  0xfe   : > { %2267 = vsyncadd (%p3201_p1), %s564_s21, 4294965248  ;;  %s3202_s27 = sld [smem:[#allocation32_spill]] }
 0x104   : > { %s575_s23 = sand.u32 1, %s3202_s27  }
 0x105   : > { %s1605_s24 = sshll.u32 %s575_s23, 7 }
 0x106   : > { %s2907_s4 = scalar_lea.vmem [#allocation14], %s1605_s24 }
 0x107   : > { %2269 = dma.done.wait (%p2814_p8), %s564_s21, 2048  }
 0x108   : > { %2271 = vsyncadd (%p2814_p8), %s564_s21, 4294965248  ;;  %s3203_s9 = sld [smem:[#allocation39_spill]] }
 0x109   : > { %s3204_s1 = sld [smem:[#allocation38_spill]] }
 0x10a   : > { %s3205_s19 = sld [smem:[#allocation57_spill]] }
 0x10b   : > { %s3206_s7 = sld [smem:[#allocation58_spill]] }
 0x10e   : > { %p678_p7 = scmp.lt.s32.totalorder %s3203_s9, 1 }
 0x10f   : > { %p691_p6 = scmp.eq.s32.totalorder %s3204_s1, 0 }
 0x110   : > { %s3266_s9 = smov (!%p678_p7, %s3203_s9), 1  ;;  %v2359_v0 = vmov (%p691_p6), 0.0  }
 0x111   : > { %s680_s29 = scalar_lea.vmem %s3205_s19, %s3266_s9  ;;  %s1682_s22 = sshll.u32 %s3266_s9, 6  ;;  %697 = vst [vmem:[#allocation2 + $0x30] sm:$0xff] (%p691_p6), %v2359_v0 }
 0x112   : > { %s2926_s6 = scalar_lea.vmem %s3206_s7, %s1682_s22  ;;  %696 = sbr.rel (!%p691_p6) target bundleno = 289 (0x121), region = 68  ;;  %698 = vst [vmem:[#allocation2] sm:$0xff] (%p691_p6), %v2359_v0 }
 0x113   : > { %699 = vst [vmem:[#allocation2 + $0x58] sm:$0xff] (%p691_p6), %v2359_v0 }
 0x114   : > { %700 = vst [vmem:[#allocation2 + $0x18] sm:$0xff] (%p691_p6), %v2359_v0 }
 0x115   : > { %701 = vst [vmem:[#allocation2 + $0x50] sm:$0xff] (%p691_p6), %v2359_v0 }
 0x116   : > { %702 = vst [vmem:[#allocation2 + $0x68] sm:$0xff] (%p691_p6), %v2359_v0 }
 0x117   : > { %703 = vst [vmem:[#allocation2 + $0x8] sm:$0xff] %v2359_v0 }
 0x118   : > { %704 = vst [vmem:[#allocation2 + $0x48] sm:$0xff] %v2359_v0 }
 0x119   : > { %705 = vst [vmem:[#allocation2 + $0x40] sm:$0xff] %v2359_v0 }
 0x11a   : > { %706 = vst [vmem:[#allocation2 + $0x20] sm:$0xff] %v2359_v0 }
 0x11b   : > { %707 = vst [vmem:[#allocation2 + $0x10] sm:$0xff] %v2359_v0 }
 0x11c   : > { %708 = vst [vmem:[#allocation2 + $0x38] sm:$0xff] %v2359_v0 }
 0x11d   : > { %709 = vst [vmem:[#allocation2 + $0x60] sm:$0xff] %v2359_v0 }
 0x11e   : > { %710 = vst [vmem:[#allocation2 + $0x70] sm:$0xff] %v2359_v0 }
 0x11f   : > { %711 = vst [vmem:[#allocation2 + $0x78] sm:$0xff] %v2359_v0 }
 0x120   : > { %712 = vst [vmem:[#allocation2 + $0x28] sm:$0xff] %v2359_v0 }
 0x121 PF: > { %s3207_s11 = sld [smem:[#allocation39_spill]] }
 0x122   : > { %s3208_s15 = sld [smem:[#allocation38_spill]] }
 0x127   : > { %s713_s13 = sld [smem:[#allocation6 + %s3207_s11]] }
 0x12d   : > { %p1609_p8 = scmp.ge.s32.totalorder %s3208_s15, %s713_s13 }
 0x12f   : > { %717 = sbr.rel (%p1609_p8) target bundleno = 757 (0x2f5), region = 72 }
 0x134   : > { %v1699_v1 = vld [vmem:[%s2893_s0 + $0x38] sm:$0xff]  ;;  %v2360_v2 = vmov 0   ;;  %v909_v3 = vld [vmem:[%s2900_s8 + $0x70] sm:$0xff]  ;;  %v907_v4 = vld [vmem:[%s2900_s8 + $0x60] sm:$0xff] }
 0x135   : > { %1980 = vset.pattern.permute.xlu0 %v2360_v2  ;;  %1981 = vset.pattern.permute.xlu1 %v2360_v2  ;;  %v1698_v5 = vld [vmem:[%s2893_s0 + $0x30] sm:$0xff]  ;;  %v1697_v6 = vld [vmem:[%s2893_s0 + $0x28] sm:$0xff]  ;;  %v910_v7 = vld [vmem:[%s2900_s8 + $0x78] sm:$0xff] }
 0x136   : > { %846 = vmatpush.bf16.msra.mxu0 %v1699_v1  ;;  %1748 = vmatpush.bf16.msra.mxu2 %v1699_v1  ;;  %v908_v8 = vld [vmem:[%s2900_s8 + $0x68] sm:$0xff]  ;;  %v1696_v9 = vld [vmem:[%s2893_s0 + $0x20] sm:$0xff]  ;;  %v1695_v10 = vld [vmem:[%s2893_s0 + $0x18] sm:$0xff] }
 0x137   : > { %983 = vperm.xlu0 %1980, %v909_v3   ;;  %973 = vperm.xlu1 %1981, %v907_v4   ;;  %v903_v11 = vld [vmem:[%s2900_s8 + $0x40] sm:$0xff]  ;;  %v904_v12 = vld [vmem:[%s2900_s8 + $0x48] sm:$0xff]  ;;  %v905_v13 = vld [vmem:[%s2900_s8 + $0x50] sm:$0xff] }
 0x138   : > { %1982 = vset.pattern.permute.xlu2 %v2360_v2  ;;  %v1694_v14 = vld [vmem:[%s2893_s0 + $0x10] sm:$0xff]  ;;  %v1693_v15 = vld [vmem:[%s2893_s0 + $0x8] sm:$0xff]  ;;  %v902_v16 = vld [vmem:[%s2900_s8 + $0x38] sm:$0xff] }
 0x139   : > { %963 = vperm.xlu2 %1982, %v905_v13   ;;  %v899_v17 = vld [vmem:[%s2900_s8 + $0x20] sm:$0xff]  ;;  %v906_v18 = vld [vmem:[%s2900_s8 + $0x58] sm:$0xff]  ;;  %v897_v22 = vld [vmem:[%s2900_s8 + $0x10] sm:$0xff] }
 0x13a   : > { %847 = vmatpush.bf16.msra.mxu0 %v1698_v5  ;;  %1749 = vmatpush.bf16.msra.mxu2 %v1698_v5  ;;  %v1692_v19 = vld [vmem:[%s2893_s0] sm:$0xff]  ;;  %v898_v23 = vld [vmem:[%s2900_s8 + $0x18] sm:$0xff]  ;;  %v901_v24 = vld [vmem:[%s2900_s8 + $0x30] sm:$0xff] }
 0x13b   : > { %v1684_v20 = vld [vmem:[%s2886_s14] sm:$0xff]  ;;  %v896_v25 = vld [vmem:[%s2900_s8 + $0x8] sm:$0xff]  ;;  %v1126_v30 = vld [vmem:[%s2907_s4 + $0x10] sm:$0xff] }
 0x13c   : > { %v1688_v21 = vld [vmem:[%s2886_s14 + $0x20] sm:$0xff]  ;;  %v900_v27 = vld [vmem:[%s2900_s8 + $0x28] sm:$0xff]  ;;  %v1127_v31 = vld [vmem:[%s2907_s4 + $0x18] sm:$0xff] }
 0x13d   : > { %v1124_v26 = vld [vmem:[%s2907_s4] sm:$0xff]  ;;  %v1685_v28 = vld [vmem:[%s2886_s14 + $0x8] sm:$0xff]  ;;  %v1130_v34 = vld [vmem:[%s2907_s4 + $0x30] sm:$0xff] }
 0x13e   : > { %848 = vmatpush.bf16.msra.mxu0 %v1697_v6  ;;  %1750 = vmatpush.bf16.msra.mxu2 %v1697_v6  ;;  %v1689_v29 = vld [vmem:[%s2886_s14 + $0x28] sm:$0xff]  ;;  %v895_v32 = vld [vmem:[%s2900_s8] sm:$0xff]  ;;  %v1686_v36 = vld [vmem:[%s2886_s14 + $0x10] sm:$0xff] }
 0x13f   : > { %988 = vperm.xlu0 %1980, %v910_v7   ;;  %978 = vperm.xlu1 %1981, %v908_v8   ;;  %v1129_v33 = vld [vmem:[%s2907_s4 + $0x28] sm:$0xff]  ;;  %v1690_v37 = vld [vmem:[%s2886_s14 + $0x30] sm:$0xff]  ;;  %v1132_v38 = vld [vmem:[%s2907_s4 + $0x40] sm:$0xff] }
 0x140   : > { %v1125_v35 = vld [vmem:[%s2907_s4 + $0x8] sm:$0xff]  ;;  %v1128_v40 = vld [vmem:[%s2907_s4 + $0x20] sm:$0xff]  ;;  %v1135_v41 = vld [vmem:[%s2907_s4 + $0x58] sm:$0xff] }
 0x141   : > { %968 = vperm.xlu2 %1982, %v906_v18   ;;  %v1133_v39 = vld [vmem:[%s2907_s4 + $0x48] sm:$0xff]  ;;  %v1136_v42 = vld [vmem:[%s2907_s4 + $0x60] sm:$0xff]  ;;  %v1131_v43 = vld [vmem:[%s2907_s4 + $0x38] sm:$0xff] }
 0x142   : > { %849 = vmatpush.bf16.msra.mxu0 %v1696_v9  ;;  %1751 = vmatpush.bf16.msra.mxu2 %v1696_v9  ;;  %v1687_v44 = vld [vmem:[%s2886_s14 + $0x18] sm:$0xff]  ;;  %v1138_v46 = vld [vmem:[%s2907_s4 + $0x70] sm:$0xff]  ;;  %v1137_v49 = vld [vmem:[%s2907_s4 + $0x68] sm:$0xff] }
 0x143   : > { %v1691_v45 = vld [vmem:[%s2886_s14 + $0x38] sm:$0xff]  ;;  %v1134_v48 = vld [vmem:[%s2907_s4 + $0x50] sm:$0xff] }
 0x144   : > { %v1139_v47 = vld [vmem:[%s2907_s4 + $0x78] sm:$0xff] }
 0x146   : > { %850 = vmatpush.bf16.msra.mxu0 %v1695_v10  ;;  %1752 = vmatpush.bf16.msra.mxu2 %v1695_v10 }
 0x147   : > { %953 = vperm.xlu0 %1980, %v903_v11   ;;  %958 = vperm.xlu1 %1981, %v904_v12  }
 0x149   : > { %943 = vperm.xlu2 %1982, %v901_v24  }
 0x14a   : > { %851 = vmatpush.bf16.msra.mxu0 %v1694_v14  ;;  %1753 = vmatpush.bf16.msra.mxu2 %v1694_v14 }
 0x14e   : > { %852 = vmatpush.bf16.msra.mxu0 %v1693_v15  ;;  %1754 = vmatpush.bf16.msra.mxu2 %v1693_v15 }
 0x14f   : > { %948 = vperm.xlu0 %1980, %v902_v16   ;;  %933 = vperm.xlu1 %1981, %v899_v17  }
 0x151   : > { %938 = vperm.xlu2 %1982, %v900_v27  }
 0x152   : > { %853 = vmatpush.bf16.msra.mxu0 %v1692_v19  ;;  %1755 = vmatpush.bf16.msra.mxu2 %v1692_v19 }
 0x155   : > { %854 = vmatmul.bf16.vlgmr.msra.gmra.mxu0 %v1684_v20  ;;  %874 = vmatmul.bf16.vlgmr.msra.gmra.mxu2 %v1688_v21 }
 0x157   : > { %923 = vperm.xlu0 %1980, %v897_v22   ;;  %928 = vperm.xlu1 %1981, %v898_v23  }
 0x159   : > { %913 = vperm.xlu2 %1982, %v895_v32   ;;  %v1015_v32 = vld [vmem:[%s2877_s17] sm:$0xff] }
 0x15f   : > { %918 = vperm.xlu0 %1980, %v896_v25   ;;  %1142 = vperm.xlu1 %1981, %v1124_v26  }
 0x161   : > { %1147 = vperm.xlu2 %1982, %v1125_v35  }
 0x165   : > { %859 = vmatmul.bf16.gmra.mxu0 %v1685_v28  ;;  %879 = vmatmul.bf16.gmra.mxu2 %v1689_v29 }
 0x167   : > { %1152 = vperm.xlu0 %1980, %v1126_v30   ;;  %1157 = vperm.xlu1 %1981, %v1127_v31  }
 0x169   : > { %1162 = vperm.xlu2 %1982, %v1128_v40  }
 0x16f   : > { %1167 = vperm.xlu0 %1980, %v1129_v33   ;;  %1172 = vperm.xlu1 %1981, %v1130_v34   ;;  %v1017_v33 = vld [vmem:[%s2877_s17 + $0x10] sm:$0xff] }
 0x170   : > { %v1027_v40 = vunpack.c.0.s8 %v1017_v33 }
 0x171   : > { %1177 = vperm.xlu2 %1982, %v1131_v43  }
 0x175   : > { %864 = vmatmul.bf16.gmra.mxu0 %v1686_v36  ;;  %884 = vmatmul.bf16.gmra.mxu2 %v1690_v37 }
 0x177   : > { %1182 = vperm.xlu0 %1980, %v1132_v38   ;;  %1187 = vperm.xlu1 %1981, %v1133_v39   ;;  %v1019_v38 = vunpack.c.0.s8 %v1015_v32  ;;  %v1020_v39 = vunpack.c.1.s8 %v1015_v32 }
 0x179   : > { %1192 = vperm.xlu2 %1982, %v1134_v48   ;;  %v1036_v48 = vcvt.s32.f32 %v1020_v39 }
 0x17f   : > { %1197 = vperm.xlu0 %1980, %v1135_v41   ;;  %1202 = vperm.xlu1 %1981, %v1136_v42   ;;  %v1028_v41 = vunpack.c.1.s8 %v1017_v33 }
 0x181   : > { %1207 = vperm.xlu2 %1982, %v1137_v49   ;;  %v1043_v49 = vcvt.s32.f32 %v1027_v40 }
 0x185   : > { %869 = vmatmul.bf16.gmra.mxu0 %v1687_v44  ;;  %889 = vmatmul.bf16.gmra.mxu2 %v1691_v45 }
 0x187   : > { %1212 = vperm.xlu0 %1980, %v1138_v46   ;;  %1217 = vperm.xlu1 %1981, %v1139_v47   ;;  %v1035_v47 = vcvt.s32.f32 %v1019_v38  ;;  %v1109_v38 = vld [vmem:[#allocation2] sm:$0xff] }
 0x193   : > { %v964_v0 = vpop.permute.xlu2 %963 }
 0x19b   : > { %v969_v5 = vpop.permute.xlu2 %968 }
 0x1a3   : > { %v944_v15 = vpop.permute.xlu2 %943 }
 0x1a9   : > { %v984_v58 = vpop.permute.xlu0 %983  ;;  %v974_v60 = vpop.permute.xlu1 %973 }
 0x1ab   : > { %v939_v28 = vpop.permute.xlu2 %938 }
 0x1b1   : > { %v989_v63 = vpop.permute.xlu0 %988  ;;  %v979_v1 = vpop.permute.xlu1 %978 }
 0x1b3   : > { %v914_v43 = vpop.permute.xlu2 %913 }
 0x1b9   : > { %v954_v4 = vpop.permute.xlu0 %953  ;;  %v959_v9 = vpop.permute.xlu1 %958 }
 0x1c1   : > { %v949_v14 = vpop.permute.xlu0 %948  ;;  %v934_v21 = vpop.permute.xlu1 %933 }
 0x1c9   : > { %v924_v27 = vpop.permute.xlu0 %923  ;;  %v929_v34 = vpop.permute.xlu1 %928 }
 0x1d1   : > { %v919_v42 = vpop.permute.xlu0 %918 }
 0x1d2   : > { %v2978_v50 = vpop.f32.mrf.mxu0 }
 0x1d3   : > { %v991_v45 = vmul.f32 %v914_v43, %v2978_v50  ;;  %v1030_v50 = vunpack.c.3.s8 %v1017_v33 }
 0x1d8   : > { %v875_v51 = vpop.f32.mrf.mxu2 }
 0x1d9   : > { %v999_v23 = vmul.f32 %v954_v4, %v875_v51  ;;  %v1044_v51 = vcvt.s32.f32 %v1028_v41 }
 0x1da   : > { %v2980_v52 = vpop.f32.mrf.mxu0 }
 0x1db   : > { %v992_v44 = vmul.f32 %v919_v42, %v2980_v52  ;;  %v1022_v52 = vunpack.c.3.s8 %v1015_v32 }
 0x1e0   : > { %v877_v53 = vpop.f32.mrf.mxu2 }
 0x1e1   : > { %v1000_v19 = vmul.f32 %v959_v9, %v877_v53  ;;  %v1007_v53 = vpack.c.bf16 %v992_v44, %v991_v45  ;;  %v1117_v45 = vld [vmem:[#allocation2 + $0x20] sm:$0xff] }
 0x1e2   : > { %v860_v55 = vpop.f32.mrf.mxu0 }
 0x1e3   : > { %v1011_v26 = vpack.c.bf16 %v1000_v19, %v999_v23  ;;  %v993_v35 = vmul.f32 %v924_v27, %v860_v55  ;;  %v1055_v55 = vpack.c.bf16 %v1044_v51, %v1043_v49  ;;  %v1153_v23 = vpop.permute.xlu0 %1152 }
 0x1e8   : > { %v880_v54 = vpop.f32.mrf.mxu2 }
 0x1e9   : > { %v1001_v18 = vmul.f32 %v964_v0, %v880_v54  ;;  %v1051_v54 = vpack.c.bf16 %v1036_v48, %v1035_v47  ;;  %v1016_v0 = vld [vmem:[%s2877_s17 + $0x8] sm:$0xff]  ;;  %v1110_v48 = vld [vmem:[#allocation2 + $0x58] sm:$0xff] }
 0x1ea   : > { %v862_v57 = vpop.f32.mrf.mxu0 }
 0x1eb   : > { %v994_v36 = vmul.f32 %v929_v34, %v862_v57  ;;  %v1029_v57 = vunpack.c.2.s8 %v1017_v33 }
 0x1ed   : > { %v1008_v46 = vpack.c.bf16 %v994_v36, %v993_v35  ;;  %v1116_v35 = vld [vmem:[#allocation2 + $0x40] sm:$0xff] }
 0x1f0   : > { %v882_v56 = vpop.f32.mrf.mxu2 }
 0x1f1   : > { %v1002_v16 = vmul.f32 %v969_v5, %v882_v56  ;;  %v1021_v56 = vunpack.c.2.s8 %v1015_v32 }
 0x1f2   : > { %v865_v61 = vpop.f32.mrf.mxu0 }
 0x1f3   : > { %v1012_v20 = vpack.c.bf16 %v1002_v16, %v1001_v18  ;;  %v995_v29 = vmul.f32 %v934_v21, %v865_v61  ;;  %v1046_v61 = vcvt.s32.f32 %v1030_v50  ;;  %v1111_v50 = vld [vmem:[#allocation2 + $0x18] sm:$0xff] }
 0x1f8   : > { %v885_v59 = vpop.f32.mrf.mxu2 }
 0x1f9   : > { %v1003_v13 = vmul.f32 %v974_v60, %v885_v59  ;;  %v1038_v59 = vcvt.s32.f32 %v1022_v52  ;;  %v1045_v60 = vcvt.s32.f32 %v1029_v57 }
 0x1fa   : > { %v867_v2 = vpop.f32.mrf.mxu0 }
 0x1fb   : > { %v996_v30 = vmul.f32 %v939_v28, %v867_v2  ;;  %v1023_v2 = vunpack.c.0.s8 %v1016_v0  ;;  %v1108_v28 = vld [vmem:[#allocation2 + $0x30] sm:$0xff] }
 0x1fd   : > { %v1009_v37 = vpack.c.bf16 %v996_v30, %v995_v29 }
 0x200   : > { %v887_v62 = vpop.f32.mrf.mxu2 }
 0x201   : > { %v1004_v11 = vmul.f32 %v979_v1, %v887_v62  ;;  %v1018_v1 = vld [vmem:[%s2877_s17 + $0x18] sm:$0xff] }
 0x202   : > { %v870_v10 = vpop.f32.mrf.mxu0  ;;  %v1031_v4 = vunpack.c.0.s8 %v1018_v1  ;;  %v1032_v5 = vunpack.c.1.s8 %v1018_v1 }
 0x203   : > { %v1013_v17 = vpack.c.bf16 %v1004_v11, %v1003_v13  ;;  %v997_v24 = vmul.f32 %v944_v15, %v870_v10  ;;  %v1026_v13 = vunpack.c.3.s8 %v1016_v0  ;;  %v1034_v15 = vunpack.c.3.s8 %v1018_v1 }
 0x204   : > { %v1048_v9 = vcvt.s32.f32 %v1032_v5 }
 0x205   : > { %v1050_v19 = vcvt.s32.f32 %v1034_v15 }
 0x208   : > { %v890_v3 = vpop.f32.mrf.mxu2 }
 0x209   : > { %v1005_v7 = vmul.f32 %v984_v58, %v890_v3  ;;  %v1037_v58 = vcvt.s32.f32 %v1021_v56  ;;  %v1024_v3 = vunpack.c.1.s8 %v1016_v0  ;;  %v1118_v56 = vld [vmem:[#allocation2 + $0x10] sm:$0xff] }
 0x20a   : > { %v872_v22 = vpop.f32.mrf.mxu0 }
 0x20b   : > { %v998_v25 = vmul.f32 %v949_v14, %v872_v22  ;;  %v1052_v62 = vpack.c.bf16 %v1038_v59, %v1037_v58  ;;  %v1033_v14 = vunpack.c.2.s8 %v1018_v1  ;;  %v1143_v22 = vpop.permute.xlu1 %1142 }
 0x20d   : > { %v1010_v31 = vpack.c.bf16 %v998_v25, %v997_v24  ;;  %v1049_v18 = vcvt.s32.f32 %v1033_v14  ;;  %v1148_v24 = vpop.permute.xlu2 %1147 }
 0x20f   : > { %v1058_v21 = vpack.c.bf16 %v1050_v19, %v1049_v18 }
 0x210   : > { %v892_v6 = vpop.f32.mrf.mxu2 }
 0x211   : > { %v1006_v8 = vmul.f32 %v989_v63, %v892_v6  ;;  %v1056_v63 = vpack.c.bf16 %v1046_v61, %v1045_v60  ;;  %v1039_v6 = vcvt.s32.f32 %v1023_v2  ;;  %v1112_v2 = vld [vmem:[#allocation2 + $0x50] sm:$0xff] }
 0x213   : > { %v1014_v12 = vpack.c.bf16 %v1006_v8, %v1005_v7  ;;  %v1040_v7 = vcvt.s32.f32 %v1024_v3  ;;  %v1047_v8 = vcvt.s32.f32 %v1031_v4  ;;  %v1158_v25 = vpop.permute.xlu1 %1157 }
 0x215   : > { %1059 = vmatpush.bf16.msra.mxu1 %v1014_v12  ;;  %1756 = vmatpush.bf16.msra.mxu3 %v1014_v12  ;;  %v1053_v10 = vpack.c.bf16 %v1040_v7, %v1039_v6  ;;  %v1057_v11 = vpack.c.bf16 %v1048_v9, %v1047_v8  ;;  %v1025_v12 = vunpack.c.2.s8 %v1016_v0  ;;  %v1163_v30 = vpop.permute.xlu2 %1162  ;;  %v1120_v8 = vld [vmem:[#allocation2 + $0x60] sm:$0xff] }
 0x217   : > { %v1041_v16 = vcvt.s32.f32 %v1025_v12 }
 0x219   : > { %1060 = vmatpush.bf16.msra.mxu1 %v1013_v17  ;;  %1757 = vmatpush.bf16.msra.mxu3 %v1013_v17  ;;  %v1042_v17 = vcvt.s32.f32 %v1026_v13 }
 0x21b   : > { %v2988_v32 = vpop.permute.xlu1 %1172 }
 0x21d   : > { %1061 = vmatpush.bf16.msra.mxu1 %v1012_v20  ;;  %1758 = vmatpush.bf16.msra.mxu3 %v1012_v20  ;;  %v1054_v20 = vpack.c.bf16 %v1042_v17, %v1041_v16  ;;  %v2990_v42 = vpop.permute.xlu2 %1177  ;;  %v1121_v17 = vld [vmem:[#allocation2 + $0x70] sm:$0xff] }
 0x221   : > { %1062 = vmatpush.bf16.msra.mxu1 %v1011_v26  ;;  %1759 = vmatpush.bf16.msra.mxu3 %v1011_v26  ;;  %v1168_v26 = vpop.permute.xlu0 %1167 }
 0x223   : > { %v1188_v43 = vpop.permute.xlu1 %1187 }
 0x225   : > { %1063 = vmatpush.bf16.msra.mxu1 %v1010_v31  ;;  %1760 = vmatpush.bf16.msra.mxu3 %v1010_v31 }
 0x229   : > { %1064 = vmatpush.bf16.msra.mxu1 %v1009_v37  ;;  %1761 = vmatpush.bf16.msra.mxu3 %v1009_v37  ;;  %v1183_v33 = vpop.permute.xlu0 %1182 }
 0x22b   : > { %v1203_v6 = vpop.permute.xlu1 %1202 }
 0x22d   : > { %1065 = vmatpush.bf16.msra.mxu1 %v1008_v46  ;;  %1762 = vmatpush.bf16.msra.mxu3 %v1008_v46 }
 0x231   : > { %1066 = vmatpush.bf16.msra.mxu1 %v1007_v53  ;;  %1763 = vmatpush.bf16.msra.mxu3 %v1007_v53  ;;  %v1198_v61 = vpop.permute.xlu0 %1197 }
 0x234   : > { %1067 = vmatmul.bf16.vlgmr.msra.gmra.mxu1 %v1051_v54  ;;  %1087 = vmatmul.bf16.vlgmr.msra.gmra.mxu3 %v1055_v55  ;;  %v1193_v54 = vpop.permute.xlu2 %1192 }
 0x23c   : > { %v1208_v15 = vpop.permute.xlu2 %1207 }
 0x244   : > { %1072 = vmatmul.bf16.gmra.mxu1 %v1052_v62  ;;  %1092 = vmatmul.bf16.gmra.mxu3 %v1056_v63  ;;  %v1119_v63 = vld [vmem:[#allocation2 + $0x38] sm:$0xff] }
 0x254   : > { %1077 = vmatmul.bf16.gmra.mxu1 %v1053_v10  ;;  %1097 = vmatmul.bf16.gmra.mxu3 %v1057_v11  ;;  %v1113_v11 = vld [vmem:[#allocation2 + $0x68] sm:$0xff] }
 0x264   : > { %1082 = vmatmul.bf16.gmra.mxu1 %v1054_v20  ;;  %1102 = vmatmul.bf16.gmra.mxu3 %v1058_v21  ;;  %v1114_v20 = vld [vmem:[#allocation2 + $0x8] sm:$0xff] }
 0x2b1   : > { %v1068_v27 = vpop.f32.mrf.mxu1 }
 0x2b2   : > { %v1220_v29 = vmul.f32 %v1143_v22, %v1068_v27  ;;  %v1122_v27 = vld [vmem:[#allocation2 + $0x78] sm:$0xff] }
 0x2b4   : > { %v1236_v31 = vadd.f32 %v1220_v29, %v1108_v28  ;;  %v1115_v29 = vld [vmem:[#allocation2 + $0x48] sm:$0xff] }
 0x2b6   : > { %1252 = vst [vmem:[#allocation2 + $0x30] sm:$0xff] %v1236_v31 }
 0x2b7   : > { %v1088_v34 = vpop.f32.mrf.mxu3 }
 0x2b8   : > { %v1228_v36 = vmul.f32 %v1183_v33, %v1088_v34  ;;  %v1218_v34 = vpop.permute.xlu1 %1217 }
 0x2b9   : > { %v1070_v37 = vpop.f32.mrf.mxu1 }
 0x2ba   : > { %v1244_v39 = vadd.f32 %v1228_v36, %v1116_v35  ;;  %v1221_v40 = vmul.f32 %v1148_v24, %v1070_v37  ;;  %v1213_v24 = vpop.permute.xlu0 %1212  ;;  %v1123_v36 = vld [vmem:[#allocation2 + $0x28] sm:$0xff] }
 0x2bc   : > { %1260 = vst [vmem:[#allocation2 + $0x40] sm:$0xff] %v1244_v39  ;;  %v1237_v41 = vadd.f32 %v1221_v40, %v1109_v38 }
 0x2be   : > { %1253 = vst [vmem:[#allocation2] sm:$0xff] %v1237_v41 }
 0x2bf   : > { %v1090_v44 = vpop.f32.mrf.mxu3 }
 0x2c0   : > { %v1229_v46 = vmul.f32 %v1188_v43, %v1090_v44 }
 0x2c1   : > { %v1073_v47 = vpop.f32.mrf.mxu1 }
 0x2c2   : > { %v1245_v49 = vadd.f32 %v1229_v46, %v1117_v45  ;;  %v1222_v51 = vmul.f32 %v1153_v23, %v1073_v47 }
 0x2c4   : > { %1261 = vst [vmem:[#allocation2 + $0x20] sm:$0xff] %v1245_v49  ;;  %v1238_v53 = vadd.f32 %v1222_v51, %v1110_v48 }
 0x2c6   : > { %1254 = vst [vmem:[#allocation2 + $0x58] sm:$0xff] %v1238_v53 }
 0x2c7   : > { %v1093_v55 = vpop.f32.mrf.mxu3 }
 0x2c8   : > { %v1230_v52 = vmul.f32 %v1193_v54, %v1093_v55 }
 0x2c9   : > { %v1075_v57 = vpop.f32.mrf.mxu1 }
 0x2ca   : > { %v1246_v58 = vadd.f32 %v1230_v52, %v1118_v56  ;;  %v1223_v59 = vmul.f32 %v1158_v25, %v1075_v57 }
 0x2cc   : > { %1262 = vst [vmem:[#allocation2 + $0x10] sm:$0xff] %v1246_v58  ;;  %v1239_v60 = vadd.f32 %v1223_v59, %v1111_v50 }
 0x2ce   : > { %1255 = vst [vmem:[#allocation2 + $0x18] sm:$0xff] %v1239_v60 }
 0x2cf   : > { %v1095_v62 = vpop.f32.mrf.mxu3 }
 0x2d0   : > { %v1231_v0 = vmul.f32 %v1198_v61, %v1095_v62 }
 0x2d1   : > { %v1078_v1 = vpop.f32.mrf.mxu1 }
 0x2d2   : > { %v1247_v3 = vadd.f32 %v1231_v0, %v1119_v63  ;;  %v1224_v4 = vmul.f32 %v1163_v30, %v1078_v1 }
 0x2d4   : > { %1263 = vst [vmem:[#allocation2 + $0x38] sm:$0xff] %v1247_v3  ;;  %v1240_v5 = vadd.f32 %v1224_v4, %v1112_v2 }
 0x2d6   : > { %1256 = vst [vmem:[#allocation2 + $0x50] sm:$0xff] %v1240_v5 }
 0x2d7   : > { %v1098_v7 = vpop.f32.mrf.mxu3 }
 0x2d8   : > { %v1232_v9 = vmul.f32 %v1203_v6, %v1098_v7 }
 0x2d9   : > { %v1080_v10 = vpop.f32.mrf.mxu1 }
 0x2da   : > { %v1248_v12 = vadd.f32 %v1232_v9, %v1120_v8  ;;  %v1225_v13 = vmul.f32 %v1168_v26, %v1080_v10 }
 0x2dc   : > { %1264 = vst [vmem:[#allocation2 + $0x60] sm:$0xff] %v1248_v12  ;;  %v1241_v14 = vadd.f32 %v1225_v13, %v1113_v11 }
 0x2de   : > { %1257 = vst [vmem:[#allocation2 + $0x68] sm:$0xff] %v1241_v14 }
 0x2df   : > { %v1100_v16 = vpop.f32.mrf.mxu3 }
 0x2e0   : > { %v1233_v18 = vmul.f32 %v1208_v15, %v1100_v16 }
 0x2e1   : > { %v1083_v19 = vpop.f32.mrf.mxu1 }
 0x2e2   : > { %v1249_v21 = vadd.f32 %v1233_v18, %v1121_v17  ;;  %v1226_v22 = vmul.f32 %v2988_v32, %v1083_v19 }
 0x2e4   : > { %1265 = vst [vmem:[#allocation2 + $0x70] sm:$0xff] %v1249_v21  ;;  %v1242_v23 = vadd.f32 %v1226_v22, %v1114_v20 }
 0x2e6   : > { %1258 = vst [vmem:[#allocation2 + $0x8] sm:$0xff] %v1242_v23 }
 0x2e7   : > { %v1103_v25 = vpop.f32.mrf.mxu3 }
 0x2e8   : > { %v1234_v28 = vmul.f32 %v1213_v24, %v1103_v25 }
 0x2e9   : > { %v1085_v26 = vpop.f32.mrf.mxu1 }
 0x2ea   : > { %v1250_v30 = vadd.f32 %v1234_v28, %v1122_v27  ;;  %v1227_v31 = vmul.f32 %v2990_v42, %v1085_v26 }
 0x2ec   : > { %1266 = vst [vmem:[#allocation2 + $0x78] sm:$0xff] %v1250_v30  ;;  %v1243_v33 = vadd.f32 %v1227_v31, %v1115_v29 }
 0x2ee   : > { %1259 = vst [vmem:[#allocation2 + $0x48] sm:$0xff] %v1243_v33 }
 0x2ef   : > { %v1105_v35 = vpop.f32.mrf.mxu3 }
 0x2f0   : > { %v1235_v37 = vmul.f32 %v1218_v34, %v1105_v35 }
 0x2f2   : > { %v1251_v32 = vadd.f32 %v1235_v37, %v1123_v36 }
 0x2f4   : > { %1267 = vst [vmem:[#allocation2 + $0x28] sm:$0xff] %v1251_v32 }
 0x2f5 PF: > { %s3209_s17 = sld [smem:[#allocation38_spill]] }
 0x2fb   : > { %p1268_p3 = scmp.eq.s32.totalorder %s3209_s17, 1 }
 0x2fc   : > { %v1273_v38 = vld [vmem:[#allocation2 + $0x30] sm:$0xff] (%p1268_p3)  ;;  %v1274_v39 = vld [vmem:[#allocation2] sm:$0xff] (%p1268_p3)  ;;  %v1275_v41 = vld [vmem:[#allocation2 + $0x58] sm:$0xff] (%p1268_p3) }
 0x2fd   : > { %1272 = sbr.rel (!%p1268_p3) target bundleno = 780 (0x30c), region = 76  ;;  %v1983_v40 = vld [vmem:[%s680_s29] ss:$0 sm:$0xff] (%p1268_p3)  ;;  %v1276_v42 = vld [vmem:[#allocation2 + $0x18] sm:$0xff] (%p1268_p3)  ;;  %v1277_v43 = vld [vmem:[#allocation2 + $0x50] sm:$0xff] (%p1268_p3) }
 0x2fe   : > { %v1278_v44 = vld [vmem:[#allocation2 + $0x68] sm:$0xff] (%p1268_p3)  ;;  %v1293_v46 = vadd.f32 (%p1268_p3), %v1983_v40, %v1273_v38  ;;  %v1294_v47 = vadd.f32 (%p1268_p3), %v1983_v40, %v1274_v39  ;;  %v1295_v48 = vadd.f32 (%p1268_p3), %v1983_v40, %v1275_v41  ;;  %v1296_v49 = vadd.f32 (%p1268_p3), %v1983_v40, %v1276_v42  ;;  %v1281_v52 = vld [vmem:[#allocation2 + $0x40] sm:$0xff] (%p1268_p3)  ;;  %v1283_v61 = vld [vmem:[#allocation2 + $0x10] sm:$0xff] (%p1268_p3) }
 0x2ff   : > { %v1279_v45 = vld [vmem:[#allocation2 + $0x8] sm:$0xff] (%p1268_p3)  ;;  %v1297_v53 = vadd.f32 (%p1268_p3), %v1983_v40, %v1277_v43  ;;  %v1298_v54 = vadd.f32 (%p1268_p3), %v1983_v40, %v1278_v44  ;;  %v1282_v57 = vld [vmem:[#allocation2 + $0x20] sm:$0xff] (%p1268_p3)  ;;  %v1284_v62 = vld [vmem:[#allocation2 + $0x38] sm:$0xff] (%p1268_p3)  ;;  %v1301_v7 = vadd.f32 (%p1268_p3), %v1983_v40, %v1281_v52  ;;  %v1303_v13 = vadd.f32 (%p1268_p3), %v1983_v40, %v1283_v61 }
 0x300   : > { %v1280_v51 = vld [vmem:[#allocation2 + $0x48] sm:$0xff] (%p1268_p3)  ;;  %v1299_v55 = vadd.f32 (%p1268_p3), %v1983_v40, %v1279_v45  ;;  %v1309_v50 = vmax.f32 (%p1268_p3), %v1293_v46, 0.0  ;;  %v1310_v58 = vmax.f32 (%p1268_p3), %v1294_v47, 0.0  ;;  %v1311_v59 = vmax.f32 (%p1268_p3), %v1295_v48, 0.0  ;;  %v1285_v3 = vld [vmem:[#allocation2 + $0x60] sm:$0xff] (%p1268_p3)  ;;  %v1286_v4 = vld [vmem:[#allocation2 + $0x70] sm:$0xff] (%p1268_p3) }
 0x301   : > { %v1300_v56 = vadd.f32 (%p1268_p3), %v1983_v40, %v1280_v51  ;;  %v1312_v60 = vmax.f32 (%p1268_p3), %v1296_v49, 0.0  ;;  %v1313_v63 = vmax.f32 (%p1268_p3), %v1297_v53, 0.0  ;;  %v1314_v0 = vmax.f32 (%p1268_p3), %v1298_v54, 0.0  ;;  %v1287_v9 = vld [vmem:[#allocation2 + $0x78] sm:$0xff] (%p1268_p3)  ;;  %v1288_v10 = vld [vmem:[#allocation2 + $0x28] sm:$0xff] (%p1268_p3) }
 0x302   : > { %v1315_v1 = vmax.f32 %v1299_v55, 0.0  ;;  %v1704_v5 = vpack.c.bf16 %v1310_v58, %v1309_v50  ;;  %v1302_v8 = vadd.f32 %v1983_v40, %v1282_v57  ;;  %v1304_v14 = vadd.f32 %v1983_v40, %v1284_v62 }
 0x303   : > { %v1316_v2 = vmax.f32 %v1300_v56, 0.0  ;;  %v1709_v6 = vpack.c.bf16 %v1312_v60, %v1311_v59  ;;  %v1714_v11 = vpack.c.bf16 %v1314_v0, %v1313_v63  ;;  %v1317_v15 = vmax.f32 %v1301_v7, 0.0 }
 0x304   : > { %1705 = vst [vmem:[%s2926_s6] sm:$0xff] %v1704_v5   ;;  %v1318_v16 = vmax.f32 %v1302_v8, 0.0  ;;  %v1305_v17 = vadd.f32 %v1983_v40, %v1285_v3  ;;  %v1306_v18 = vadd.f32 %v1983_v40, %v1286_v4  ;;  %v1319_v19 = vmax.f32 %v1303_v13, 0.0 }
 0x305   : > { %v1719_v12 = vpack.c.bf16 %v1316_v2, %v1315_v1  ;;  %1741 = vst [vmem:[%s2926_s6 + $0x8] sm:$0xff] %v1709_v6   ;;  %v1320_v20 = vmax.f32 %v1304_v14, 0.0  ;;  %v1307_v21 = vadd.f32 %v1983_v40, %v1287_v9  ;;  %v1308_v22 = vadd.f32 %v1983_v40, %v1288_v10 }
 0x306   : > { %1742 = vst [vmem:[%s2926_s6 + $0x10] sm:$0xff] %v1714_v11   ;;  %v1724_v23 = vpack.c.bf16 %v1318_v16, %v1317_v15  ;;  %v1321_v24 = vmax.f32 %v1305_v17, 0.0  ;;  %v1322_v25 = vmax.f32 %v1306_v18, 0.0 }
 0x307   : > { %1743 = vst [vmem:[%s2926_s6 + $0x18] sm:$0xff] %v1719_v12   ;;  %v1729_v27 = vpack.c.bf16 %v1320_v20, %v1319_v19  ;;  %v1323_v28 = vmax.f32 %v1307_v21, 0.0  ;;  %v1324_v26 = vmax.f32 %v1308_v22, 0.0 }
 0x308   : > { %1744 = vst [vmem:[%s2926_s6 + $0x20] sm:$0xff] %v1724_v23   ;;  %v1734_v29 = vpack.c.bf16 %v1322_v25, %v1321_v24 }
 0x309   : > { %1745 = vst [vmem:[%s2926_s6 + $0x28] sm:$0xff] %v1729_v27   ;;  %v1739_v30 = vpack.c.bf16 %v1324_v26, %v1323_v28 }
 0x30a   : > { %1746 = vst [vmem:[%s2926_s6 + $0x30] sm:$0xff] %v1734_v29  }
 0x30b   : > { %1747 = vst [vmem:[%s2926_s6 + $0x38] sm:$0xff] %v1739_v30  }
 0x30c PF: > { %s46_s16 = sadd.s32 1, %s2350_s16   ;;  %s3212_s0 = sld [smem:[#allocation32_spill]] }
 0x30d   : > { %p3009_p11 = scmp.ge.s32.totalorder %s46_s16, 6   ;;  %s3213_s1 = sld [smem:[#allocation33_spill]] }
 0x30e   : > { %s3214_s27 = sld [smem:[#allocation34_spill]]  ;;  %s3225_s21 = smov %s3258_s30 }
 0x30f   : > { %s3215_s23 = sld [smem:[#allocation48_spill]]  ;;  %s3227_s22 = smov %s2290_s2 }
 0x310   : > { %s3216_s4 = sld [smem:[#allocation51_spill]]  ;;  %s3229_s24 = smov %s2302_s25 }
 0x311   : > { %s3217_s9 = sld [smem:[#allocation35_spill]]  ;;  %s3230_s25 = smov %s2306_s26 }
 0x312   : > { %s3218_s28 = sld [smem:[#allocation36_spill]]  ;;  %s3233_s30 = smov %s2326_s10 }
 0x313   : > { %s3219_s29 = sld [smem:[#allocation46_spill]] }
 0x314   : > { %s3220_s20 = sld [smem:[#allocation37_spill]]  ;;  %s3228_s2 = smov %s3214_s27 }
 0x315   : > { %s3221_s11 = sld [smem:[#allocation49_spill]] }
 0x316   : > { %s3222_s12 = sld [smem:[#allocation40_spill]]  ;;  %s3231_s26 = smov %s3216_s4 }
 0x317   : > { %s3223_s13 = sld [smem:[#allocation41_spill]]  ;;  %s3232_s27 = smov %s3217_s9 }
 0x318   : > { %s3224_s14 = sld [smem:[#allocation42_spill]]  ;;  %45 = sbr.rel (!%p3009_p11) target bundleno = 29 (0x1d), region = 147 }
 0x319   : > { %s3226_s15 = sld [smem:[#allocation43_spill]] }
 0x31a   : > { %s3234_s10 = smov %s3220_s20 }
 0x31d   :  { %1387 = vsyncpa [#allocation8], 1 }
 0x31e   :  { %1389 = vsyncpa [#allocation8 + $0x1], 1 }
 0x31f   :  { %1390 = vsyncpa [#allocation10], 1 }
 0x320   :  { %1392 = vsyncpa [#allocation10 + $0x1], 1 }
 0x321   :  { %1393 = vsyncpa [#allocation13], 1 }
 0x322   :  { %1395 = vsyncpa [#allocation13 + $0x1], 1 }

// kernel: forward.3
= control target key start
LH: loop header
LB: loop body
LE: loop exit
PB: predicated region body
PF: predicated region fallthrough
CT: control target
= control target key end

     0   :  { %s2282_s15 = smov [#allocation4]   ;;  %s2283_s16 = smov [#allocation5]   ;;  %s2966_s0 = inlined_call_operand.vmem [shape: s32[2,2], index: 0, kind: input, shape index: {}]   ;;  %s2967_s3 = inlined_call_operand.hbm [shape: s8[3,128,128], index: 3, kind: input, shape index: {}]   ;;  %s2968_s4 = inlined_call_operand.vmem [shape: bf16[2,128,128], index: 4, kind: input, shape index: {}]   ;;  %s2969_s5 = inlined_call_operand.hbm [shape: bf16[3,128,128], index: 5, kind: input, shape index: {}]   ;;  %s2970_s6 = inlined_call_operand.hbm [shape: f32[3,128,1], index: 6, kind: input, shape index: {}]   ;;  %s2971_s7 = inlined_call_operand.hbm [shape: f32[3,128,1], index: 7, kind: input, shape index: {}]   ;;  %s2972_s8 = inlined_call_operand.vmem [shape: f32[2,1,128], index: 8, kind: input, shape index: {}]   ;;  %s2973_s9 = inlined_call_operand.hbm [shape: f32[2,128,128], index: 9, kind: output, shape index: {}]   ;;  %s2974_s1 = inlined_call_operand.vmem [shape: s32[2,2], index: 1, kind: input, shape index: {}]   ;;  %s2975_s2 = inlined_call_operand.vmem [shape: s32[2], index: 2, kind: input, shape index: {}]  }
   0x1   :  { %3009 = sst [smem:[#allocation51_spill]] %s2967_s3  ;;  %s15_s11 = sshll.u32 %s2966_s0, 4  ;;  %s16_s11 = int_to_ptr.vmem [resolvable:$true] %s15_s11 }
   0x2   :  { %3010 = sst [smem:[#allocation52_spill]] %s2968_s4  ;;  %s20_s14 = sshll.u32 %s2974_s1, 4  ;;  %s21_s14 = int_to_ptr.vmem [resolvable:$true] %s20_s14 }
   0x3   :  { %3011 = sst [smem:[#allocation53_spill]] %s2969_s5  ;;  %s25_s19 = sshll.u32 %s2975_s2, 4  ;;  %s26_s19 = int_to_ptr.vmem [resolvable:$true] %s25_s19 }
   0x4   :  { %3012 = sst [smem:[#allocation54_spill]] %s2970_s6  ;;  %s2284_s20 = smov [#allocation6]  }
   0x5   :  { %3013 = sst [smem:[#allocation55_spill]] %s2971_s7 }
   0x6   :  { %3014 = sst [smem:[#allocation56_spill]] %s2972_s8 }
   0x7   :  { %3015 = sst [smem:[#allocation57_spill]] %s2973_s9 }
   0x8   :  { %18 = dma.vmem_to_smem %s16_s11, 32, %s2282_s15, [#allocation3] }
   0x9   :  { %23 = dma.vmem_to_smem %s21_s14, 32, %s2283_s16, [#allocation3] }
   0xa   :  { %28 = dma.vmem_to_smem %s26_s19, 16, %s2284_s20, [#allocation3] }
   0xb   :  { %2180 = dma.done.wait [#allocation3], 80 }
   0xc   :  { %2181 = vsyncadd [#allocation3], 4294967216 }
   0xd   :  { %31 = sfence }
   0xe   :  { %32 = vsyncpa [#allocation8], 0 }
   0xf   :  { %34 = vsyncpa [#allocation8 + $0x1], 0 }
  0x10   :  { %35 = vsyncpa [#allocation11], 0 }
  0x11   :  { %37 = vsyncpa [#allocation11 + $0x1], 0 }
  0x12   :  { %38 = vsyncpa [#allocation14], 0 }
  0x13   :  { %40 = vsyncpa [#allocation14 + $0x1], 0 }
  0x14   :  { %41 = vsyncpa [#allocation9], 0 }
  0x15   :  { %43 = vsyncpa [#allocation9 + $0x1], 0  ;;  %s2352_s0 = smov 0   ;;  %s2354_s1 = smov 0  }
  0x16   :  { %s2356_s21 = smov 0   ;;  %s2358_s2 = smov 0  }
  0x17   :  { %s2360_s22 = smov 0   ;;  %s2362_s23 = smov 0  }
  0x18   :  { %s2364_s24 = smov 0   ;;  %s2366_s25 = smov 0  }
  0x19   :  { %s2368_s26 = smov 0   ;;  %s2370_s27 = smov 0  }
  0x1a   :  { %s2372_s28 = smov 0   ;;  %s2374_s29 = smov 0  }
  0x1b   :  { %s2376_s30 = smov 0   ;;  %s2378_s10 = smov 0  }
  0x1c   :  { %s2380_s11 = smov 0   ;;  %s2382_s12 = smov 0  }
  0x1d   :  { %s2384_s13 = smov 0   ;;  %s2386_s14 = smov 0  }
  0x1e   :  { %s2388_s15 = smov 0   ;;  %s2390_s16 = smov 0  }
  0x1f LB: > { %3016 = sst [smem:[#allocation30_spill]] %s2204_s0  ;;  %s2453_s17 = sadd.s32 4294967295, %s2280_s16   ;;  %s2280_s16 = sphi %s2390_s16, %s49_s16   ;;  %s2276_s15 = sphi %s2388_s15, %s3115_s15   ;;  %s2272_s14 = sphi %s2386_s14, %s3114_s14   ;;  %s2268_s13 = sphi %s2384_s13, %s3113_s13   ;;  %s2264_s12 = sphi %s2382_s12, %s3112_s12   ;;  %s2260_s11 = sphi %s2380_s11, %s3111_s11   ;;  %s2256_s10 = sphi %s2378_s10, %s3123_s10   ;;  %s2252_s30 = sphi %s2376_s30, %s3122_s30   ;;  %s2248_s29 = sphi %s2374_s29, %s3109_s29   ;;  %s2244_s28 = sphi %s2372_s28, %s3108_s28   ;;  %s2240_s27 = sphi %s2370_s27, %s3107_s27   ;;  %s2236_s26 = sphi %s2368_s26, %s3121_s26   ;;  %s2232_s25 = sphi %s2366_s25, %s3120_s25   ;;  %s2228_s24 = sphi %s2364_s24, %s3119_s24   ;;  %s2224_s23 = sphi %s2362_s23, %s3118_s23   ;;  %s2220_s22 = sphi %s2360_s22, %s3117_s22   ;;  %s2216_s2 = sphi %s2358_s2, %s3116_s2   ;;  %s2212_s21 = sphi %s2356_s21, %s3104_s21   ;;  %s2208_s1 = sphi %s2354_s1, %s3103_s1   ;;  %s2204_s0 = sphi %s2352_s0, %s3102_s0  }
  0x20   : > { %3017 = sst [smem:[#allocation31_spill]] %s2208_s1  ;;  %s67_s19 = sadd.s32 1, %s2272_s14 }
  0x21   : > { %3018 = sst [smem:[#allocation32_spill]] %s2212_s21  ;;  %s75_s20 = sadd.s32 1, %s2276_s15 }
  0x22   : > { %3019 = sst [smem:[#allocation33_spill]] %s2244_s28  ;;  %p69_p0 = scmp.ge.s32.totalorder %s67_s19, 2 }
  0x23   : > { %3020 = sst [smem:[#allocation34_spill]] %s2248_s29  ;;  %s79_s9 = sshra.s32 %s2272_s14, 7 }
  0x24   : > { %3021 = sst [smem:[#allocation35_spill]] %s2260_s11  ;;  %s81_s4 = sadd.s32 %s2276_s15, %s79_s9 }
  0x25   : > { %3022 = sst [smem:[#allocation36_spill]] %s2264_s12  ;;  %s84_s8 = sand.u32 127, %s2272_s14 }
  0x26   : > { %3023 = sst [smem:[#allocation37_spill]] %s2268_s13  ;;  %s3125_s19 = smov (%p69_p0, %s67_s19), 0 }
  0x27   : > { %3024 = sst [smem:[#allocation38_spill]] %s2272_s14  ;;  %s3127_s20 = smov (!%p69_p0, %s75_s20), %s2276_s15 }
  0x28   : > { %3025 = sst [smem:[#allocation39_spill]] %s2276_s15  ;;  %s1547_s13 = sshll.u32 %s81_s4, 7 }
  0x29   : > { %3026 = sst [smem:[#allocation40_spill]] %s3125_s19  ;;  %s87_s18 = sshra.s32 %s3125_s19, 7 }
  0x2a   : > { %p77_p1 = scmp.ge.s32.totalorder %s3127_s20, 2  ;;  %s2465_s12 = sadd.s32 %s1547_s13, %s84_s8 }
  0x2b   : > { %s92_s9 = sand.u32 127, %s3125_s19  ;;  %p2998_p2 = scmp.eq.s32.totalorder %s2280_s16, 0 }
  0x2c   : > { %s3129_s20 = smov (%p77_p1, %s3127_s20), 0  ;;  %p3000_p3 = scmp.eq.s32.totalorder %s2453_s17, 0 }
  0x2d   : > { %3027 = sst [smem:[#allocation41_spill]] %s3129_s20  ;;  %s89_s14 = sadd.s32 %s87_s18, %s3129_s20 }
  0x2e   : > { %s176_s4 = sld [smem:[#allocation4 + %s2465_s12]]  ;;  %s188_s7 = sadd.s32 1, %s2248_s29 }
  0x2f   : > { %s1548_s8 = sshll.u32 %s89_s14, 7  ;;  %p195_p4 = scmp.ne.s32.totalorder %s2248_s29, %s2244_s28 }
  0x30   : > { %s2477_s13 = sadd.s32 %s1548_s8, %s92_s9  ;;  %p201_p5 = scmp.ne.s32.totalorder %s2244_s28, %s2240_s27 }
  0x31   : > { %s184_s19 = sld [smem:[#allocation4 + %s2477_s13]]  ;;  %p2484_p6 = por %p195_p4, %p2998_p2 }
  0x32   : > { %p2490_p7 = por %p201_p5, %p3000_p3  ;;  %s325_s14 = ssub.s32 %s2276_s15, %s3129_s20 }
  0x33   : > { %p328_p8 = scmp.eq.s32.totalorder %s325_s14, 0  ;;  %s330_s27 = sadd.s32 1, %s2212_s21 }
  0x34   : > { %s3029_s18 = scalar_select %p2490_p7, 1, 0 }
  0x35   : > { %p340_p9 = scmp.ne.s32.totalorder %s2212_s21, %s2208_s1  ;;  %p341_p10 = scmp.eq.s32.totalorder %s2453_s17, 3 }
  0x36   : > { %3030 = sst [smem:[#allocation42_spill]] %s3029_s18  ;;  %p346_p12 = scmp.ne.s32.totalorder %s2208_s1, %s2204_s0 }
  0x37   : > { %s2501_s9 = scalar_select %p328_p8, %s2212_s21, %s330_s27  }
  0x38   : > { %p2503_p11 = por %p341_p10, %p340_p9  ;;  %s185_s18 = ssub.s32 %s176_s4, %s184_s19 }
  0x39   : > { %3031 = sst [smem:[#allocation43_spill]] %s2501_s9  ;;  %s3034_s20 = sadd.s32 4294967294, %s2280_s16  }
  0x3a   : > { %s3032_s8 = scalar_select %p2503_p11, 1, 0 }
  0x3b   : > { %p347_p13 = scmp.eq.s32.totalorder %s3034_s20, 3  ;;  %p186_p0 = scmp.eq.s32.totalorder %s185_s18, 0 }
  0x3c   : > { %3033 = sst [smem:[#allocation44_spill]] %s3032_s8  ;;  %p2997_p4 = scmp.lt.s32.totalorder %s2280_s16, 4 }
  0x3d   : > { %p2511_p1 = por %p347_p13, %p346_p12  ;;  %s429_s27 = sand.u32 1, %s2280_s16  }
  0x3e   : > { %s2517_s15 = scalar_select %p186_p0, %s2248_s29, %s188_s7  }
  0x3f   : > { %s3035_s14 = scalar_select %p2511_p1, 1, 0 }
  0x40   : > { %3037 = sst [smem:[#allocation46_spill]] %s2517_s15  ;;  %s431_s9 = sand.u32 1, %s2248_s29  }
  0x41   : > { %3036 = sst [smem:[#allocation45_spill]] %s3035_s14  ;;  %s1563_s21 = sshll.u32 %s431_s9, 6 }
  0x42   : > { %p2525_p5 = pnand %p2997_p4, %p2484_p6  ;;  %s433_s4 = scalar_lea.vmem [#allocation10], %s1563_s21 }
  0x43   : > { %s1699_s19 = scalar_select %p2484_p6, [#allocation4], [#allocation17] }
  0x44   : > { %s1700_s20 = scalar_select %p2484_p6, %s2465_s12, 0 }
  0x45   : > { %s3131_s19 = smov (!%p2997_p4, %s1699_s19), [#allocation21]  ;;  %s2538_s7 = sshll.u32 %s433_s4, 4  ;;  %s450_s7 = int_to_ptr.vmem [resolvable:$true] %s2538_s7 }
  0x46   : > { %s3133_s20 = smov (!%p2997_p4, %s1700_s20), 0  ;;  %p1575_p8 = scmp.ge.s32.totalorder %s2280_s16, 1 }
  0x47   : > { %s441_s18 = sld [smem:[%s3131_s19 + %s3133_s20]]  ;;  %p527_p9 = scmp.lt.s32.totalorder %s2280_s16, 5 }
  0x48   : > { %s3041_s5 = sld [smem:[#allocation53_spill]]  ;;  %s2550_s21 = scalar_lea.sflag [#allocation11], %s429_s27 }
  0x49   : > { %p2543_p10 = pnand %p1575_p8, %p527_p9  ;;  %p1956_p12 = pneg %p2525_p5 }
  0x4b   : > { %s3039_s9 = scalar_select %p2543_p10, 1, 0 }
  0x4d   : > { %3040 = sst [smem:[#allocation47_spill]] %s3039_s9  ;;  %s1657_s15 = sshll.u32 %s441_s18, 6 }
  0x4e   : > { %s446_s14 = scalar_lea.hbm %s3041_s5, %s1657_s15  ;;  %s1959_s18 = scalar_lea.hbm %s3041_s5, 192 }
  0x4f   : > { %s447_s8 = sshll.u32 %s446_s14, 4  ;;  %s448_s8 = int_to_ptr.hbm [resolvable:$true] %s447_s8 }
  0x50   : > { %s1952_s4 = sshra.s32 %s448_s8, 4  ;;  %s1953_s4 = int_to_ptr.hbm [resolvable:$true] %s1952_s4 }
  0x51   : > { %s1954_s1 = scalar_lea.hbm %s1953_s4, 64  ;;  %p1960_p8 = scmp.lt.s32.totalorder %s1953_s4, %s3041_s5 }
  0x52   : > { %p1955_p6 = scmp.ne.s32.totalorder %s1953_s4, %s1954_s1  ;;  %p1961_p9 = scmp.lt.s32.totalorder %s1959_s18, %s1954_s1 }
  0x54   : > { %p1957_p13 = pnand %p1956_p12, %p1955_p6  ;;  %p1962_p4 = por %p1961_p9, %p1960_p8 }
  0x56   : > { %p1958_p0 = pneg %p1957_p13 }
  0x58   : > { %p1963_p2 = pnand %p1962_p4, %p1958_p0 }
  0x5a   : > { %1966 = shalt.err (!%p1963_p2)
}
  0x5b   : > { %s2285_s29 = smov 64   ;;  %s2286_s28 = smov 4  }
  0x5c   : > { %1724 = dma.hbm_to_vmem [thread:$0]  (!%p2525_p5), %s448_s8, 1024, %s450_s7, %s2550_s21, %s2285_s29, %s2285_s29, %s2286_s28  }
  0x5d   : > { %s86_s1 = sld [smem:[#allocation4 + %s2465_s12]]  ;;  %p109_p2 = scmp.ne.s32.totalorder %s2260_s11, %s2256_s10 }
  0x5e   : > { %s94_s15 = sld [smem:[#allocation4 + %s2477_s13]]  ;;  %p115_p4 = scmp.ne.s32.totalorder %s2256_s10, %s2252_s30 }
  0x5f   : > { %s102_s14 = sadd.s32 1, %s2260_s11  ;;  %s367_s27 = sand.u32 1, %s2260_s11  }
  0x60   : > { %p2573_p6 = por %p3000_p3, %p115_p4  ;;  %p3043_p12 = scmp.eq.s32.totalorder %s2280_s16, 0 }
  0x61   : > { %s1559_s0 = sshll.u32 %s367_s27, 5  ;;  %p3044_p5 = scmp.lt.s32.totalorder %s2280_s16, 4 }
  0x62   : > { %p111_p13 = por %p3043_p12, %p109_p2  ;;  %s371_s7 = scalar_lea.vmem [#allocation7], %s1559_s0 }
  0x63   : > { %s2585_s6 = sshll.u32 %s371_s7, 4  ;;  %p3048_p9 = pmov %p3044_p5 }
  0x64   : > { %s95_s8 = ssub.s32 %s86_s1, %s94_s15  ;;  %p2581_p0 = pnand %p3044_p5, %p111_p13 }
  0x65   : > { %p100_p8 = scmp.eq.s32.totalorder %s95_s8, 0  ;;  %3046 = sst [smem:[#allocation48_spill]] %s2585_s6 }
  0x66   : > { %s1696_s4 = scalar_select %p111_p13, [#allocation4], [#allocation16] }
  0x67   : > { %s2588_s19 = scalar_select %p100_p8, %s2260_s11, %s102_s14  }
  0x68   : > { %s1697_s20 = scalar_select %p111_p13, %s2465_s12, 0 }
  0x69   : > { %3047 = sst [smem:[#allocation49_spill]] %s2588_s19  ;;  %s3135_s4 = smov (!%p3048_p9, %s1696_s4), [#allocation20] }
  0x6a   : > { %p3049_p2 = pmov %p3044_p5  ;;  %s2597_s29 = sld [smem:[#allocation4 + %s2465_s12]] }
  0x6b   : > { %s2600_s28 = sld [smem:[#allocation4 + %s2477_s13]]  ;;  %p239_p4 = scmp.ne.s32.totalorder %s2236_s26, %s2232_s25 }
  0x6c   : > { %s3137_s20 = smov (!%p3049_p2, %s1697_s20), 0  ;;  %p245_p12 = scmp.ne.s32.totalorder %s2232_s25, %s2228_s24 }
  0x6d   : > { %s379_s18 = sld [smem:[%s3135_s4 + %s3137_s20]]  ;;  %s461_s15 = sand.u32 1, %s2236_s26  }
  0x6e   : > { %s3050_s3 = sld [smem:[#allocation51_spill]]  ;;  %p3051_p13 = scmp.eq.s32.totalorder %s2280_s16, 0 }
  0x6f   : > { %p2618_p8 = por %p245_p12, %p3000_p3  ;;  %s1567_s20 = sshll.u32 %s461_s15, 7 }
  0x70   : > { %p2612_p5 = por %p239_p4, %p3051_p13  ;;  %s368_s24 = scalar_lea.sflag [#allocation8], %s367_s27 }
  0x71   : > { %p1986_p2 = pneg %p2581_p0 }
  0x73   : > { %s1656_s1 = sshll.u32 %s379_s18, 5 }
  0x74   : > { %s387_s14 = scalar_lea.hbm %s3050_s3, %s1656_s1  ;;  %s1989_s8 = scalar_lea.hbm %s3050_s3, 96 }
  0x75   : > { %s388_s6 = sshll.u32 %s387_s14, 4  ;;  %s389_s6 = int_to_ptr.hbm [resolvable:$true] %s388_s6 }
  0x76   : > { %s1982_s18 = sshra.s32 %s389_s6, 4  ;;  %s1983_s18 = int_to_ptr.hbm [resolvable:$true] %s1982_s18 }
  0x77   : > { %s1984_s5 = scalar_lea.hbm %s1983_s18, 32  ;;  %p1990_p12 = scmp.lt.s32.totalorder %s1983_s18, %s3050_s3 }
  0x78   : > { %p1985_p9 = scmp.ne.s32.totalorder %s1983_s18, %s1984_s5  ;;  %p1991_p13 = scmp.lt.s32.totalorder %s1989_s8, %s1984_s5 }
  0x7a   : > { %p1987_p1 = pnand %p1986_p2, %p1985_p9  ;;  %p1992_p3 = por %p1991_p13, %p1990_p12 }
  0x7c   : > { %p1988_p4 = pneg %p1987_p1 }
  0x7e   : > { %p1993_p11 = pnand %p1992_p3, %p1988_p4 }
  0x80   : > { %1996 = shalt.err (!%p1993_p11)
}
  0x81   : > { %s3002_s27 = smov 128   ;;  %s3054_s15 = sld [smem:[#allocation48_spill]] }
  0x82   : > { %s3004_s19 = smov 8   ;;  %s227_s18 = ssub.s32 %s2597_s29, %s2600_s28 }
  0x83   : > { %s232_s1 = sadd.s32 1, %s2236_s26  ;;  %p230_p3 = scmp.eq.s32.totalorder %s227_s18, 0 }
  0x84   : > { %s1702_s0 = scalar_select %p2612_p5, [#allocation4], [#allocation18] }
  0x85   : > { %s2643_s8 = scalar_select %p230_p3, %s2236_s26, %s232_s1  }
  0x86   : > { %s1703_s30 = scalar_select %p2612_p5, %s2465_s12, 0 }
  0x87   : > { %s3055_s5 = int_to_ptr.vmem [resolvable:$true] %s3054_s15  ;;  %3056 = sst [smem:[#allocation50_spill]] %s2643_s8 }
  0x88   : > { %1719 = dma.hbm_to_vmem [thread:$0]  (!%p2581_p0), %s389_s6, 512, %s3055_s5, %s368_s24, %s3002_s27, %s3002_s27, %s3004_s19  }
  0x89   : > { %p3057_p11 = scmp.lt.s32.totalorder %s2280_s16, 4  ;;  %s463_s6 = scalar_lea.vmem [#allocation12], %s1567_s20 }
  0x8a   : > { %s2652_s29 = sshll.u32 %s463_s6, 4  ;;  %s2664_s14 = sld [smem:[#allocation4 + %s2465_s12]] }
  0x8b   : > { %s3139_s0 = smov (!%p3057_p11, %s1702_s0), [#allocation22]  ;;  %p3058_p1 = pmov %p3057_p11 }
  0x8c   : > { %3059 = sst [smem:[#allocation48_spill]] %s2652_s29  ;;  %s276_s5 = sadd.s32 1, %s2224_s23 }
  0x8d   : > { %s3141_s30 = smov (!%p3058_p1, %s1703_s30), 0  ;;  %p3060_p0 = pmov %p3058_p1 }
  0x8e   : > { %s471_s24 = sld [smem:[%s3139_s0 + %s3141_s30]]  ;;  %p289_p2 = scmp.ne.s32.totalorder %s2220_s22, %s2216_s2 }
  0x8f   : > { %p2658_p9 = pnand %p3060_p0, %p2612_p5  ;;  %s270_s15 = sld [smem:[#allocation4 + %s2477_s13]] }
  0x90   : > { %s3062_s6 = sld [smem:[#allocation54_spill]]  ;;  %p3063_p12 = scmp.eq.s32.totalorder %s2453_s17, 0 }
  0x91   : > { %p2016_p3 = pneg %p2658_p9 }
  0x92   : > { %p2677_p5 = por %p289_p2, %p3063_p12 }
  0x94   : > { %s1658_s18 = sshll.u32 %s471_s24, 7 }
  0x96   : > { %s478_s27 = scalar_lea.hbm %s3062_s6, %s1658_s18  ;;  %s2019_s24 = scalar_lea.hbm %s3062_s6, 384 }
  0x97   : > { %s479_s7 = sshll.u32 %s478_s27, 4  ;;  %s480_s7 = int_to_ptr.hbm [resolvable:$true] %s479_s7 }
  0x98   : > { %s2012_s30 = sshra.s32 %s480_s7, 4  ;;  %s2013_s30 = int_to_ptr.hbm [resolvable:$true] %s2012_s30 }
  0x99   : > { %s2014_s29 = scalar_lea.hbm %s2013_s30, 128  ;;  %p2020_p0 = scmp.lt.s32.totalorder %s2013_s30, %s3062_s6 }
  0x9a   : > { %p2015_p13 = scmp.ne.s32.totalorder %s2013_s30, %s2014_s29  ;;  %p2021_p2 = scmp.lt.s32.totalorder %s2019_s24, %s2014_s29 }
  0x9c   : > { %p2017_p11 = pnand %p2016_p3, %p2015_p13  ;;  %p2022_p12 = por %p2021_p2, %p2020_p0 }
  0x9e   : > { %p2018_p1 = pneg %p2017_p11 }
  0xa0   : > { %p2023_p4 = pnand %p2022_p12, %p2018_p1 }
  0xa2   : > { %2026 = shalt.err (!%p2023_p4)
}
  0xa3   : > { %s3065_s1 = smov 8   ;;  %s3066_s20 = smov 128  }
  0xa4   : > { %s3067_s0 = sld [smem:[#allocation48_spill]]  ;;  %s271_s29 = ssub.s32 %s2664_s14, %s270_s15 }
  0xa5   : > { %p3069_p4 = scmp.eq.s32.totalorder %s2280_s16, 0  ;;  %p3070_p13 = scmp.ne.s32.totalorder %s2224_s23, %s2220_s22 }
  0xa6   : > { %p274_p11 = scmp.eq.s32.totalorder %s271_s29, 0  ;;  %s3071_s28 = sand.u32 1, %s2224_s23  }
  0xa7   : > { %p285_p3 = por %p3070_p13, %p3069_p4  ;;  %s1571_s30 = sshll.u32 %s3071_s28, 7 }
  0xa8   : > { %p3072_p1 = scmp.lt.s32.totalorder %s2280_s16, 4  ;;  %s3076_s27 = sld [smem:[#allocation55_spill]] }
  0xa9   : > { %s2713_s2 = scalar_select %p274_p11, %s2224_s23, %s276_s5  }
  0xaa   : > { %s3068_s3 = int_to_ptr.vmem [resolvable:$true] %s3067_s0  ;;  %p2708_p0 = pnand %p3072_p1, %p285_p3 }
  0xab   : > { %1729 = dma.hbm_to_vmem [thread:$0]  (!%p2658_p9), %s480_s7, 2048, %s3068_s3, %s2550_s21, %s3066_s20, %s3066_s20, %s3065_s1  }
  0xac   : > { %s1705_s13 = scalar_select %p285_p3, [#allocation4], [#allocation19] }
  0xad   : > { %s3143_s12 = smov (!%p285_p3, %s2465_s12), 0  ;;  %p3074_p2 = pmov %p3072_p1 }
  0xae   : > { %p3075_p9 = pmov %p3072_p1  ;;  %s495_s21 = scalar_lea.vmem [#allocation13], %s1571_s30 }
  0xaf   : > { %s3145_s13 = smov (!%p3074_p2, %s1705_s13), [#allocation23]  ;;  %s513_s14 = sshll.u32 %s495_s21, 4  ;;  %s514_s14 = int_to_ptr.vmem [resolvable:$true] %s513_s14 }
  0xb0   : > { %s3147_s12 = smov (!%p3075_p9, %s3143_s12), 0  ;;  %s3077_s18 = smov %s3076_s27 }
  0xb1   : > { %s503_s3 = sld [smem:[%s3145_s13 + %s3147_s12]]  ;;  %s3078_s5 = sand.u32 1, %s2224_s23  }
  0xb2   : > { %s492_s6 = scalar_lea.sflag [#allocation14], %s3078_s5  ;;  %p2046_p4 = pneg %p2708_p0 }
  0xb3   : > { %s2049_s13 = scalar_lea.hbm %s3077_s18, 384 }
  0xb7   : > { %s1659_s15 = sshll.u32 %s503_s3, 7 }
  0xb8   : > { %s510_s29 = scalar_lea.hbm %s3076_s27, %s1659_s15 }
  0xb9   : > { %s511_s28 = sshll.u32 %s510_s29, 4  ;;  %s512_s28 = int_to_ptr.hbm [resolvable:$true] %s511_s28 }
  0xba   : > { %s2042_s11 = sshra.s32 %s512_s28, 4  ;;  %s2043_s11 = int_to_ptr.hbm [resolvable:$true] %s2042_s11 }
  0xbb   : > { %s2044_s8 = scalar_lea.hbm %s2043_s11, 128  ;;  %p2050_p11 = scmp.lt.s32.totalorder %s2043_s11, %s3077_s18 }
  0xbc   : > { %p2045_p12 = scmp.ne.s32.totalorder %s2043_s11, %s2044_s8  ;;  %p2051_p1 = scmp.lt.s32.totalorder %s2049_s13, %s2044_s8 }
  0xbe   : > { %p2047_p13 = pnand %p2046_p4, %p2045_p12  ;;  %p2052_p2 = por %p2051_p1, %p2050_p11 }
  0xc0   : > { %p2048_p3 = pneg %p2047_p13 }
  0xc2   : > { %p2053_p9 = pnand %p2052_p2, %p2048_p3 }
  0xc4   : > { %2056 = shalt.err (!%p2053_p9)
}
  0xc5   : > { %1734 = dma.hbm_to_vmem [thread:$0]  (!%p2708_p0), %s512_s28, 2048, %s514_s14, %s492_s6, %s3066_s20, %s3066_s20, %s3065_s1  }
  0xc6   : > { %531 = sbr.rel (%p2543_p10) target bundleno = 767 (0x2ff), region = 44  ;;  %s533_s7 = sand.u32 (!%p2543_p10), 1, %s2256_s10  }
  0xc7   : > { %s1576_s24 = sshll.u32 (!%p2543_p10), %s533_s7, 5  ;;  %s534_s27 = scalar_lea.sflag (!%p2543_p10), [#allocation8], %s533_s7 }
  0xc8   : > { %s2741_s29 = scalar_lea.vmem (!%p2543_p10), [#allocation7], %s1576_s24 }
  0xcb   : > { %2183 = dma.done.wait (%p2573_p6), %s534_s27, 512  }
  0xcc   : > { %2185 = vsyncadd (%p2573_p6), %s534_s27, 4294966784  ;;  %s3080_s11 = sld [smem:[#allocation33_spill]]  ;;  %s543_s0 = sand.u32 1, %s2453_s17  }
  0xcd   : > { %s544_s20 = scalar_lea.sflag [#allocation11], %s543_s0 }
  0xd2   : > { %s545_s6 = sand.u32 1, %s3080_s11  }
  0xd3   : > { %s1577_s1 = sshll.u32 %s545_s6, 6 }
  0xd4   : > { %s2749_s14 = scalar_lea.vmem [#allocation10], %s1577_s1 }
  0xd5   : > { %2187 = dma.done.wait (%p2490_p7), %s544_s20, 1024  }
  0xd6   : > { %2189 = vsyncadd (%p2490_p7), %s544_s20, 4294966272  ;;  %s555_s28 = sand.u32 1, %s2232_s25  }
  0xd7   : > { %s1578_s5 = sshll.u32 %s555_s28, 7 }
  0xd8   : > { %s2756_s9 = scalar_lea.vmem [#allocation12], %s1578_s5 }
  0xd9   : > { %2191 = dma.done.wait (%p2618_p8), %s544_s20, 2048  }
  0xda   : > { %2193 = vsyncadd (%p2618_p8), %s544_s20, 4294965248  ;;  %s563_s17 = sand.u32 1, %s2220_s22  }
  0xdb   : > { %s1579_s12 = sshll.u32 %s563_s17, 7  ;;  %s564_s30 = scalar_lea.sflag [#allocation14], %s563_s17 }
  0xdc   : > { %s2763_s13 = scalar_lea.vmem [#allocation13], %s1579_s12 }
  0xdd   : > { %2195 = dma.done.wait (%p2677_p5), %s564_s30, 2048  }
  0xde   : > { %2197 = vsyncadd (%p2677_p5), %s564_s30, 4294965248  ;;  %s3082_s3 = sld [smem:[#allocation36_spill]] }
  0xdf   : > { %s3083_s21 = sld [smem:[#allocation37_spill]] }
  0xe0   : > { %s3084_s15 = sld [smem:[#allocation31_spill]] }
  0xe1   : > { %s3085_s20 = sld [smem:[#allocation56_spill]] }
  0xe2   : > { %s3086_s30 = sld [smem:[#allocation52_spill]] }
  0xe4   : > { %s641_s4 = sshra.s32 %s3082_s3, 7  ;;  %s646_s7 = sand.u32 127, %s3082_s3 }
  0xe5   : > { %s643_s24 = sadd.s32 %s3083_s21, %s641_s4  ;;  %p693_p7 = scmp.lt.s32.totalorder %s3083_s21, 1 }
  0xe6   : > { %s629_s27 = sand.u32 1, %s3084_s15   ;;  %s1581_s11 = sshll.u32 %s643_s24, 7 }
  0xe7   : > { %s1580_s8 = sshll.u32 %s629_s27, 7  ;;  %s647_s0 = sadd.s32 %s1581_s11, %s646_s7 }
  0xe8   : > { %s648_s6 = sld [smem:[#allocation5 + %s647_s0]]  ;;  %p697_p10 = scmp.eq.s32.totalorder %s3082_s3, 0 }
  0xe9   : > { %s3149_s21 = smov (!%p693_p7, %s3083_s21), 1  ;;  %s2789_s15 = scalar_lea.vmem [#allocation15], %s1580_s8  ;;  %v2289_v0 = vmov (%p697_p10), 0.0  }
  0xea   : > { %s695_s28 = scalar_lea.vmem %s3085_s20, %s3149_s21  ;;  %703 = vst [vmem:[#allocation2 + $0x30] sm:$0xff] (%p697_p10), %v2289_v0 }
  0xeb   : > { %704 = vst [vmem:[#allocation2] sm:$0xff] (%p697_p10), %v2289_v0 }
  0xec   : > { %705 = vst [vmem:[#allocation2 + $0x58] sm:$0xff] (%p697_p10), %v2289_v0 }
  0xed   : > { %706 = vst [vmem:[#allocation2 + $0x18] sm:$0xff] (%p697_p10), %v2289_v0 }
  0xee   : > { %p650_p6 = scmp.lt.s32.totalorder %s648_s6, 1  ;;  %702 = sbr.rel (!%p697_p10) target bundleno = 250 (0xfa), region = 64  ;;  %707 = vst [vmem:[#allocation2 + $0x50] sm:$0xff] (%p697_p10), %v2289_v0 }
  0xef   : > { %708 = vst [vmem:[#allocation2 + $0x68] sm:$0xff] (%p697_p10), %v2289_v0 }
  0xf0   : > { %s3151_s6 = smov (!%p650_p6, %s648_s6), 1  ;;  %709 = vst [vmem:[#allocation2 + $0x8] sm:$0xff] (%p697_p10), %v2289_v0 }
  0xf1   : > { %s1660_s5 = sshll.u32 %s3151_s6, 6  ;;  %710 = vst [vmem:[#allocation2 + $0x48] sm:$0xff] (%p697_p10), %v2289_v0 }
  0xf2   : > { %s2787_s4 = scalar_lea.vmem %s3086_s30, %s1660_s5  ;;  %711 = vst [vmem:[#allocation2 + $0x40] sm:$0xff] (%p697_p10), %v2289_v0 }
  0xf3   : > { %712 = vst [vmem:[#allocation2 + $0x20] sm:$0xff] %v2289_v0 }
  0xf4   : > { %713 = vst [vmem:[#allocation2 + $0x10] sm:$0xff] %v2289_v0 }
  0xf5   : > { %714 = vst [vmem:[#allocation2 + $0x38] sm:$0xff] %v2289_v0 }
  0xf6   : > { %715 = vst [vmem:[#allocation2 + $0x60] sm:$0xff] %v2289_v0 }
  0xf7   : > { %716 = vst [vmem:[#allocation2 + $0x70] sm:$0xff] %v2289_v0 }
  0xf8   : > { %717 = vst [vmem:[#allocation2 + $0x78] sm:$0xff] %v2289_v0 }
  0xf9   : > { %718 = vst [vmem:[#allocation2 + $0x28] sm:$0xff] %v2289_v0 }
  0xfa PF: > { %s3087_s3 = sld [smem:[#allocation37_spill]] }
  0xfb   : > { %s3088_s24 = sld [smem:[#allocation36_spill]] }
 0x100   : > { %s719_s7 = sld [smem:[#allocation6 + %s3087_s3]] }
 0x106   : > { %p1585_p8 = scmp.ge.s32.totalorder %s3088_s24, %s719_s7 }
 0x108   : > { %723 = sbr.rel (%p1585_p8) target bundleno = 718 (0x2ce), region = 68 }
 0x10d   : > { %v1677_v1 = vld [vmem:[%s2749_s14 + $0x38] sm:$0xff]  ;;  %v2290_v2 = vmov 0   ;;  %v915_v3 = vld [vmem:[%s2756_s9 + $0x70] sm:$0xff]  ;;  %v913_v4 = vld [vmem:[%s2756_s9 + $0x60] sm:$0xff] }
 0x10e   : > { %1912 = vset.pattern.permute.xlu0 %v2290_v2  ;;  %1913 = vset.pattern.permute.xlu1 %v2290_v2  ;;  %v1676_v5 = vld [vmem:[%s2749_s14 + $0x30] sm:$0xff]  ;;  %v1675_v6 = vld [vmem:[%s2749_s14 + $0x28] sm:$0xff]  ;;  %v916_v7 = vld [vmem:[%s2756_s9 + $0x78] sm:$0xff] }
 0x10f   : > { %852 = vmatpush.bf16.msra.mxu0 %v1677_v1  ;;  %1680 = vmatpush.bf16.msra.mxu2 %v1677_v1  ;;  %v914_v8 = vld [vmem:[%s2756_s9 + $0x68] sm:$0xff]  ;;  %v1674_v9 = vld [vmem:[%s2749_s14 + $0x20] sm:$0xff]  ;;  %v1673_v10 = vld [vmem:[%s2749_s14 + $0x18] sm:$0xff] }
 0x110   : > { %989 = vperm.xlu0 %1912, %v915_v3   ;;  %979 = vperm.xlu1 %1913, %v913_v4   ;;  %v909_v11 = vld [vmem:[%s2756_s9 + $0x40] sm:$0xff]  ;;  %v910_v12 = vld [vmem:[%s2756_s9 + $0x48] sm:$0xff]  ;;  %v911_v13 = vld [vmem:[%s2756_s9 + $0x50] sm:$0xff] }
 0x111   : > { %1914 = vset.pattern.permute.xlu2 %v2290_v2  ;;  %v1672_v14 = vld [vmem:[%s2749_s14 + $0x10] sm:$0xff]  ;;  %v1671_v15 = vld [vmem:[%s2749_s14 + $0x8] sm:$0xff]  ;;  %v908_v16 = vld [vmem:[%s2756_s9 + $0x38] sm:$0xff] }
 0x112   : > { %969 = vperm.xlu2 %1914, %v911_v13   ;;  %v905_v17 = vld [vmem:[%s2756_s9 + $0x20] sm:$0xff]  ;;  %v912_v18 = vld [vmem:[%s2756_s9 + $0x58] sm:$0xff]  ;;  %v903_v22 = vld [vmem:[%s2756_s9 + $0x10] sm:$0xff] }
 0x113   : > { %853 = vmatpush.bf16.msra.mxu0 %v1676_v5  ;;  %1681 = vmatpush.bf16.msra.mxu2 %v1676_v5  ;;  %v1670_v19 = vld [vmem:[%s2749_s14] sm:$0xff]  ;;  %v904_v23 = vld [vmem:[%s2756_s9 + $0x18] sm:$0xff]  ;;  %v907_v24 = vld [vmem:[%s2756_s9 + $0x30] sm:$0xff] }
 0x114   : > { %v1662_v20 = vld [vmem:[%s2787_s4] sm:$0xff]  ;;  %v902_v25 = vld [vmem:[%s2756_s9 + $0x8] sm:$0xff]  ;;  %v1132_v30 = vld [vmem:[%s2763_s13 + $0x10] sm:$0xff] }
 0x115   : > { %v1666_v21 = vld [vmem:[%s2787_s4 + $0x20] sm:$0xff]  ;;  %v906_v27 = vld [vmem:[%s2756_s9 + $0x28] sm:$0xff]  ;;  %v1133_v31 = vld [vmem:[%s2763_s13 + $0x18] sm:$0xff] }
 0x116   : > { %v1130_v26 = vld [vmem:[%s2763_s13] sm:$0xff]  ;;  %v1663_v28 = vld [vmem:[%s2787_s4 + $0x8] sm:$0xff]  ;;  %v1136_v34 = vld [vmem:[%s2763_s13 + $0x30] sm:$0xff] }
 0x117   : > { %854 = vmatpush.bf16.msra.mxu0 %v1675_v6  ;;  %1682 = vmatpush.bf16.msra.mxu2 %v1675_v6  ;;  %v1667_v29 = vld [vmem:[%s2787_s4 + $0x28] sm:$0xff]  ;;  %v901_v32 = vld [vmem:[%s2756_s9] sm:$0xff]  ;;  %v1664_v36 = vld [vmem:[%s2787_s4 + $0x10] sm:$0xff] }
 0x118   : > { %994 = vperm.xlu0 %1912, %v916_v7   ;;  %984 = vperm.xlu1 %1913, %v914_v8   ;;  %v1135_v33 = vld [vmem:[%s2763_s13 + $0x28] sm:$0xff]  ;;  %v1668_v37 = vld [vmem:[%s2787_s4 + $0x30] sm:$0xff]  ;;  %v1138_v38 = vld [vmem:[%s2763_s13 + $0x40] sm:$0xff] }
 0x119   : > { %v1131_v35 = vld [vmem:[%s2763_s13 + $0x8] sm:$0xff]  ;;  %v1134_v40 = vld [vmem:[%s2763_s13 + $0x20] sm:$0xff]  ;;  %v1141_v41 = vld [vmem:[%s2763_s13 + $0x58] sm:$0xff] }
 0x11a   : > { %974 = vperm.xlu2 %1914, %v912_v18   ;;  %v1139_v39 = vld [vmem:[%s2763_s13 + $0x48] sm:$0xff]  ;;  %v1142_v42 = vld [vmem:[%s2763_s13 + $0x60] sm:$0xff]  ;;  %v1137_v43 = vld [vmem:[%s2763_s13 + $0x38] sm:$0xff] }
 0x11b   : > { %855 = vmatpush.bf16.msra.mxu0 %v1674_v9  ;;  %1683 = vmatpush.bf16.msra.mxu2 %v1674_v9  ;;  %v1665_v44 = vld [vmem:[%s2787_s4 + $0x18] sm:$0xff]  ;;  %v1144_v46 = vld [vmem:[%s2763_s13 + $0x70] sm:$0xff]  ;;  %v1143_v49 = vld [vmem:[%s2763_s13 + $0x68] sm:$0xff] }
 0x11c   : > { %v1669_v45 = vld [vmem:[%s2787_s4 + $0x38] sm:$0xff]  ;;  %v1140_v48 = vld [vmem:[%s2763_s13 + $0x50] sm:$0xff] }
 0x11d   : > { %v1145_v47 = vld [vmem:[%s2763_s13 + $0x78] sm:$0xff] }
 0x11f   : > { %856 = vmatpush.bf16.msra.mxu0 %v1673_v10  ;;  %1684 = vmatpush.bf16.msra.mxu2 %v1673_v10 }
 0x120   : > { %959 = vperm.xlu0 %1912, %v909_v11   ;;  %964 = vperm.xlu1 %1913, %v910_v12  }
 0x122   : > { %949 = vperm.xlu2 %1914, %v907_v24  }
 0x123   : > { %857 = vmatpush.bf16.msra.mxu0 %v1672_v14  ;;  %1685 = vmatpush.bf16.msra.mxu2 %v1672_v14 }
 0x127   : > { %858 = vmatpush.bf16.msra.mxu0 %v1671_v15  ;;  %1686 = vmatpush.bf16.msra.mxu2 %v1671_v15 }
 0x128   : > { %954 = vperm.xlu0 %1912, %v908_v16   ;;  %939 = vperm.xlu1 %1913, %v905_v17  }
 0x12a   : > { %944 = vperm.xlu2 %1914, %v906_v27  }
 0x12b   : > { %859 = vmatpush.bf16.msra.mxu0 %v1670_v19  ;;  %1687 = vmatpush.bf16.msra.mxu2 %v1670_v19 }
 0x12e   : > { %860 = vmatmul.bf16.vlgmr.msra.gmra.mxu0 %v1662_v20  ;;  %880 = vmatmul.bf16.vlgmr.msra.gmra.mxu2 %v1666_v21 }
 0x130   : > { %929 = vperm.xlu0 %1912, %v903_v22   ;;  %934 = vperm.xlu1 %1913, %v904_v23  }
 0x132   : > { %919 = vperm.xlu2 %1914, %v901_v32   ;;  %v1021_v32 = vld [vmem:[%s2741_s29] sm:$0xff] }
 0x138   : > { %924 = vperm.xlu0 %1912, %v902_v25   ;;  %1148 = vperm.xlu1 %1913, %v1130_v26  }
 0x13a   : > { %1153 = vperm.xlu2 %1914, %v1131_v35  }
 0x13e   : > { %865 = vmatmul.bf16.gmra.mxu0 %v1663_v28  ;;  %885 = vmatmul.bf16.gmra.mxu2 %v1667_v29 }
 0x140   : > { %1158 = vperm.xlu0 %1912, %v1132_v30   ;;  %1163 = vperm.xlu1 %1913, %v1133_v31  }
 0x142   : > { %1168 = vperm.xlu2 %1914, %v1134_v40  }
 0x148   : > { %1173 = vperm.xlu0 %1912, %v1135_v33   ;;  %1178 = vperm.xlu1 %1913, %v1136_v34   ;;  %v1023_v33 = vld [vmem:[%s2741_s29 + $0x10] sm:$0xff] }
 0x149   : > { %v1033_v40 = vunpack.c.0.s8 %v1023_v33 }
 0x14a   : > { %1183 = vperm.xlu2 %1914, %v1137_v43  }
 0x14e   : > { %870 = vmatmul.bf16.gmra.mxu0 %v1664_v36  ;;  %890 = vmatmul.bf16.gmra.mxu2 %v1668_v37 }
 0x150   : > { %1188 = vperm.xlu0 %1912, %v1138_v38   ;;  %1193 = vperm.xlu1 %1913, %v1139_v39   ;;  %v1025_v38 = vunpack.c.0.s8 %v1021_v32  ;;  %v1026_v39 = vunpack.c.1.s8 %v1021_v32 }
 0x152   : > { %1198 = vperm.xlu2 %1914, %v1140_v48   ;;  %v1042_v48 = vcvt.s32.f32 %v1026_v39 }
 0x158   : > { %1203 = vperm.xlu0 %1912, %v1141_v41   ;;  %1208 = vperm.xlu1 %1913, %v1142_v42   ;;  %v1034_v41 = vunpack.c.1.s8 %v1023_v33 }
 0x15a   : > { %1213 = vperm.xlu2 %1914, %v1143_v49   ;;  %v1049_v49 = vcvt.s32.f32 %v1033_v40 }
 0x15e   : > { %875 = vmatmul.bf16.gmra.mxu0 %v1665_v44  ;;  %895 = vmatmul.bf16.gmra.mxu2 %v1669_v45 }
 0x160   : > { %1218 = vperm.xlu0 %1912, %v1144_v46   ;;  %1223 = vperm.xlu1 %1913, %v1145_v47   ;;  %v1041_v47 = vcvt.s32.f32 %v1025_v38  ;;  %v1115_v38 = vld [vmem:[#allocation2] sm:$0xff] }
 0x16c   : > { %v970_v0 = vpop.permute.xlu2 %969 }
 0x174   : > { %v975_v5 = vpop.permute.xlu2 %974 }
 0x17c   : > { %v950_v15 = vpop.permute.xlu2 %949 }
 0x182   : > { %v990_v58 = vpop.permute.xlu0 %989  ;;  %v980_v60 = vpop.permute.xlu1 %979 }
 0x184   : > { %v945_v28 = vpop.permute.xlu2 %944 }
 0x18a   : > { %v995_v63 = vpop.permute.xlu0 %994  ;;  %v985_v1 = vpop.permute.xlu1 %984 }
 0x18c   : > { %v920_v43 = vpop.permute.xlu2 %919 }
 0x192   : > { %v960_v4 = vpop.permute.xlu0 %959  ;;  %v965_v9 = vpop.permute.xlu1 %964 }
 0x19a   : > { %v955_v14 = vpop.permute.xlu0 %954  ;;  %v940_v21 = vpop.permute.xlu1 %939 }
 0x1a2   : > { %v930_v27 = vpop.permute.xlu0 %929  ;;  %v935_v34 = vpop.permute.xlu1 %934 }
 0x1aa   : > { %v925_v42 = vpop.permute.xlu0 %924 }
 0x1ab   : > { %v2841_v50 = vpop.f32.mrf.mxu0 }
 0x1ac   : > { %v997_v45 = vmul.f32 %v920_v43, %v2841_v50  ;;  %v1036_v50 = vunpack.c.3.s8 %v1023_v33 }
 0x1b1   : > { %v881_v51 = vpop.f32.mrf.mxu2 }
 0x1b2   : > { %v1005_v23 = vmul.f32 %v960_v4, %v881_v51  ;;  %v1050_v51 = vcvt.s32.f32 %v1034_v41 }
 0x1b3   : > { %v2843_v52 = vpop.f32.mrf.mxu0 }
 0x1b4   : > { %v998_v44 = vmul.f32 %v925_v42, %v2843_v52  ;;  %v1028_v52 = vunpack.c.3.s8 %v1021_v32 }
 0x1b9   : > { %v883_v53 = vpop.f32.mrf.mxu2 }
 0x1ba   : > { %v1006_v19 = vmul.f32 %v965_v9, %v883_v53  ;;  %v1013_v53 = vpack.c.bf16 %v998_v44, %v997_v45  ;;  %v1123_v45 = vld [vmem:[#allocation2 + $0x20] sm:$0xff] }
 0x1bb   : > { %v866_v55 = vpop.f32.mrf.mxu0 }
 0x1bc   : > { %v1017_v26 = vpack.c.bf16 %v1006_v19, %v1005_v23  ;;  %v999_v35 = vmul.f32 %v930_v27, %v866_v55  ;;  %v1061_v55 = vpack.c.bf16 %v1050_v51, %v1049_v49  ;;  %v1159_v23 = vpop.permute.xlu0 %1158 }
 0x1c1   : > { %v886_v54 = vpop.f32.mrf.mxu2 }
 0x1c2   : > { %v1007_v18 = vmul.f32 %v970_v0, %v886_v54  ;;  %v1057_v54 = vpack.c.bf16 %v1042_v48, %v1041_v47  ;;  %v1022_v0 = vld [vmem:[%s2741_s29 + $0x8] sm:$0xff]  ;;  %v1116_v48 = vld [vmem:[#allocation2 + $0x58] sm:$0xff] }
 0x1c3   : > { %v868_v57 = vpop.f32.mrf.mxu0 }
 0x1c4   : > { %v1000_v36 = vmul.f32 %v935_v34, %v868_v57  ;;  %v1035_v57 = vunpack.c.2.s8 %v1023_v33 }
 0x1c6   : > { %v1014_v46 = vpack.c.bf16 %v1000_v36, %v999_v35  ;;  %v1122_v35 = vld [vmem:[#allocation2 + $0x40] sm:$0xff] }
 0x1c9   : > { %v888_v56 = vpop.f32.mrf.mxu2 }
 0x1ca   : > { %v1008_v16 = vmul.f32 %v975_v5, %v888_v56  ;;  %v1027_v56 = vunpack.c.2.s8 %v1021_v32 }
 0x1cb   : > { %v871_v61 = vpop.f32.mrf.mxu0 }
 0x1cc   : > { %v1018_v20 = vpack.c.bf16 %v1008_v16, %v1007_v18  ;;  %v1001_v29 = vmul.f32 %v940_v21, %v871_v61  ;;  %v1052_v61 = vcvt.s32.f32 %v1036_v50  ;;  %v1117_v50 = vld [vmem:[#allocation2 + $0x18] sm:$0xff] }
 0x1d1   : > { %v891_v59 = vpop.f32.mrf.mxu2 }
 0x1d2   : > { %v1009_v13 = vmul.f32 %v980_v60, %v891_v59  ;;  %v1044_v59 = vcvt.s32.f32 %v1028_v52  ;;  %v1051_v60 = vcvt.s32.f32 %v1035_v57 }
 0x1d3   : > { %v873_v2 = vpop.f32.mrf.mxu0 }
 0x1d4   : > { %v1002_v30 = vmul.f32 %v945_v28, %v873_v2  ;;  %v1029_v2 = vunpack.c.0.s8 %v1022_v0  ;;  %v1114_v28 = vld [vmem:[#allocation2 + $0x30] sm:$0xff] }
 0x1d6   : > { %v1015_v37 = vpack.c.bf16 %v1002_v30, %v1001_v29 }
 0x1d9   : > { %v893_v62 = vpop.f32.mrf.mxu2 }
 0x1da   : > { %v1010_v11 = vmul.f32 %v985_v1, %v893_v62  ;;  %v1024_v1 = vld [vmem:[%s2741_s29 + $0x18] sm:$0xff] }
 0x1db   : > { %v876_v10 = vpop.f32.mrf.mxu0  ;;  %v1037_v4 = vunpack.c.0.s8 %v1024_v1  ;;  %v1038_v5 = vunpack.c.1.s8 %v1024_v1 }
 0x1dc   : > { %v1019_v17 = vpack.c.bf16 %v1010_v11, %v1009_v13  ;;  %v1003_v24 = vmul.f32 %v950_v15, %v876_v10  ;;  %v1032_v13 = vunpack.c.3.s8 %v1022_v0  ;;  %v1040_v15 = vunpack.c.3.s8 %v1024_v1 }
 0x1dd   : > { %v1054_v9 = vcvt.s32.f32 %v1038_v5 }
 0x1de   : > { %v1056_v19 = vcvt.s32.f32 %v1040_v15 }
 0x1e1   : > { %v896_v3 = vpop.f32.mrf.mxu2 }
 0x1e2   : > { %v1011_v7 = vmul.f32 %v990_v58, %v896_v3  ;;  %v1043_v58 = vcvt.s32.f32 %v1027_v56  ;;  %v1030_v3 = vunpack.c.1.s8 %v1022_v0  ;;  %v1124_v56 = vld [vmem:[#allocation2 + $0x10] sm:$0xff] }
 0x1e3   : > { %v878_v22 = vpop.f32.mrf.mxu0 }
 0x1e4   : > { %v1004_v25 = vmul.f32 %v955_v14, %v878_v22  ;;  %v1058_v62 = vpack.c.bf16 %v1044_v59, %v1043_v58  ;;  %v1039_v14 = vunpack.c.2.s8 %v1024_v1  ;;  %v1149_v22 = vpop.permute.xlu1 %1148 }
 0x1e6   : > { %v1016_v31 = vpack.c.bf16 %v1004_v25, %v1003_v24  ;;  %v1055_v18 = vcvt.s32.f32 %v1039_v14  ;;  %v1154_v24 = vpop.permute.xlu2 %1153 }
 0x1e8   : > { %v1064_v21 = vpack.c.bf16 %v1056_v19, %v1055_v18 }
 0x1e9   : > { %v898_v6 = vpop.f32.mrf.mxu2 }
 0x1ea   : > { %v1012_v8 = vmul.f32 %v995_v63, %v898_v6  ;;  %v1062_v63 = vpack.c.bf16 %v1052_v61, %v1051_v60  ;;  %v1045_v6 = vcvt.s32.f32 %v1029_v2  ;;  %v1118_v2 = vld [vmem:[#allocation2 + $0x50] sm:$0xff] }
 0x1ec   : > { %v1020_v12 = vpack.c.bf16 %v1012_v8, %v1011_v7  ;;  %v1046_v7 = vcvt.s32.f32 %v1030_v3  ;;  %v1053_v8 = vcvt.s32.f32 %v1037_v4  ;;  %v1164_v25 = vpop.permute.xlu1 %1163 }
 0x1ee   : > { %1065 = vmatpush.bf16.msra.mxu1 %v1020_v12  ;;  %1688 = vmatpush.bf16.msra.mxu3 %v1020_v12  ;;  %v1059_v10 = vpack.c.bf16 %v1046_v7, %v1045_v6  ;;  %v1063_v11 = vpack.c.bf16 %v1054_v9, %v1053_v8  ;;  %v1031_v12 = vunpack.c.2.s8 %v1022_v0  ;;  %v1169_v30 = vpop.permute.xlu2 %1168  ;;  %v1126_v8 = vld [vmem:[#allocation2 + $0x60] sm:$0xff] }
 0x1f0   : > { %v1047_v16 = vcvt.s32.f32 %v1031_v12 }
 0x1f2   : > { %1066 = vmatpush.bf16.msra.mxu1 %v1019_v17  ;;  %1689 = vmatpush.bf16.msra.mxu3 %v1019_v17  ;;  %v1048_v17 = vcvt.s32.f32 %v1032_v13 }
 0x1f4   : > { %v2851_v32 = vpop.permute.xlu1 %1178 }
 0x1f6   : > { %1067 = vmatpush.bf16.msra.mxu1 %v1018_v20  ;;  %1690 = vmatpush.bf16.msra.mxu3 %v1018_v20  ;;  %v1060_v20 = vpack.c.bf16 %v1048_v17, %v1047_v16  ;;  %v2853_v42 = vpop.permute.xlu2 %1183  ;;  %v1127_v17 = vld [vmem:[#allocation2 + $0x70] sm:$0xff] }
 0x1fa   : > { %1068 = vmatpush.bf16.msra.mxu1 %v1017_v26  ;;  %1691 = vmatpush.bf16.msra.mxu3 %v1017_v26  ;;  %v1174_v26 = vpop.permute.xlu0 %1173 }
 0x1fc   : > { %v1194_v43 = vpop.permute.xlu1 %1193 }
 0x1fe   : > { %1069 = vmatpush.bf16.msra.mxu1 %v1016_v31  ;;  %1692 = vmatpush.bf16.msra.mxu3 %v1016_v31 }
 0x202   : > { %1070 = vmatpush.bf16.msra.mxu1 %v1015_v37  ;;  %1693 = vmatpush.bf16.msra.mxu3 %v1015_v37  ;;  %v1189_v33 = vpop.permute.xlu0 %1188 }
 0x204   : > { %v1209_v6 = vpop.permute.xlu1 %1208 }
 0x206   : > { %1071 = vmatpush.bf16.msra.mxu1 %v1014_v46  ;;  %1694 = vmatpush.bf16.msra.mxu3 %v1014_v46 }
 0x20a   : > { %1072 = vmatpush.bf16.msra.mxu1 %v1013_v53  ;;  %1695 = vmatpush.bf16.msra.mxu3 %v1013_v53  ;;  %v1204_v61 = vpop.permute.xlu0 %1203 }
 0x20d   : > { %1073 = vmatmul.bf16.vlgmr.msra.gmra.mxu1 %v1057_v54  ;;  %1093 = vmatmul.bf16.vlgmr.msra.gmra.mxu3 %v1061_v55  ;;  %v1199_v54 = vpop.permute.xlu2 %1198 }
 0x215   : > { %v1214_v15 = vpop.permute.xlu2 %1213 }
 0x21d   : > { %1078 = vmatmul.bf16.gmra.mxu1 %v1058_v62  ;;  %1098 = vmatmul.bf16.gmra.mxu3 %v1062_v63  ;;  %v1125_v63 = vld [vmem:[#allocation2 + $0x38] sm:$0xff] }
 0x22d   : > { %1083 = vmatmul.bf16.gmra.mxu1 %v1059_v10  ;;  %1103 = vmatmul.bf16.gmra.mxu3 %v1063_v11  ;;  %v1119_v11 = vld [vmem:[#allocation2 + $0x68] sm:$0xff] }
 0x23d   : > { %1088 = vmatmul.bf16.gmra.mxu1 %v1060_v20  ;;  %1108 = vmatmul.bf16.gmra.mxu3 %v1064_v21  ;;  %v1120_v20 = vld [vmem:[#allocation2 + $0x8] sm:$0xff] }
 0x28a   : > { %v1074_v27 = vpop.f32.mrf.mxu1 }
 0x28b   : > { %v1226_v29 = vmul.f32 %v1149_v22, %v1074_v27  ;;  %v1128_v27 = vld [vmem:[#allocation2 + $0x78] sm:$0xff] }
 0x28d   : > { %v1242_v31 = vadd.f32 %v1226_v29, %v1114_v28  ;;  %v1121_v29 = vld [vmem:[#allocation2 + $0x48] sm:$0xff] }
 0x28f   : > { %1258 = vst [vmem:[#allocation2 + $0x30] sm:$0xff] %v1242_v31 }
 0x290   : > { %v1094_v34 = vpop.f32.mrf.mxu3 }
 0x291   : > { %v1234_v36 = vmul.f32 %v1189_v33, %v1094_v34  ;;  %v1224_v34 = vpop.permute.xlu1 %1223 }
 0x292   : > { %v1076_v37 = vpop.f32.mrf.mxu1 }
 0x293   : > { %v1250_v39 = vadd.f32 %v1234_v36, %v1122_v35  ;;  %v1227_v40 = vmul.f32 %v1154_v24, %v1076_v37  ;;  %v1219_v24 = vpop.permute.xlu0 %1218  ;;  %v1129_v36 = vld [vmem:[#allocation2 + $0x28] sm:$0xff] }
 0x295   : > { %1266 = vst [vmem:[#allocation2 + $0x40] sm:$0xff] %v1250_v39  ;;  %v1243_v41 = vadd.f32 %v1227_v40, %v1115_v38 }
 0x297   : > { %1259 = vst [vmem:[#allocation2] sm:$0xff] %v1243_v41 }
 0x298   : > { %v1096_v44 = vpop.f32.mrf.mxu3 }
 0x299   : > { %v1235_v46 = vmul.f32 %v1194_v43, %v1096_v44 }
 0x29a   : > { %v1079_v47 = vpop.f32.mrf.mxu1 }
 0x29b   : > { %v1251_v49 = vadd.f32 %v1235_v46, %v1123_v45  ;;  %v1228_v51 = vmul.f32 %v1159_v23, %v1079_v47 }
 0x29d   : > { %1267 = vst [vmem:[#allocation2 + $0x20] sm:$0xff] %v1251_v49  ;;  %v1244_v53 = vadd.f32 %v1228_v51, %v1116_v48 }
 0x29f   : > { %1260 = vst [vmem:[#allocation2 + $0x58] sm:$0xff] %v1244_v53 }
 0x2a0   : > { %v1099_v55 = vpop.f32.mrf.mxu3 }
 0x2a1   : > { %v1236_v52 = vmul.f32 %v1199_v54, %v1099_v55 }
 0x2a2   : > { %v1081_v57 = vpop.f32.mrf.mxu1 }
 0x2a3   : > { %v1252_v58 = vadd.f32 %v1236_v52, %v1124_v56  ;;  %v1229_v59 = vmul.f32 %v1164_v25, %v1081_v57 }
 0x2a5   : > { %1268 = vst [vmem:[#allocation2 + $0x10] sm:$0xff] %v1252_v58  ;;  %v1245_v60 = vadd.f32 %v1229_v59, %v1117_v50 }
 0x2a7   : > { %1261 = vst [vmem:[#allocation2 + $0x18] sm:$0xff] %v1245_v60 }
 0x2a8   : > { %v1101_v62 = vpop.f32.mrf.mxu3 }
 0x2a9   : > { %v1237_v0 = vmul.f32 %v1204_v61, %v1101_v62 }
 0x2aa   : > { %v1084_v1 = vpop.f32.mrf.mxu1 }
 0x2ab   : > { %v1253_v3 = vadd.f32 %v1237_v0, %v1125_v63  ;;  %v1230_v4 = vmul.f32 %v1169_v30, %v1084_v1 }
 0x2ad   : > { %1269 = vst [vmem:[#allocation2 + $0x38] sm:$0xff] %v1253_v3  ;;  %v1246_v5 = vadd.f32 %v1230_v4, %v1118_v2 }
 0x2af   : > { %1262 = vst [vmem:[#allocation2 + $0x50] sm:$0xff] %v1246_v5 }
 0x2b0   : > { %v1104_v7 = vpop.f32.mrf.mxu3 }
 0x2b1   : > { %v1238_v9 = vmul.f32 %v1209_v6, %v1104_v7 }
 0x2b2   : > { %v1086_v10 = vpop.f32.mrf.mxu1 }
 0x2b3   : > { %v1254_v12 = vadd.f32 %v1238_v9, %v1126_v8  ;;  %v1231_v13 = vmul.f32 %v1174_v26, %v1086_v10 }
 0x2b5   : > { %1270 = vst [vmem:[#allocation2 + $0x60] sm:$0xff] %v1254_v12  ;;  %v1247_v14 = vadd.f32 %v1231_v13, %v1119_v11 }
 0x2b7   : > { %1263 = vst [vmem:[#allocation2 + $0x68] sm:$0xff] %v1247_v14 }
 0x2b8   : > { %v1106_v16 = vpop.f32.mrf.mxu3 }
 0x2b9   : > { %v1239_v18 = vmul.f32 %v1214_v15, %v1106_v16 }
 0x2ba   : > { %v1089_v19 = vpop.f32.mrf.mxu1 }
 0x2bb   : > { %v1255_v21 = vadd.f32 %v1239_v18, %v1127_v17  ;;  %v1232_v22 = vmul.f32 %v2851_v32, %v1089_v19 }
 0x2bd   : > { %1271 = vst [vmem:[#allocation2 + $0x70] sm:$0xff] %v1255_v21  ;;  %v1248_v23 = vadd.f32 %v1232_v22, %v1120_v20 }
 0x2bf   : > { %1264 = vst [vmem:[#allocation2 + $0x8] sm:$0xff] %v1248_v23 }
 0x2c0   : > { %v1109_v25 = vpop.f32.mrf.mxu3 }
 0x2c1   : > { %v1240_v28 = vmul.f32 %v1219_v24, %v1109_v25 }
 0x2c2   : > { %v1091_v26 = vpop.f32.mrf.mxu1 }
 0x2c3   : > { %v1256_v30 = vadd.f32 %v1240_v28, %v1128_v27  ;;  %v1233_v31 = vmul.f32 %v2853_v42, %v1091_v26 }
 0x2c5   : > { %1272 = vst [vmem:[#allocation2 + $0x78] sm:$0xff] %v1256_v30  ;;  %v1249_v33 = vadd.f32 %v1233_v31, %v1121_v29 }
 0x2c7   : > { %1265 = vst [vmem:[#allocation2 + $0x48] sm:$0xff] %v1249_v33 }
 0x2c8   : > { %v1111_v35 = vpop.f32.mrf.mxu3 }
 0x2c9   : > { %v1241_v37 = vmul.f32 %v1224_v34, %v1111_v35 }
 0x2cb   : > { %v1257_v32 = vadd.f32 %v1241_v37, %v1129_v36 }
 0x2cd   : > { %1273 = vst [vmem:[#allocation2 + $0x28] sm:$0xff] %v1257_v32 }
 0x2ce PF: > { %s3089_s29 = sld [smem:[#allocation36_spill]] }
 0x2d4   : > { %p1274_p5 = scmp.eq.s32.totalorder %s3089_s29, 1 }
 0x2d5   : > { %v1279_v38 = vld [vmem:[#allocation2 + $0x30] sm:$0xff] (%p1274_p5)  ;;  %v1915_v39 = vld [vmem:[%s695_s28] ss:$0 sm:$0xff] (%p1274_p5)  ;;  %v1281_v41 = vld [vmem:[#allocation2 + $0x58] sm:$0xff] (%p1274_p5) }
 0x2d6   : > { %1278 = sbr.rel (!%p1274_p5) target bundleno = 744 (0x2e8), region = 72  ;;  %v1280_v40 = vld [vmem:[#allocation2] sm:$0xff] (%p1274_p5)  ;;  %v1282_v42 = vld [vmem:[#allocation2 + $0x18] sm:$0xff] (%p1274_p5)  ;;  %v1299_v43 = vadd.f32 (%p1274_p5), %v1915_v39, %v1279_v38  ;;  %v1301_v45 = vadd.f32 (%p1274_p5), %v1915_v39, %v1281_v41  ;;  %v1283_v46 = vld [vmem:[#allocation2 + $0x50] sm:$0xff] (%p1274_p5) }
 0x2d7   : > { %v1300_v44 = vadd.f32 (%p1274_p5), %v1915_v39, %v1280_v40  ;;  %v1284_v47 = vld [vmem:[#allocation2 + $0x68] sm:$0xff] (%p1274_p5)  ;;  %v1302_v48 = vadd.f32 (%p1274_p5), %v1915_v39, %v1282_v42  ;;  %v1303_v51 = vadd.f32 (%p1274_p5), %v1915_v39, %v1283_v46  ;;  %v1287_v55 = vld [vmem:[#allocation2 + $0x40] sm:$0xff] (%p1274_p5)  ;;  %v1289_v50 = vld [vmem:[#allocation2 + $0x10] sm:$0xff] (%p1274_p5) }
 0x2d8   : > { %v1285_v49 = vld [vmem:[#allocation2 + $0x8] sm:$0xff] (%p1274_p5)  ;;  %1315 = vst [vmem:[%s2789_s15] sm:$0xff] (%p1274_p5), %v1299_v43  ;;  %v1304_v54 = vadd.f32 (%p1274_p5), %v1915_v39, %v1284_v47  ;;  %v1288_v52 = vld [vmem:[#allocation2 + $0x20] sm:$0xff] (%p1274_p5)  ;;  %v1307_v58 = vadd.f32 (%p1274_p5), %v1915_v39, %v1287_v55  ;;  %v1290_v59 = vld [vmem:[#allocation2 + $0x38] sm:$0xff] (%p1274_p5)  ;;  %v1309_v62 = vadd.f32 (%p1274_p5), %v1915_v39, %v1289_v50 }
 0x2d9   : > { %v1286_v53 = vld [vmem:[#allocation2 + $0x48] sm:$0xff] (%p1274_p5)  ;;  %1316 = vst [vmem:[%s2789_s15 + $0x8] sm:$0xff] (%p1274_p5), %v1300_v44  ;;  %v1305_v56 = vadd.f32 (%p1274_p5), %v1915_v39, %v1285_v49  ;;  %v1308_v60 = vadd.f32 (%p1274_p5), %v1915_v39, %v1288_v52  ;;  %v1291_v61 = vld [vmem:[#allocation2 + $0x60] sm:$0xff] (%p1274_p5)  ;;  %v1292_v63 = vld [vmem:[#allocation2 + $0x70] sm:$0xff] (%p1274_p5)  ;;  %v1310_v0 = vadd.f32 (%p1274_p5), %v1915_v39, %v1290_v59 }
 0x2da   : > { %1317 = vst [vmem:[%s2789_s15 + $0x10] sm:$0xff] (%p1274_p5), %v1301_v45  ;;  %v1306_v57 = vadd.f32 (%p1274_p5), %v1915_v39, %v1286_v53  ;;  %v1293_v1 = vld [vmem:[#allocation2 + $0x78] sm:$0xff] (%p1274_p5)  ;;  %v1311_v2 = vadd.f32 (%p1274_p5), %v1915_v39, %v1291_v61  ;;  %v1294_v3 = vld [vmem:[#allocation2 + $0x28] sm:$0xff] (%p1274_p5)  ;;  %v1312_v4 = vadd.f32 (%p1274_p5), %v1915_v39, %v1292_v63 }
 0x2db   : > { %1318 = vst [vmem:[%s2789_s15 + $0x18] sm:$0xff] %v1302_v48  ;;  %v1313_v5 = vadd.f32 %v1915_v39, %v1293_v1  ;;  %v1314_v6 = vadd.f32 %v1915_v39, %v1294_v3 }
 0x2dc   : > { %1319 = vst [vmem:[%s2789_s15 + $0x20] sm:$0xff] %v1303_v51 }
 0x2dd   : > { %1320 = vst [vmem:[%s2789_s15 + $0x28] sm:$0xff] %v1304_v54 }
 0x2de   : > { %1321 = vst [vmem:[%s2789_s15 + $0x30] sm:$0xff] %v1305_v56 }
 0x2df   : > { %1322 = vst [vmem:[%s2789_s15 + $0x38] sm:$0xff] %v1306_v57 }
 0x2e0   : > { %1323 = vst [vmem:[%s2789_s15 + $0x40] sm:$0xff] %v1307_v58 }
 0x2e1   : > { %1324 = vst [vmem:[%s2789_s15 + $0x48] sm:$0xff] %v1308_v60 }
 0x2e2   : > { %1325 = vst [vmem:[%s2789_s15 + $0x50] sm:$0xff] %v1309_v62 }
 0x2e3   : > { %1326 = vst [vmem:[%s2789_s15 + $0x58] sm:$0xff] %v1310_v0 }
 0x2e4   : > { %1327 = vst [vmem:[%s2789_s15 + $0x60] sm:$0xff] %v1311_v2 }
 0x2e5   : > { %1328 = vst [vmem:[%s2789_s15 + $0x68] sm:$0xff] %v1312_v4 }
 0x2e6   : > { %1329 = vst [vmem:[%s2789_s15 + $0x70] sm:$0xff] %v1313_v5 }
 0x2e7   : > { %1330 = vst [vmem:[%s2789_s15 + $0x78] sm:$0xff] %v1314_v6 }
 0x2e8 PF: > { %s3091_s21 = sld [smem:[#allocation37_spill]]  ;;  %s1346_s5 = sshll.u32 %s2789_s15, 4  ;;  %s1347_s5 = int_to_ptr.vmem [resolvable:$true] %s1346_s5 }
 0x2e9   : > { %s3093_s8 = sld [smem:[#allocation44_spill]]  ;;  %s1332_s12 = scalar_lea.sflag [#allocation9], %s629_s27 }
 0x2ea   : > { %s3094_s1 = sld [smem:[#allocation57_spill]] }
 0x2ee   : > { %s1679_s0 = sshll.u32 %s3091_s21, 7 }
 0x2ef   : > { %p3096_p12 = scmp.ne.s32.totalorder %s3093_s8, 0 }
 0x2f0   : > { %s3095_s20 = smov %s3094_s1  ;;  %s1345_s28 = scalar_lea.hbm %s3094_s1, %s1679_s0 }
 0x2f1   : > { %s1348_s17 = sshll.u32 %s1345_s28, 4  ;;  %s2092_s24 = scalar_lea.hbm %s3095_s20, 256  ;;  %s1349_s17 = int_to_ptr.hbm [resolvable:$true] %s1348_s17 }
 0x2f2   : > { %s2086_s30 = sshra.s32 %s1349_s17, 4  ;;  %s2087_s30 = int_to_ptr.hbm [resolvable:$true] %s2086_s30 }
 0x2f3   : > { %s2088_s4 = scalar_lea.hbm %s2087_s30, 128  ;;  %p2093_p3 = scmp.lt.s32.totalorder %s2087_s30, %s3095_s20 }
 0x2f4   : > { %p2089_p0 = scmp.ne.s32.totalorder %s2087_s30, %s2088_s4  ;;  %p2094_p11 = scmp.lt.s32.totalorder %s2092_s24, %s2088_s4 }
 0x2f6   : > { %p2090_p4 = pnand %p2089_p0, %p3096_p12  ;;  %p2095_p1 = por %p2094_p11, %p2093_p3 }
 0x2f8   : > { %p2091_p13 = pneg %p2090_p4 }
 0x2fa   : > { %p2096_p2 = pnand %p2095_p1, %p2091_p13 }
 0x2fc   : > { %2099 = shalt.err (!%p2096_p2)
}
 0x2fd   : > { %s2291_s27 = smov 128   ;;  %s2292_s15 = smov 8  }
 0x2fe   : > { %1712 = dma.vmem_to_hbm [thread:$0]  (%p3096_p12), %s1347_s5, 2048, %s1349_s17, %s1332_s12, %s2291_s27, %s2291_s27, %s2292_s15  }
 0x2ff PF: > { %s3097_s9 = sld [smem:[#allocation30_spill]]  ;;  %p1740_p9 = scmp.ge.s32.totalorder %s2280_s16, 2 }
 0x300   : > { %s3098_s13 = sld [smem:[#allocation45_spill]] }
 0x305   : > { %s1363_s21 = sand.u32 1, %s3097_s9  }
 0x306   : > { %p3099_p7 = scmp.ne.s32.totalorder %s3098_s13, 0  ;;  %s1364_s11 = scalar_lea.sflag [#allocation9], %s1363_s21 }
 0x308   : > { %p1736_p10 = pnand %p1740_p9, %p3099_p7 }
 0x30a   : > { %p1737_p6 = pneg %p1736_p10 }
 0x30c   : > { %2199 = dma.done.wait (%p1737_p6), %s1364_s11, 2048  }
 0x30d   : > { %2201 = vsyncadd (%p1737_p6), %s1364_s11, 4294965248  ;;  %s49_s16 = sadd.s32 1, %s2280_s16   ;;  %s3102_s0 = sld [smem:[#allocation31_spill]] }
 0x30e   : > { %p2901_p8 = scmp.ge.s32.totalorder %s49_s16, 6   ;;  %s3103_s1 = sld [smem:[#allocation32_spill]] }
 0x30f   : > { %s3104_s21 = sld [smem:[#allocation43_spill]]  ;;  %s3105_s8 = smov %s2713_s2 }
 0x310   : > { %s3106_s19 = sld [smem:[#allocation50_spill]]  ;;  %s3116_s2 = smov %s2220_s22 }
 0x311   : > { %s3107_s27 = sld [smem:[#allocation33_spill]]  ;;  %s3117_s22 = smov %s2224_s23 }
 0x312   : > { %s3108_s28 = sld [smem:[#allocation34_spill]]  ;;  %s3118_s23 = smov %s3105_s8 }
 0x313   : > { %s3109_s29 = sld [smem:[#allocation46_spill]]  ;;  %s3119_s24 = smov %s2232_s25 }
 0x314   : > { %s3110_s5 = sld [smem:[#allocation35_spill]]  ;;  %s3120_s25 = smov %s2236_s26 }
 0x315   : > { %s3111_s11 = sld [smem:[#allocation49_spill]]  ;;  %s3122_s30 = smov %s2256_s10 }
 0x316   : > { %s3112_s12 = sld [smem:[#allocation38_spill]]  ;;  %s3121_s26 = smov %s3106_s19 }
 0x317   : > { %s3113_s13 = sld [smem:[#allocation39_spill]]  ;;  %48 = sbr.rel (!%p2901_p8) target bundleno = 31 (0x1f), region = 144 }
 0x318   : > { %s3114_s14 = sld [smem:[#allocation40_spill]] }
 0x319   : > { %s3115_s15 = sld [smem:[#allocation41_spill]] }
 0x31a   : > { %s3123_s10 = smov %s3110_s5 }
 0x31c   :  { %1370 = vsyncpa [#allocation8], 1 }
 0x31d   :  { %1372 = vsyncpa [#allocation8 + $0x1], 1 }
 0x31e   :  { %1373 = vsyncpa [#allocation11], 1 }
 0x31f   :  { %1375 = vsyncpa [#allocation11 + $0x1], 1 }
 0x320   :  { %1376 = vsyncpa [#allocation14], 1 }
 0x321   :  { %1378 = vsyncpa [#allocation14 + $0x1], 1 }
 0x322   :  { %1379 = vsyncpa [#allocation9], 1 }
 0x323   :  { %1381 = vsyncpa [#allocation9 + $0x1], 1 }

</bundles_post_ra>
